<compile_context>
chip_gen: v7x
topology: tpu7x:2x2x1
jax: 0.10.0
libtpu: 0.0.40
codegen_flags: <defaults>
</compile_context>

<pallas_src>
import numpy as np
import jax
import jax.numpy as jnp
from jax.experimental import pallas as pl
from jax.experimental.pallas import tpu as pltpu


def _erf_poly(x):
    """Abramowitz & Stegun 7.1.26 erf approximation, |error| <= 1.5e-7."""
    a1 = 0.254829592
    a2 = -0.284496736
    a3 = 1.421413741
    a4 = -1.453152027
    a5 = 1.061405429
    p = 0.3275911
    ax = jnp.abs(x)
    # EUP approx reciprocal instead of an f32 VALU divide (EUP slot is ~idle).
    t = pl.reciprocal(1.0 + p * ax, approx=True)
    poly = ((((a5 * t + a4) * t + a3) * t + a2) * t + a1) * t
    y = 1.0 - poly * jnp.exp(-ax * ax)
    return jnp.where(x >= 0, y, -y)


def _gelu_exact(x):
    """GELU matching torch.nn.GELU() (erf form)."""
    return 0.5 * x * (1.0 + _erf_poly(x * 0.7071067811865476))


def mlp_kernel(x_ref, w1_ref, b1_ref, w2_ref, b2_ref, o_ref):
    # x block: (tm, Cin) f32 tokens; weights are bf16, biases f32.
    x = x_ref[...].astype(jnp.bfloat16)

    # fc1 on the MXU: bf16 x bf16 -> f32 accumulation.
    h = jnp.dot(x, w1_ref[...], preferred_element_type=jnp.float32)
    h = h + b1_ref[...]

    # exact (erf-based) GELU — VPU/EUP work, all in f32.
    h = _gelu_exact(h)

    # fc2, again bf16 MXU operands with f32 accumulation.
    out = jnp.dot(h.astype(jnp.bfloat16), w2_ref[...],
                  preferred_element_type=jnp.float32)
    out = out + b2_ref[...]

    o_ref[...] = out.astype(o_ref.dtype)


def _round_up(x, m):
    return (x + m - 1) // m * m


def _choose_tiling(M, H):
    """Pick (tm, M_padded) for the flattened token axis.

    * tm*H*4 (the f32 hidden slab) is kept <= ~4 MiB so GELU temporaries and
      the fc2 operand do not blow VMEM at large H.
    * >= 2 grid steps whenever M >= 256, so the 'parallel' axis can be split
      across both v7x TensorCores.
    * M is padded up to a multiple of tm (sublane/lane aligned, fully
      pipelined blocks even for token counts like 2*197).
    """
    if M < 256:
        tm = _round_up(M, 8)          # single aligned tile
        return tm, tm
    cap = (4 * 1024 * 1024) // (H * 4)              # hidden-slab cap on tm
    cap = max(128, min(1024, (cap // 128) * 128))
    tm = min(cap, _round_up((M + 1) // 2, 128))     # guarantee >= 2 steps
    return tm, _round_up(M, tm)


def _vmem_limit_bytes(tm, Cin, H, Cout):
    x_tile = 2 * tm * Cin * 4              # double-buffered f32 input tile
    out_tile = 2 * tm * Cout * 4           # double-buffered f32 output tile
    weights = (Cin * H + H * Cout) * 2     # bf16, single-buffered
    biases = (H + Cout) * 4
    hidden = 3 * tm * H * 4                # f32 hidden slab + GELU temporaries
    footprint = x_tile + out_tile + weights + biases + hidden
    # Generous headroom, clamped below v7x's 64 MiB physical VMEM.
    return int(min(max(2 * footprint, 32 * 1024 * 1024), 64 * 1024 * 1024))


def mlp_forward(x, w1, b1, w2, b2):
    """x: (..., Cin); w1: (Cin, H); b1: (1, H); w2: (H, Cout); b2: (1, Cout)."""
    lead = x.shape[:-1]
    Cin = x.shape[-1]
    H = w1.shape[1]
    Cout = w2.shape[1]
    M = int(np.prod(lead)) if lead else 1

    x2 = x.reshape(M, Cin)
    tm, M_pad = _choose_tiling(M, H)
    if M_pad != M:
        x2 = jnp.pad(x2, ((0, M_pad - M), (0, 0)))
    grid = (M_pad // tm,)

    # bf16 weights feed the MXU at native rate; biases stay f32 (tiny).
    w1b = w1.astype(jnp.bfloat16)
    w2b = w2.astype(jnp.bfloat16)
    b1f = b1.astype(jnp.float32).reshape(1, H)
    b2f = b2.astype(jnp.float32).reshape(1, Cout)

    out = pl.pallas_call(
        mlp_kernel,
        out_shape=jax.ShapeDtypeStruct((M_pad, Cout), x.dtype),
        grid=grid,
        in_specs=[
            pl.BlockSpec((tm, Cin), lambda i: (i, 0)),
            # Grid-invariant operands: single-buffered (no pointless 2x VMEM).
            pl.BlockSpec((Cin, H), lambda i: (0, 0),
                         pipeline_mode=pl.Buffered(1)),
            pl.BlockSpec((1, H), lambda i: (0, 0),
                         pipeline_mode=pl.Buffered(1)),
            pl.BlockSpec((H, Cout), lambda i: (0, 0),
                         pipeline_mode=pl.Buffered(1)),
            pl.BlockSpec((1, Cout), lambda i: (0, 0),
                         pipeline_mode=pl.Buffered(1)),
        ],
        out_specs=pl.BlockSpec((tm, Cout), lambda i: (i, 0)),
        compiler_params=pltpu.CompilerParams(
            dimension_semantics=("parallel",),
            vmem_limit_bytes=_vmem_limit_bytes(tm, Cin, H, Cout)),
    )(x2, w1b, b1f, w2b, b2f)

    if M_pad != M:
        out = out[:M]
    return out.reshape(*lead, Cout)


def mlp_ref(x, w1, b1, w2, b2):
    """Pure-JAX f32 reference mirroring the PyTorch forward exactly."""
    h = x @ w1 + b1
    h = jax.nn.gelu(h, approximate=False)   # torch.nn.GELU() default (erf)
    return h @ w2 + b2


if __name__ == "__main__":
    # ViT-style Mlp config: in_features=128, hidden_features=512 (mlp_ratio=4),
    # out_features=128; input tokens x: (batch=2, seq=64, channels=128).
    in_features = 128
    hidden_features = 512
    out_features = 128
    B, N = 2, 64

    key = jax.random.PRNGKey(0)
    kx, kw1, kb1, kw2, kb2 = jax.random.split(key, 5)

    x = jax.random.normal(kx, (B, N, in_features), dtype=jnp.float32)
    # torch nn.Linear weights are (out, in); store transposed (in, out).
    w1 = jax.random.normal(kw1, (in_features, hidden_features), jnp.float32) * 0.05
    b1 = jax.random.normal(kb1, (1, hidden_features), jnp.float32) * 0.05
    w2 = jax.random.normal(kw2, (hidden_features, out_features), jnp.float32) * 0.05
    b2 = jax.random.normal(kb2, (1, out_features), jnp.float32) * 0.05

    out = mlp_forward(x, w1, b1, w2, b2)
    out = jax.block_until_ready(out)

    ref = mlp_ref(x, w1, b1, w2, b2)
    # Kernel uses bf16 MXU operands (f32 accumulation), so allow ~1% of
    # quantization error vs. the pure-f32 reference.
    np.testing.assert_allclose(np.asarray(out), np.asarray(ref),
                               rtol=2e-2, atol=2e-2)
    print("KERNEL_OK")
</pallas_src>

<mosaic_0001>
module attributes {stable_mosaic.version = 11 : i64} {
  func.func @mlp_kernel(%arg0: i32, %arg1: memref<128x128xf32, #tpu.memory_space<vmem>>, %arg2: memref<128x512xbf16, #tpu.memory_space<vmem>>, %arg3: memref<1x512xf32, #tpu.memory_space<vmem>>, %arg4: memref<512x128xbf16, #tpu.memory_space<vmem>>, %arg5: memref<1x128xf32, #tpu.memory_space<vmem>>, %arg6: memref<128x128xf32, #tpu.memory_space<vmem>>) attributes {dimension_semantics = [#tpu.dimension_semantics<parallel>], iteration_bounds = array<i64: 1>, scalar_prefetch = 0 : i64, scratch_operands = 0 : i64, tpu.core_type = #tpu.core_type<tc>, window_params = [{transform_indices = @transform_0, window_bounds = array<i64: 128, 128>}, {pipeline_mode = #tpu.pipeline_mode<synchronous>, transform_indices = @transform_1, window_bounds = array<i64: 128, 512>}, {pipeline_mode = #tpu.pipeline_mode<synchronous>, transform_indices = @transform_2, window_bounds = array<i64: 1, 512>}, {pipeline_mode = #tpu.pipeline_mode<synchronous>, transform_indices = @transform_3, window_bounds = array<i64: 512, 128>}, {pipeline_mode = #tpu.pipeline_mode<synchronous>, transform_indices = @transform_4, window_bounds = array<i64: 1, 128>}, {transform_indices = @transform_5, window_bounds = array<i64: 128, 128>}]} {
    %c0 = arith.constant 0 : index
    %c0_0 = arith.constant 0 : index
    %0 = vector.load %arg1[%c0, %c0_0] : memref<128x128xf32, #tpu.memory_space<vmem>>, vector<128x128xf32>
    %1 = arith.truncf %0 : vector<128x128xf32> to vector<128x128xbf16>
    %c0_1 = arith.constant 0 : index
    %c0_2 = arith.constant 0 : index
    %2 = vector.load %arg2[%c0_1, %c0_2] : memref<128x512xbf16, #tpu.memory_space<vmem>>, vector<128x512xbf16>
    %cst = arith.constant dense<0.000000e+00> : vector<128x512xf32>
    %3 = tpu.matmul %1, %2, %cst {dimension_numbers = #tpu.dot_dimension_numbers<[1], [0], [0], [1], [0, 0, 1, 1], [], []>} : vector<128x128xbf16>, vector<128x512xbf16>, vector<128x512xf32> -> vector<128x512xf32>
    %c0_3 = arith.constant 0 : index
    %c0_4 = arith.constant 0 : index
    %4 = vector.load %arg3[%c0_3, %c0_4] : memref<1x512xf32, #tpu.memory_space<vmem>>, vector<1x512xf32>
    %5 = vector.broadcast %4 : vector<1x512xf32> to vector<128x512xf32>
    %6 = arith.addf %3, %5 : vector<128x512xf32>
    %cst_5 = arith.constant 5.000000e-01 : f32
    %7 = vector.broadcast %cst_5 : f32 to vector<128x512xf32>
    %8 = arith.mulf %7, %6 : vector<128x512xf32>
    %cst_6 = arith.constant 0.707106769 : f32
    %9 = vector.broadcast %cst_6 : f32 to vector<128x512xf32>
    %10 = arith.mulf %6, %9 : vector<128x512xf32>
    %11 = math.absf %10 : vector<128x512xf32>
    %cst_7 = arith.constant 0.327591091 : f32
    %12 = vector.broadcast %cst_7 : f32 to vector<128x512xf32>
    %13 = arith.mulf %12, %11 : vector<128x512xf32>
    %cst_8 = arith.constant 1.000000e+00 : f32
    %14 = vector.broadcast %cst_8 : f32 to vector<128x512xf32>
    %15 = arith.addf %14, %13 : vector<128x512xf32>
    %16 = tpu.reciprocal %15 {approx = true} : vector<128x512xf32> -> vector<128x512xf32>
    %cst_9 = arith.constant 1.06140542 : f32
    %17 = vector.broadcast %cst_9 : f32 to vector<128x512xf32>
    %18 = arith.mulf %17, %16 : vector<128x512xf32>
    %cst_10 = arith.constant -1.45315206 : f32
    %19 = vector.broadcast %cst_10 : f32 to vector<128x512xf32>
    %20 = arith.addf %18, %19 : vector<128x512xf32>
    %21 = arith.mulf %20, %16 : vector<128x512xf32>
    %cst_11 = arith.constant 1.42141378 : f32
    %22 = vector.broadcast %cst_11 : f32 to vector<128x512xf32>
    %23 = arith.addf %21, %22 : vector<128x512xf32>
    %24 = arith.mulf %23, %16 : vector<128x512xf32>
    %cst_12 = arith.constant -0.284496725 : f32
    %25 = vector.broadcast %cst_12 : f32 to vector<128x512xf32>
    %26 = arith.addf %24, %25 : vector<128x512xf32>
    %27 = arith.mulf %26, %16 : vector<128x512xf32>
    %cst_13 = arith.constant 0.254829586 : f32
    %28 = vector.broadcast %cst_13 : f32 to vector<128x512xf32>
    %29 = arith.addf %27, %28 : vector<128x512xf32>
    %30 = arith.mulf %29, %16 : vector<128x512xf32>
    %cst_14 = arith.constant 0.000000e+00 : f32
    %31 = vector.broadcast %cst_14 : f32 to vector<128x512xf32>
    %32 = arith.subf %31, %11 : vector<128x512xf32>
    %33 = arith.mulf %32, %11 : vector<128x512xf32>
    %34 = math.exp %33 : vector<128x512xf32>
    %35 = arith.mulf %30, %34 : vector<128x512xf32>
    %cst_15 = arith.constant 1.000000e+00 : f32
    %36 = vector.broadcast %cst_15 : f32 to vector<128x512xf32>
    %37 = arith.subf %36, %35 : vector<128x512xf32>
    %cst_16 = arith.constant 0.000000e+00 : f32
    %38 = vector.broadcast %cst_16 : f32 to vector<128x512xf32>
    %39 = arith.cmpf oge, %10, %38 : vector<128x512xf32>
    %cst_17 = arith.constant 0.000000e+00 : f32
    %40 = vector.broadcast %cst_17 : f32 to vector<128x512xf32>
    %41 = arith.subf %40, %37 : vector<128x512xf32>
    %42 = arith.select %39, %37, %41 : vector<128x512xi1>, vector<128x512xf32>
    %cst_18 = arith.constant 1.000000e+00 : f32
    %43 = vector.broadcast %cst_18 : f32 to vector<128x512xf32>
    %44 = arith.addf %43, %42 : vector<128x512xf32>
    %45 = arith.mulf %8, %44 : vector<128x512xf32>
    %46 = arith.truncf %45 : vector<128x512xf32> to vector<128x512xbf16>
    %c0_19 = arith.constant 0 : index
    %c0_20 = arith.constant 0 : index
    %47 = vector.load %arg4[%c0_19, %c0_20] : memref<512x128xbf16, #tpu.memory_space<vmem>>, vector<512x128xbf16>
    %cst_21 = arith.constant dense<0.000000e+00> : vector<128x128xf32>
    %48 = tpu.matmul %46, %47, %cst_21 {dimension_numbers = #tpu.dot_dimension_numbers<[1], [0], [0], [1], [0, 0, 1, 1], [], []>} : vector<128x512xbf16>, vector<512x128xbf16>, vector<128x128xf32> -> vector<128x128xf32>
    %c0_22 = arith.constant 0 : index
    %c0_23 = arith.constant 0 : index
    %49 = vector.load %arg5[%c0_22, %c0_23] : memref<1x128xf32, #tpu.memory_space<vmem>>, vector<1x128xf32>
    %50 = vector.broadcast %49 : vector<1x128xf32> to vector<128x128xf32>
    %51 = arith.addf %48, %50 : vector<128x128xf32>
    %c0_24 = arith.constant 0 : index
    %c0_25 = arith.constant 0 : index
    %52 = vector.load %arg6[%c0_24, %c0_25] : memref<128x128xf32, #tpu.memory_space<vmem>>, vector<128x128xf32>
    tpu.vector_store %arg6[%c0_24, %c0_25], %51 {strides = array<i32>} : memref<128x128xf32, #tpu.memory_space<vmem>>, vector<128x128xf32>,
    return
  }
  func.func @transform_0(%arg0: i32) -> (i32, i32) {
    %c0_i32 = arith.constant 0 : i32
    %c0_i32_0 = arith.constant 0 : i32
    return %arg0, %c0_i32 : i32, i32
  }
  func.func @transform_1(%arg0: i32) -> (i32, i32) {
    %c0_i32 = arith.constant 0 : i32
    %c0_i32_0 = arith.constant 0 : i32
    %c0_i32_1 = arith.constant 0 : i32
    return %c0_i32, %c0_i32_0 : i32, i32
  }
  func.func @transform_2(%arg0: i32) -> (i32, i32) {
    %c0_i32 = arith.constant 0 : i32
    %c0_i32_0 = arith.constant 0 : i32
    %c0_i32_1 = arith.constant 0 : i32
    return %c0_i32, %c0_i32_0 : i32, i32
  }
  func.func @transform_3(%arg0: i32) -> (i32, i32) {
    %c0_i32 = arith.constant 0 : i32
    %c0_i32_0 = arith.constant 0 : i32
    %c0_i32_1 = arith.constant 0 : i32
    return %c0_i32, %c0_i32_0 : i32, i32
  }
  func.func @transform_4(%arg0: i32) -> (i32, i32) {
    %c0_i32 = arith.constant 0 : i32
    %c0_i32_0 = arith.constant 0 : i32
    %c0_i32_1 = arith.constant 0 : i32
    return %c0_i32, %c0_i32_0 : i32, i32
  }
  func.func @transform_5(%arg0: i32) -> (i32, i32) {
    %c0_i32 = arith.constant 0 : i32
    %c0_i32_0 = arith.constant 0 : i32
    return %arg0, %c0_i32 : i32, i32
  }
}

</mosaic_0001>

<bundles_post_ra>
// kernel: tpu_custom_call.1
= control target key start
LH: loop header
LB: loop body
LE: loop exit
PB: predicated region body
PF: predicated region fallthrough
CT: control target
= control target key end

     0   :  { %10 = vsyncpa [#allocation3], 0  ;;  %s5493_s0 = inlined_call_operand.hbm [shape: f32[128,128], index: 0, kind: input, shape index: {}]   ;;  %s5494_s1 = inlined_call_operand.hbm [shape: bf16[128,512], index: 1, kind: input, shape index: {}]   ;;  %s5495_s2 = inlined_call_operand.vmem [shape: f32[1,512], index: 2, kind: input, shape index: {}]   ;;  %s5496_s3 = inlined_call_operand.hbm [shape: bf16[512,128], index: 3, kind: input, shape index: {}]   ;;  %s5497_s4 = inlined_call_operand.vmem [shape: f32[1,128], index: 4, kind: input, shape index: {}]   ;;  %s5498_s5 = inlined_call_operand.hbm [shape: f32[128,128], index: 5, kind: output, shape index: {}]  }
   0x1   :  { %11 = vsyncpa [#allocation6], 0 }
   0x2   :  { %12 = vsyncpa [#allocation4], 0  ;;  %s3348_s18 = smov [#allocation5]   ;;  %s3254_s22 = scalar_lea.hbm %s5494_s1, 4096 }
   0x3   :  { %s30_s19 = sshll.u32 %s3348_s18, 4  ;;  %p3255_p0 = scmp.ne.s32.totalorder %s5494_s1, %s3254_s22  ;;  %s31_s19 = int_to_ptr.vmem [resolvable:$true] %s30_s19 }
   0x4   :  { %p3258_p1 = scmp.lt.u32.totalorder %s3254_s22, %s5494_s1 }
   0x6   :  { %p3260_p2 = pnand %p3258_p1, %p3255_p0 }
   0x8   :  { %3263 = shalt.err (!%p3260_p2)
}
   0x9   :  { %s3264_s27 = scalar_lea.vmem %s31_s19, 4096  ;;  %p3269_p4 = scmp.lt.s32.totalorder %s31_s19, %s31_s19 }
   0xa   :  { %p3265_p3 = scmp.ne.s32.totalorder %s31_s19, %s3264_s27  ;;  %p3270_p5 = scmp.lt.s32.totalorder %s3264_s27, %s3264_s27 }
   0xc   :  { %p3271_p6 = por %p3270_p5, %p3269_p4 }
   0xe   :  { %p3272_p7 = pnand %p3271_p6, %p3265_p3 }
  0x10   :  { %3275 = shalt.err (!%p3272_p7)
}
  0x11   :  { %s3349_s28 = smov 256   ;;  %s3350_s29 = smov 16  }
  0x12   :  { %36 = dma.hbm_to_vmem [thread:$0]  %s5494_s1, 4096, %s31_s19, [#allocation6], %s3349_s28, %s3349_s28, %s3350_s29  }
  0x13   :  { %s3351_s7 = smov [#allocation2]   ;;  %s3276_s11 = scalar_lea.hbm %s5493_s0, 2048 }
  0x14   :  { %s18_s8 = sshll.u32 %s3351_s7, 4  ;;  %p3277_p8 = scmp.ne.s32.totalorder %s5493_s0, %s3276_s11  ;;  %s19_s8 = int_to_ptr.vmem [resolvable:$true] %s18_s8 }
  0x15   :  { %p3280_p9 = scmp.lt.u32.totalorder %s3276_s11, %s5493_s0 }
  0x17   :  { %p3282_p10 = pnand %p3280_p9, %p3277_p8 }
  0x19   :  { %3285 = shalt.err (!%p3282_p10)
}
  0x1a   :  { %s3286_s16 = scalar_lea.vmem %s19_s8, 2048  ;;  %p3291_p12 = scmp.lt.s32.totalorder %s19_s8, %s19_s8 }
  0x1b   :  { %p3287_p11 = scmp.ne.s32.totalorder %s19_s8, %s3286_s16  ;;  %p3292_p13 = scmp.lt.s32.totalorder %s3286_s16, %s3286_s16 }
  0x1d   :  { %p3293_p0 = por %p3292_p13, %p3291_p12 }
  0x1f   :  { %p3294_p1 = pnand %p3293_p0, %p3287_p11 }
  0x21   :  { %3297 = shalt.err (!%p3294_p1)
}
  0x22   :  { %s3352_s1 = smov 128   ;;  %s3353_s17 = smov 8  }
  0x23   :  { %24 = dma.hbm_to_vmem [thread:$0]  %s5493_s0, 2048, %s19_s8, [#allocation3], %s3352_s1, %s3352_s1, %s3353_s17  }
  0x24   :  { %s3354_s20 = smov [#allocation7]   ;;  %s3298_s24 = scalar_lea.hbm %s5496_s3, 4096 }
  0x25   :  { %s44_s21 = sshll.u32 %s3354_s20, 4  ;;  %p3299_p2 = scmp.ne.s32.totalorder %s5496_s3, %s3298_s24  ;;  %s45_s21 = int_to_ptr.vmem [resolvable:$true] %s44_s21 }
  0x26   :  { %p3302_p3 = scmp.lt.u32.totalorder %s3298_s24, %s5496_s3 }
  0x28   :  { %p3304_p4 = pnand %p3302_p3, %p3299_p2 }
  0x2a   :  { %3307 = shalt.err (!%p3304_p4)
}
  0x2b   :  { %s3308_s29 = scalar_lea.vmem %s45_s21, 4096  ;;  %p3313_p6 = scmp.lt.s32.totalorder %s45_s21, %s45_s21 }
  0x2c   :  { %p3309_p5 = scmp.ne.s32.totalorder %s45_s21, %s3308_s29  ;;  %p3314_p7 = scmp.lt.s32.totalorder %s3308_s29, %s3308_s29 }
  0x2e   :  { %p3315_p8 = por %p3314_p7, %p3313_p6 }
  0x30   :  { %p3316_p9 = pnand %p3315_p8, %p3309_p5 }
  0x32   :  { %3319 = shalt.err (!%p3316_p9)
}
  0x33   :  { %s3355_s0 = smov 64   ;;  %s3356_s30 = smov 4  }
  0x34   :  { %50 = dma.hbm_to_vmem [thread:$0]  %s5496_s3, 4096, %s45_s21, [#allocation6], %s3355_s0, %s3355_s0, %s3356_s30  }
  0x35   :  { %3342 = dma.done.wait [#allocation3], 2048  }
  0x36   :  { %3343 = vsyncadd [#allocation3], 4294965248 }
  0x37   :  { %3344 = dma.done.wait [#allocation6], 8192  }
  0x38   :  { %3345 = vsyncadd [#allocation6], 4294959104  ;;  %v3357_v0 = vmov 0   ;;  %v2918_v1 = vld [vmem:[#allocation5 + $0x4] ss:$16 sps:$4 sm:$0xff]   ;;  %v64_v34 = vld [vmem:[#allocation2 + $0x8] sm:$0xff] }
  0x39   :  { %333 = vmatprep.mubr.bf16.mxu0 %v3357_v0  ;;  %446 = vmatprep.mubr.bf16.mxu1 %v3357_v0  ;;  %v2920_v2 = vld [vmem:[#allocation5 + $0xc] ss:$16 sps:$4 sm:$0xff]   ;;  %v2922_v3 = vld [vmem:[#allocation5] ss:$16 sps:$4 sm:$0xff]   ;;  %v2923_v4 = vld [vmem:[#allocation5 + $0x8] ss:$16 sps:$4 sm:$0xff]  }
  0x3a   :  { %301 = vmatprep.subr.bf16.mxu0 %v2918_v1  ;;  %414 = vmatprep.subr.bf16.mxu1 %v2920_v2  ;;  %v2924_v5 = vld [vmem:[#allocation5 + $0x24] ss:$16 sps:$4 sm:$0xff]   ;;  %v2926_v6 = vld [vmem:[#allocation5 + $0x2c] ss:$16 sps:$4 sm:$0xff]   ;;  %v2928_v7 = vld [vmem:[#allocation5 + $0x20] ss:$16 sps:$4 sm:$0xff]  }
  0x3b   :  { %302 = vmatpush1.bf16.msra.mxu0 %v2922_v3  ;;  %415 = vmatpush1.bf16.msra.mxu1 %v2923_v4  ;;  %v2929_v8 = vld [vmem:[#allocation5 + $0x28] ss:$16 sps:$4 sm:$0xff]   ;;  %v2930_v9 = vld [vmem:[#allocation5 + $0x44] ss:$16 sps:$4 sm:$0xff]   ;;  %v2932_v10 = vld [vmem:[#allocation5 + $0x4c] ss:$16 sps:$4 sm:$0xff]  }
  0x3c   :  { %303 = vmatprep.subr.bf16.mxu0 %v2924_v5  ;;  %416 = vmatprep.subr.bf16.mxu1 %v2926_v6  ;;  %v2934_v11 = vld [vmem:[#allocation5 + $0x40] ss:$16 sps:$4 sm:$0xff]   ;;  %v2935_v12 = vld [vmem:[#allocation5 + $0x48] ss:$16 sps:$4 sm:$0xff]   ;;  %v2936_v13 = vld [vmem:[#allocation5 + $0x64] ss:$16 sps:$4 sm:$0xff]   ;;  %v121_v5 = vlaneseq }
  0x3d   :  { %v2938_v14 = vld [vmem:[#allocation5 + $0x6c] ss:$16 sps:$4 sm:$0xff]   ;;  %v2940_v15 = vld [vmem:[#allocation5 + $0x60] ss:$16 sps:$4 sm:$0xff]   ;;  %v2941_v16 = vld [vmem:[#allocation5 + $0x68] ss:$16 sps:$4 sm:$0xff]  }
  0x3e   :  { %v2942_v17 = vld [vmem:[#allocation5 + $0x84] ss:$16 sps:$4 sm:$0xff]   ;;  %v2944_v18 = vld [vmem:[#allocation5 + $0x8c] ss:$16 sps:$4 sm:$0xff]   ;;  %v2946_v19 = vld [vmem:[#allocation5 + $0x80] ss:$16 sps:$4 sm:$0xff]  }
  0x3f   :  { %304 = vmatpush1.bf16.msra.mxu0 %v2928_v7  ;;  %417 = vmatpush1.bf16.msra.mxu1 %v2929_v8  ;;  %v2947_v20 = vld [vmem:[#allocation5 + $0x88] ss:$16 sps:$4 sm:$0xff]   ;;  %v2948_v21 = vld [vmem:[#allocation5 + $0xa4] ss:$16 sps:$4 sm:$0xff]   ;;  %v2950_v22 = vld [vmem:[#allocation5 + $0xac] ss:$16 sps:$4 sm:$0xff]  }
  0x40   :  { %305 = vmatprep.subr.bf16.mxu0 %v2930_v9  ;;  %418 = vmatprep.subr.bf16.mxu1 %v2932_v10  ;;  %v2952_v23 = vld [vmem:[#allocation5 + $0xa0] ss:$16 sps:$4 sm:$0xff]   ;;  %v2953_v24 = vld [vmem:[#allocation5 + $0xa8] ss:$16 sps:$4 sm:$0xff]   ;;  %v2954_v25 = vld [vmem:[#allocation5 + $0xc4] ss:$16 sps:$4 sm:$0xff]  }
  0x41   :  { %v2956_v26 = vld [vmem:[#allocation5 + $0xcc] ss:$16 sps:$4 sm:$0xff]   ;;  %v2958_v27 = vld [vmem:[#allocation5 + $0xc0] ss:$16 sps:$4 sm:$0xff]   ;;  %v2959_v28 = vld [vmem:[#allocation5 + $0xc8] ss:$16 sps:$4 sm:$0xff]  }
  0x42   :  { %v2960_v29 = vld [vmem:[#allocation5 + $0xe4] ss:$16 sps:$4 sm:$0xff]   ;;  %v2962_v30 = vld [vmem:[#allocation5 + $0xec] ss:$16 sps:$4 sm:$0xff]   ;;  %v2964_v31 = vld [vmem:[#allocation5 + $0xe0] ss:$16 sps:$4 sm:$0xff]  }
  0x43   :  { %306 = vmatpush1.bf16.msra.mxu0 %v2934_v11  ;;  %419 = vmatpush1.bf16.msra.mxu1 %v2935_v12  ;;  %v2965_v32 = vld [vmem:[#allocation5 + $0xe8] ss:$16 sps:$4 sm:$0xff]   ;;  %v63_v33 = vld [vmem:[#allocation2] sm:$0xff]  ;;  %v65_v40 = vld [vmem:[#allocation2 + $0x10] sm:$0xff]  ;;  %v122_v6 = vshrl.u32 %v121_v5, 7 }
  0x44   :  { %307 = vmatprep.subr.bf16.mxu0 %v2936_v13  ;;  %420 = vmatprep.subr.bf16.mxu1 %v2938_v14  ;;  %v2966_v35 = vld [vmem:[#allocation7 + $0x40] sm:$0xff]   ;;  %v79_v37 = vpack.c.bf16 %v64_v34, %v63_v33  ;;  %v66_v41 = vld [vmem:[#allocation2 + $0x18] sm:$0xff]  ;;  %v68_v44 = vld [vmem:[#allocation2 + $0x28] sm:$0xff] }
  0x45   :  { %v2968_v36 = vld [vmem:[#allocation7 + $0xc0] sm:$0xff]   ;;  %v80_v42 = vpack.c.bf16 %v66_v41, %v65_v40  ;;  %v69_v46 = vld [vmem:[#allocation2 + $0x30] sm:$0xff]  ;;  %v70_v47 = vld [vmem:[#allocation2 + $0x38] sm:$0xff]  ;;  %v123_v8 = vsub.s32 0, %v122_v6  ;;  %v131_v9 = vsub.s32 2, %v122_v6  ;;  %v127_v13 = vsub.s32 1, %v122_v6 }
  0x46   :  { %v2967_v38 = vld [vmem:[#allocation7] sm:$0xff]   ;;  %v82_v48 = vpack.c.bf16 %v70_v47, %v69_v46  ;;  %v72_v50 = vld [vmem:[#allocation2 + $0x48] sm:$0xff]  ;;  %v73_v52 = vld [vmem:[#allocation2 + $0x50] sm:$0xff]  ;;  %v135_v14 = vsub.s32 3, %v122_v6 }
  0x47   :  { %308 = vmatpush1.bf16.msra.mxu0 %v2940_v15  ;;  %421 = vmatpush1.bf16.msra.mxu1 %v2941_v16  ;;  %v2969_v39 = vld [vmem:[#allocation7 + $0x80] sm:$0xff]   ;;  %v74_v53 = vld [vmem:[#allocation2 + $0x58] sm:$0xff]  ;;  %v76_v56 = vld [vmem:[#allocation2 + $0x68] sm:$0xff] }
  0x48   :  { %309 = vmatprep.subr.bf16.mxu0 %v2942_v17  ;;  %422 = vmatprep.subr.bf16.mxu1 %v2944_v18  ;;  %v67_v43 = vld [vmem:[#allocation2 + $0x20] sm:$0xff]  ;;  %v84_v54 = vpack.c.bf16 %v74_v53, %v73_v52  ;;  %v77_v58 = vld [vmem:[#allocation2 + $0x70] sm:$0xff]  ;;  %v78_v59 = vld [vmem:[#allocation2 + $0x78] sm:$0xff] }
  0x49   :  { %v81_v45 = vpack.c.bf16 %v68_v44, %v67_v43  ;;  %v71_v49 = vld [vmem:[#allocation2 + $0x40] sm:$0xff]  ;;  %v86_v60 = vpack.c.bf16 %v78_v59, %v77_v58  ;;  %v2970_v61 = vld [vmem:[#allocation7 + $0x48] sm:$0xff]   ;;  %v2974_v2 = vld [vmem:[#allocation7 + $0x50] sm:$0xff]  }
  0x4a   :  { %v83_v51 = vpack.c.bf16 %v72_v50, %v71_v49  ;;  %v75_v55 = vld [vmem:[#allocation2 + $0x60] sm:$0xff]  ;;  %v2971_v62 = vld [vmem:[#allocation7 + $0x8] sm:$0xff]   ;;  %v2975_v3 = vld [vmem:[#allocation7 + $0x10] sm:$0xff]  }
  0x4b   :  { %310 = vmatpush1.bf16.msra.mxu0 %v2946_v19  ;;  %423 = vmatpush1.bf16.msra.mxu1 %v2947_v20  ;;  %v85_v57 = vpack.c.bf16 %v76_v56, %v75_v55  ;;  %v2972_v63 = vld [vmem:[#allocation7 + $0xc8] sm:$0xff]   ;;  %v2976_v4 = vld [vmem:[#allocation7 + $0xd0] sm:$0xff]   ;;  %v2978_v7 = vld [vmem:[#allocation7 + $0x58] sm:$0xff]  }
  0x4c   :  { %311 = vmatprep.subr.bf16.mxu0 %v2948_v21  ;;  %424 = vmatprep.subr.bf16.mxu1 %v2950_v22  ;;  %v2973_v1 = vld [vmem:[#allocation7 + $0x88] sm:$0xff]   ;;  %v119_v10 = vld [vmem:[%s5495_s2] sm:$0xf]  ;;  %v2979_v40 = vld [vmem:[#allocation7 + $0x18] sm:$0xff]  }
  0x4d   :  { %v3447_v11 = vrot.slane %v119_v10, %v123_v8  ;;  %v3449_v12 = vrot.slane %v119_v10, %v131_v9  ;;  %v3457_v19 = vrot.slane %v119_v10, %v127_v13  ;;  %v2980_v13 = vld [vmem:[#allocation7 + $0xd8] sm:$0xff]  }
  0x4f   :  { %312 = vmatpush1.bf16.msra.mxu0 %v2952_v23  ;;  %425 = vmatpush1.bf16.msra.mxu1 %v2953_v24 }
  0x50   :  { %313 = vmatprep.subr.bf16.mxu0 %v2954_v25  ;;  %426 = vmatprep.subr.bf16.mxu1 %v2956_v26  ;;  %v3465_v26 = vrot.slane %v119_v10, %v135_v14 }
  0x53   :  { %314 = vmatpush1.bf16.msra.mxu0 %v2958_v27  ;;  %427 = vmatpush1.bf16.msra.mxu1 %v2959_v28 }
  0x54   :  { %315 = vmatprep.subr.bf16.mxu0 %v2960_v29  ;;  %428 = vmatprep.subr.bf16.mxu1 %v2962_v30 }
  0x57   :  { %316 = vmatpush1.bf16.msra.mxu0 %v2964_v31  ;;  %429 = vmatpush1.bf16.msra.mxu1 %v2965_v32 }
  0x58   :  { %2779 = vmatprep.subr.bf16.mxu0 %v2966_v35  ;;  %2843 = vmatprep.subr.bf16.mxu1 %v2968_v36 }
  0x5a   :  { %334 = vmatmul.mubr.bf16.vlgmr.msra.gmra.mrb[0].mxu0 %v79_v37  ;;  %447 = vmatmul.mubr.bf16.vlgmr.msra.gmra.mrb[0].mxu1 %v79_v37 }
  0x5b   :  { %343 = vmatprep.mubr.bf16.mxu0 %v3357_v0  ;;  %456 = vmatprep.mubr.bf16.mxu1 %v3357_v0 }
  0x5c   :  { %2780 = vmatpush3.bf16.msra.mxu0 %v2967_v38  ;;  %2844 = vmatpush3.bf16.msra.mxu1 %v2969_v39 }
  0x5d   :  { %2781 = vmatprep.subr.bf16.mxu0 %v2970_v61  ;;  %2845 = vmatprep.subr.bf16.mxu1 %v2972_v63 }
  0x60   :  { %2782 = vmatpush3.bf16.msra.mxu0 %v2971_v62  ;;  %2846 = vmatpush3.bf16.msra.mxu1 %v2973_v1 }
  0x61   :  { %2783 = vmatprep.subr.bf16.mxu0 %v2974_v2  ;;  %2847 = vmatprep.subr.bf16.mxu1 %v2976_v4 }
  0x62   :  { %344 = vmatmul.mubr.bf16.gmra.mrb[4].mxu0 %v80_v42  ;;  %457 = vmatmul.mubr.bf16.gmra.mrb[4].mxu1 %v80_v42 }
  0x63   :  { %353 = vmatprep.mubr.bf16.mxu0 %v3357_v0  ;;  %466 = vmatprep.mubr.bf16.mxu1 %v3357_v0 }
  0x64   :  { %2784 = vmatpush3.bf16.msra.mxu0 %v2975_v3 }
  0x65   :  { %2785 = vmatprep.subr.bf16.mxu0 %v2978_v7 }
  0x68   :  { %2786 = vmatpush3.bf16.msra.mxu0 %v2979_v40 }
  0x6a   :  { %354 = vmatmul.mubr.bf16.gmra.mrb[8].mxu0 %v81_v45  ;;  %467 = vmatmul.mubr.bf16.gmra.mrb[8].mxu1 %v81_v45 }
  0x6b   :  { %363 = vmatprep.mubr.bf16.mxu0 %v3357_v0  ;;  %476 = vmatprep.mubr.bf16.mxu1 %v3357_v0 }
  0x72   :  { %364 = vmatmul.mubr.bf16.gmra.mrb[12].mxu0 %v82_v48  ;;  %477 = vmatmul.mubr.bf16.gmra.mrb[12].mxu1 %v82_v48 }
  0x73   :  { %373 = vmatprep.mubr.bf16.mxu0 %v3357_v0  ;;  %486 = vmatprep.mubr.bf16.mxu1 %v3357_v0 }
  0x7a   :  { %374 = vmatmul.mubr.bf16.gmra.mrb[16].mxu0 %v83_v51  ;;  %487 = vmatmul.mubr.bf16.gmra.mrb[16].mxu1 %v83_v51 }
  0x7b   :  { %383 = vmatprep.mubr.bf16.mxu0 %v3357_v0  ;;  %496 = vmatprep.mubr.bf16.mxu1 %v3357_v0 }
  0x82   :  { %384 = vmatmul.mubr.bf16.gmra.mrb[20].mxu0 %v84_v54  ;;  %497 = vmatmul.mubr.bf16.gmra.mrb[20].mxu1 %v84_v54 }
  0x83   :  { %393 = vmatprep.mubr.bf16.mxu0 %v3357_v0  ;;  %506 = vmatprep.mubr.bf16.mxu1 %v3357_v0 }
  0x8a   :  { %394 = vmatmul.mubr.bf16.gmra.mrb[24].mxu0 %v85_v57  ;;  %507 = vmatmul.mubr.bf16.gmra.mrb[24].mxu1 %v85_v57 }
  0x8b   :  { %403 = vmatprep.mubr.bf16.mxu0 %v3357_v0  ;;  %516 = vmatprep.mubr.bf16.mxu1 %v3357_v0  ;;  %v2977_v0 = vld [vmem:[#allocation7 + $0x90] sm:$0xff]  }
  0x8c   :  { %2848 = vmatpush3.bf16.msra.mxu1 %v2977_v0 }
  0x8d   :  { %2849 = vmatprep.subr.bf16.mxu1 %v2980_v13 }
  0x92   :  { %404 = vmatmul.mubr.bf16.gmra.mrb[28].mxu0 %v86_v60  ;;  %517 = vmatmul.mubr.bf16.gmra.mrb[28].mxu1 %v86_v60 }
 0x12d   :  { %v335_v15 = vpop.f32.mrb[0].mxu0  ;;  %v448_v16 = vpop.f32.mrb[0].mxu1 }
 0x12e   :  { %v3452_v17 = vadd.f32 %v335_v15, %v3447_v11  ;;  %v3455_v18 = vadd.f32 %v448_v16, %v3449_v12  ;;  %v337_v20 = vpop.f32.mrb[1].mxu0  ;;  %v450_v21 = vpop.f32.mrb[1].mxu1 }
 0x12f   :  { %v339_v22 = vpop.f32.mrb[2].mxu0  ;;  %v452_v23 = vpop.f32.mrb[2].mxu1  ;;  %v3470_v29 = vadd.f32 %v337_v20, %v3457_v19  ;;  %v3473_v32 = vadd.f32 %v450_v21, %v3465_v26 }
 0x130   :  { %v3460_v24 = vmul.f32 0.70710677, %v3452_v17  ;;  %v3463_v25 = vmul.f32 0.70710677, %v3455_v18  ;;  %v341_v36 = vpop.f32.mrb[3].mxu0  ;;  %v454_v37 = vpop.f32.mrb[3].mxu1  ;;  %v3484_v42 = vadd.f32 %v339_v22, %v3447_v11  ;;  %v3491_v45 = vadd.f32 %v452_v23, %v3449_v12 }
 0x131   :  { %v3476_v35 = vmul.f32 0.70710677, %v3470_v29  ;;  %v3481_v41 = vmul.f32 0.70710677, %v3473_v32  ;;  %v3504_v50 = vadd.f32 %v341_v36, %v3457_v19  ;;  %v3520_v56 = vadd.f32 %v454_v37, %v3465_v26 }
 0x132   :  { %v655_v27 = vand.u32 2147483647, %v3460_v24  ;;  %v657_v28 = vand.u32 2147483647, %v3463_v25  ;;  %v3501_v49 = vmul.f32 0.70710677, %v3484_v42 }
 0x133   :  { %v3498_v48 = vand.u32 2147483647, %v3476_v35  ;;  %v3511_v53 = vmul.f32 0.70710677, %v3491_v45  ;;  %v3514_v54 = vand.u32 2147483647, %v3481_v41 }
 0x134   :  { %v719_v30 = vmul.f32 0.3275911, %v655_v27  ;;  %v721_v31 = vmul.f32 0.3275911, %v657_v28  ;;  %v3517_v55 = vand.u32 2147483647, %v3501_v49 }
 0x135   :  { %v345_v38 = vpop.f32.mrb[4].mxu0  ;;  %v3478_v39 = vpop.f32.mrb[4].mxu1  ;;  %v1487_v57 = vsub.f32 0.0, %v655_v27  ;;  %v3523_v58 = vand.u32 2147483647, %v3511_v53  ;;  %v1489_v2 = vsub.f32 0.0, %v657_v28 }
 0x136   :  { %v783_v33 = vadd.f32 1.0, %v719_v30  ;;  %v785_v34 = vadd.f32 1.0, %v721_v31  ;;  %v3486_v43 = vpop.f32.mrb[5].mxu0  ;;  %v3488_v44 = vpop.f32.mrb[5].mxu1  ;;  %v3526_v59 = vmul.f32 0.70710677, %v3504_v50  ;;  %v3565_v40 = vadd.f32 %v345_v38, %v3447_v11 }
 0x137   :  { %v3493_v46 = vpop.f32.mrb[6].mxu0  ;;  %v3495_v47 = vpop.f32.mrb[6].mxu1  ;;  %v720_v61 = vmul.f32 0.3275911, %v3498_v48  ;;  %v723_v62 = vmul.f32 0.3275911, %v3517_v55  ;;  %v1551_v9 = vmul.f32 %v1487_v57, %v655_v27  ;;  %v1553_v30 = vmul.f32 %v1489_v2, %v657_v28 }
 0x138   :  { %2998 = vrcp.f32 %v783_v33  ;;  %v3506_v51 = vpop.f32.mrb[7].mxu0  ;;  %v3508_v52 = vpop.f32.mrb[7].mxu1  ;;  %v725_v3 = vmul.f32 0.3275911, %v3523_v58  ;;  %v3538_v4 = vand.u32 2147483647, %v3526_v59 }
 0x139   :  { %3000 = vrcp.f32 %v785_v34  ;;  %v787_v5 = vadd.f32 1.0, %v723_v62  ;;  %v3543_v6 = vmul.f32 0.70710677, %v3520_v56  ;;  %v784_v16 = vadd.f32 1.0, %v720_v61  ;;  %v2981_v34 = vld [vmem:[#allocation7 + $0x98] sm:$0xff]   ;;  %5542 = vst [vmem:[#allocation18_spill] sm:$0xff] %v3565_v40 }
 0x13a   :  { %v789_v10 = vadd.f32 1.0, %v725_v3  ;;  %v722_v20 = vmul.f32 0.3275911, %v3514_v54  ;;  %v724_v33 = vmul.f32 0.3275911, %v3538_v4  ;;  %2850 = vmatpush3.bf16.msra.mxu1 %v2981_v34  ;;  %v1491_v38 = vsub.f32 0.0, %v3517_v55 }
 0x13b   :  { %3002 = vrcp.f32 %v787_v5  ;;  %v3560_v27 = vand.u32 2147483647, %v3543_v6  ;;  %v1615_v37 = vmul.f32 1.442695, %v1551_v9  ;;  %v1619_v5 = vmul.f32 1.442695, %v1553_v30 }
 0x13c   :  { %3004 = vrcp.f32 %v789_v10  ;;  %v786_v62 = vadd.f32 1.0, %v722_v20  ;;  %v788_v13 = vadd.f32 1.0, %v724_v33  ;;  %vm1871_vm0 = vcmp.ge.f32.partialorder %v3460_v24, 0.0 }
 0x13d   :  { %v3528_v60 = vpop.f32.mrb[8].mxu0  ;;  %v3532_v63 = vpop.f32.mrb[8].mxu1  ;;  %3006 = vrcp.f32 %v784_v16  ;;  %v726_v10 = vmul.f32 0.3275911, %v3560_v27  ;;  %v3579_v16 = vmul.f32 0.70710677, %v3565_v40 }
 0x13e   :  { %v3534_v1 = vpop.f32.mrb[9].mxu0  ;;  %v3540_v0 = vpop.f32.mrb[9].mxu1  ;;  %3008 = vpow2.f32 %v1615_v37  ;;  %vm1873_vm1 = vcmp.ge.f32.partialorder %v3463_v25, 0.0  ;;  %vm1875_vm2 = vcmp.ge.f32.partialorder %v3501_v49, 0.0  ;;  %vm1877_vm3 = vcmp.ge.f32.partialorder %v3511_v53, 0.0 }
 0x13f   :  { %5536 = vst [vmem:[#allocation12_spill] sm:$0xff] %v3534_v1  ;;  %5537 = vst [vmem:[#allocation13_spill] sm:$0xff] %v3540_v0  ;;  %v3545_v7 = vpop.f32.mrb[10].mxu0  ;;  %v3547_v8 = vpop.f32.mrb[10].mxu1  ;;  %3010 = vrcp.f32 %v786_v62  ;;  %v790_v30 = vadd.f32 1.0, %v726_v10  ;;  %v2982_v10 = vld [vmem:[#allocation7 + $0x60] sm:$0xff]   ;;  %v3659_v49 = vadd.f32 %v3486_v43, %v3457_v19 }
 0x140   :  { %5538 = vst [vmem:[#allocation14_spill] sm:$0xff] %v3545_v7  ;;  %5539 = vst [vmem:[#allocation15_spill] sm:$0xff] %v3547_v8  ;;  %v3549_v14 = vpop.f32.mrb[11].mxu0  ;;  %v3554_v21 = vpop.f32.mrb[11].mxu1  ;;  %3012 = vpow2.f32 %v1619_v5  ;;  %v3591_v62 = vand.u32 2147483647, %v3579_v16  ;;  %2787 = vmatprep.subr.bf16.mxu0 %v2982_v10 }
 0x141   :  { %5540 = vst [vmem:[#allocation16_spill] sm:$0xff] %v3549_v14  ;;  %5541 = vst [vmem:[#allocation17_spill] sm:$0xff] %v3554_v21  ;;  %3014 = vrcp.f32 %v788_v13  ;;  %vm1872_vm4 = vcmp.ge.f32.partialorder %v3476_v35, 0.0  ;;  %vm1874_vm5 = vcmp.ge.f32.partialorder %v3481_v41, 0.0  ;;  %vm1876_vm6 = vcmp.ge.f32.partialorder %v3526_v59, 0.0 }
 0x142   :  { %v3551_v15 = vpop.eup %2998  ;;  %5546 = vst [vmem:[#allocation22_spill] sm:$0xff] %v3579_v16  ;;  %3016 = vrcp.f32 %v790_v30  ;;  %v727_v21 = vmul.f32 0.3275911, %v3591_v62  ;;  %v3636_v16 = vadd.f32 %v3478_v39, %v3449_v12  ;;  %vm1878_vm7 = vcmp.ge.f32.partialorder %v3543_v6, 0.0 }
 0x143   :  { %v3556_v22 = vpop.eup %3000  ;;  %v911_v23 = vmul.f32 1.0614054, %v3551_v15 }
 0x144   :  { %v913_v31 = vmul.f32 1.0614054, %v3556_v22 }
 0x145   :  { %v975_v36 = vadd.f32 -1.4531521, %v911_v23  ;;  %v3567_v57 = vpop.f32.mrb[12].mxu0  ;;  %v3569_v61 = vpop.f32.mrb[12].mxu1 }
 0x146   :  { %5543 = vst [vmem:[#allocation19_spill] sm:$0xff] %v3567_v57  ;;  %5544 = vst [vmem:[#allocation20_spill] sm:$0xff] %v3569_v61  ;;  %v977_v28 = vadd.f32 -1.4531521, %v913_v31  ;;  %v3571_v2 = vpop.f32.mrb[13].mxu0  ;;  %v1493_v61 = vsub.f32 0.0, %v3523_v58  ;;  %v3582_v34 = vpop.eup %3002 }
 0x147   :  { %5545 = vst [vmem:[#allocation21_spill] sm:$0xff] %v3571_v2  ;;  %v1039_v3 = vmul.f32 %v3551_v15, %v975_v36  ;;  %v3586_v33 = vpop.eup %3004  ;;  %v3613_v1 = vpop.f32.mrb[14].mxu0 }
 0x148   :  { %v1041_v9 = vmul.f32 %v3556_v22, %v977_v28  ;;  %v1555_v28 = vmul.f32 %v1491_v38, %v3517_v55  ;;  %v1557_v2 = vmul.f32 %v1493_v61, %v3523_v58  ;;  %v917_v5 = vmul.f32 1.0614054, %v3586_v33  ;;  %v3595_v55 = vpop.f32.mrb[13].mxu1  ;;  %v3597_v38 = vpop.eup %3006  ;;  %5548 = vst [vmem:[#allocation24_spill] sm:$0xff] %v3613_v1 }
 0x149   :  { %v1103_v23 = vadd.f32 1.4214138, %v1039_v3  ;;  %v915_v3 = vmul.f32 1.0614054, %v3582_v34  ;;  %5547 = vst [vmem:[#allocation23_spill] sm:$0xff] %v3595_v55 }
 0x14a   :  { %v1105_v20 = vadd.f32 1.4214138, %v1041_v9  ;;  %v981_v57 = vadd.f32 -1.4531521, %v917_v5  ;;  %v912_v55 = vmul.f32 1.0614054, %v3597_v38 }
 0x14b   :  { %v1167_v31 = vmul.f32 %v3551_v15, %v1103_v23 }
 0x14c   :  { %v1169_v36 = vmul.f32 %v3556_v22, %v1105_v20  ;;  %v979_v20 = vadd.f32 -1.4531521, %v915_v3  ;;  %v3009_v3 = vpop.eup %3008 }
 0x14d   :  { %v1231_v37 = vadd.f32 -0.28449672, %v1167_v31  ;;  %v1623_v31 = vmul.f32 1.442695, %v1555_v28  ;;  %v3605_v7 = vpop.eup %3010 }
 0x14e   :  { %v1233_v9 = vadd.f32 -0.28449672, %v1169_v36  ;;  %v1043_v61 = vmul.f32 %v3582_v34, %v979_v20  ;;  %v1627_v36 = vmul.f32 1.442695, %v1557_v2  ;;  %v3013_v5 = vpop.eup %3012 }
 0x14f   :  { %v1295_v23 = vmul.f32 %v3551_v15, %v1231_v37  ;;  %v1045_v37 = vmul.f32 %v3586_v33, %v981_v57  ;;  %3018 = vpow2.f32 %v1623_v31  ;;  %v3609_v20 = vpop.eup %3014 }
 0x150   :  { %v1297_v13 = vmul.f32 %v3556_v22, %v1233_v9  ;;  %v1107_v8 = vadd.f32 1.4214138, %v1043_v61  ;;  %3020 = vpow2.f32 %v1627_v36  ;;  %v1488_v36 = vsub.f32 0.0, %v3498_v48 }
 0x151   :  { %v1359_v58 = vadd.f32 0.2548296, %v1295_v23  ;;  %v1109_v9 = vadd.f32 1.4214138, %v1045_v37  ;;  %v791_v23 = vadd.f32 1.0, %v727_v21 }
 0x152   :  { %v1361_v14 = vadd.f32 0.2548296, %v1297_v13  ;;  %v1171_v2 = vmul.f32 %v3582_v34, %v1107_v8  ;;  %v976_v13 = vadd.f32 -1.4531521, %v912_v55  ;;  %v916_v8 = vmul.f32 1.0614054, %v3609_v20 }
 0x153   :  { %v1423_v30 = vmul.f32 %v3551_v15, %v1359_v58  ;;  %v1173_v15 = vmul.f32 %v3586_v33, %v1109_v9  ;;  %v914_v58 = vmul.f32 1.0614054, %v3605_v7  ;;  %3022 = vrcp.f32 %v791_v23 }
 0x154   :  { %v1425_v28 = vmul.f32 %v3556_v22, %v1361_v14  ;;  %v1235_v61 = vadd.f32 -0.28449672, %v1171_v2  ;;  %v3615_v14 = vpop.eup %3016  ;;  %v527_v55 = vmul.f32 0.5, %v3452_v17  ;;  %v529_v9 = vmul.f32 0.5, %v3455_v18  ;;  %v3631_v18 = vpop.f32.mrb[14].mxu1 }
 0x155   :  { %v1743_v10 = vmul.f32 %v3009_v3, %v1423_v30  ;;  %v1237_v0 = vadd.f32 -0.28449672, %v1173_v15  ;;  %v1040_v3 = vmul.f32 %v3597_v38, %v976_v13  ;;  %v978_v30 = vadd.f32 -1.4531521, %v914_v58  ;;  %5549 = vst [vmem:[#allocation25_spill] sm:$0xff] %v3631_v18  ;;  %v3677_v53 = vpop.f32.mrb[15].mxu1 }
 0x156   :  { %v1745_v57 = vmul.f32 %v3013_v5, %v1425_v28  ;;  %v1299_v31 = vmul.f32 %v3582_v34, %v1235_v61  ;;  %v1490_v5 = vsub.f32 0.0, %v3514_v54  ;;  %v918_v2 = vmul.f32 1.0614054, %v3615_v14  ;;  %5553 = vst [vmem:[#allocation29_spill] sm:$0xff] %v3677_v53 }
 0x157   :  { %v1807_v22 = vsub.f32 1.0, %v1743_v10  ;;  %v1301_v37 = vmul.f32 %v3586_v33, %v1237_v0  ;;  %v980_v15 = vadd.f32 -1.4531521, %v916_v8  ;;  %v1552_v13 = vmul.f32 %v1488_v36, %v3498_v48 }
 0x158   :  { %v1809_v21 = vsub.f32 1.0, %v1745_v57  ;;  %v1363_v28 = vadd.f32 0.2548296, %v1299_v31  ;;  %v1104_v31 = vadd.f32 1.4214138, %v1040_v3  ;;  %v531_v8 = vmul.f32 0.5, %v3484_v42 }
 0x159   :  { %v1365_v10 = vadd.f32 0.2548296, %v1301_v37  ;;  %v1935_v23 = vsub.f32 0.0, %v1807_v22  ;;  %v3019_v0 = vpop.eup %3018  ;;  %v1042_v37 = vmul.f32 %v3605_v7, %v978_v30  ;;  %v982_v40 = vadd.f32 -1.4531521, %v918_v2 }
 0x15a   :  { %v1427_v57 = vmul.f32 %v3582_v34, %v1363_v28  ;;  %v1937_v17 = vsub.f32 0.0, %v1809_v21  ;;  %v3021_v61 = vpop.eup %3020  ;;  %v1554_v34 = vmul.f32 %v1490_v5, %v3514_v54  ;;  %v533_v36 = vmul.f32 0.5, %v3491_v45  ;;  %v3654_v45 = vpop.f32.mrb[15].mxu0 }
 0x15b   :  { %v1429_v58 = vmul.f32 %v3586_v33, %v1365_v10  ;;  %v1999_v48 = vsel %vm1871_vm0, %v1807_v22, %v1935_v23  ;;  %v1044_v3 = vmul.f32 %v3609_v20, %v980_v15  ;;  %v1168_v42 = vmul.f32 %v3597_v38, %v1104_v31  ;;  %5550 = vst [vmem:[#allocation26_spill] sm:$0xff] %v3654_v45 }
 0x15c   :  { %v1747_v1 = vmul.f32 %v3019_v0, %v1427_v57  ;;  %v2001_v30 = vsel %vm1873_vm1, %v1809_v21, %v1937_v17  ;;  %v1106_v5 = vadd.f32 1.4214138, %v1042_v37  ;;  %v2063_v22 = vadd.f32 1.0, %v1999_v48 }
 0x15d   :  { %v1749_v28 = vmul.f32 %v3021_v61, %v1429_v58  ;;  %v3648_v54 = vpop.eup %3022  ;;  %v1046_v25 = vmul.f32 %v3615_v14, %v982_v40  ;;  %v2065_v21 = vadd.f32 1.0, %v2001_v30  ;;  %v1108_v23 = vadd.f32 1.4214138, %v1044_v3  ;;  %v2983_v61 = vld [vmem:[#allocation7 + $0x20] sm:$0xff]  }
 0x15e   :  { %v1811_v33 = vsub.f32 1.0, %v1747_v1  ;;  %v3652_v1 = vmul.f32 0.70710677, %v3636_v16  ;;  %v1492_v17 = vsub.f32 0.0, %v3538_v4  ;;  %v919_v58 = vmul.f32 1.0614054, %v3648_v54  ;;  %2788 = vmatpush3.bf16.msra.mxu0 %v2983_v61 }
 0x15f   :  { %v1813_v39 = vsub.f32 1.0, %v1749_v28  ;;  %v1232_v40 = vadd.f32 -0.28449672, %v1168_v42  ;;  %v1170_v31 = vmul.f32 %v3605_v7, %v1106_v5  ;;  %v3670_v28 = vmul.f32 %v2063_v22, %v527_v55 }
 0x160   :  { %v1939_v24 = vsub.f32 0.0, %v1811_v33  ;;  %v3662_v57 = vand.u32 2147483647, %v3652_v1  ;;  %v3675_v3 = vmul.f32 0.70710677, %v3659_v49  ;;  %v3679_v30 = vmul.f32 %v2065_v21, %v529_v9 }
 0x161   :  { %v1941_v10 = vsub.f32 0.0, %v1813_v39  ;;  %5551 = vst [vmem:[#allocation27_spill] sm:$0xff] %v3670_v28  ;;  %v1172_v5 = vmul.f32 %v3609_v20, %v1108_v23  ;;  %v1296_v9 = vmul.f32 %v3597_v38, %v1232_v40  ;;  %v1234_v21 = vadd.f32 -0.28449672, %v1170_v31  ;;  %v2984_v40 = vld [vmem:[#allocation7 + $0xe0] sm:$0xff]  }
 0x162   :  { %v2003_v2 = vsel %vm1875_vm2, %v1811_v33, %v1939_v24  ;;  %v729_v37 = vmul.f32 0.3275911, %v3662_v57  ;;  %v1110_v33 = vadd.f32 1.4214138, %v1046_v25  ;;  %5554 = vst [vmem:[#allocation30_spill] sm:$0xff] %v3679_v30  ;;  %v1494_v25 = vsub.f32 0.0, %v3560_v27  ;;  %2851 = vmatprep.subr.bf16.mxu1 %v2984_v40 }
 0x163   :  { %v2067_v15 = vadd.f32 1.0, %v2003_v2  ;;  %v2005_v0 = vsel %vm1877_vm3, %v1813_v39, %v1941_v10  ;;  %v1617_v39 = vmul.f32 1.442695, %v1552_v13  ;;  %v983_v24 = vadd.f32 -1.4531521, %v919_v58 }
 0x164   :  { %v2069_v43 = vadd.f32 1.0, %v2005_v0  ;;  %v793_v22 = vadd.f32 1.0, %v729_v37  ;;  %v1174_v13 = vmul.f32 %v3615_v14, %v1110_v33  ;;  %v1621_v2 = vmul.f32 1.442695, %v1554_v34 }
 0x165   :  { %v3672_v48 = vmul.f32 %v2067_v15, %v531_v8  ;;  %v1556_v8 = vmul.f32 %v1492_v17, %v3538_v4  ;;  %3024 = vpow2.f32 %v1617_v39  ;;  %v1236_v23 = vadd.f32 -0.28449672, %v1172_v5  ;;  %v3715_v39 = vpop.f32.mrb[16].mxu0 }
 0x166   :  { %v3681_v42 = vmul.f32 %v2069_v43, %v533_v36  ;;  %v3693_v36 = vand.u32 2147483647, %v3675_v3  ;;  %v1047_v4 = vmul.f32 %v3648_v54, %v983_v24  ;;  %3026 = vrcp.f32 %v793_v22  ;;  %5556 = vst [vmem:[#allocation32_spill] sm:$0xff] %v3715_v39 }
 0x167   :  { %5552 = vst [vmem:[#allocation28_spill] sm:$0xff] %v3672_v48  ;;  %v1625_v15 = vmul.f32 1.442695, %v1556_v8  ;;  %v3698_v0 = vadd.f32 %v3488_v44, %v3465_v26  ;;  %v1558_v17 = vmul.f32 %v1494_v25, %v3560_v27  ;;  %v1495_v58 = vsub.f32 0.0, %v3591_v62  ;;  %v3721_v8 = vpop.f32.mrb[16].mxu1 }
 0x168   :  { %5555 = vst [vmem:[#allocation31_spill] sm:$0xff] %v3681_v42  ;;  %v3704_v61 = vadd.f32 %v3493_v46, %v3447_v11  ;;  %v1360_v31 = vadd.f32 0.2548296, %v1296_v9  ;;  %v1298_v34 = vmul.f32 %v3605_v7, %v1234_v21  ;;  %v1238_v43 = vadd.f32 -0.28449672, %v1174_v13  ;;  %5557 = vst [vmem:[#allocation33_spill] sm:$0xff] %v3721_v8 }
 0x169   :  { %v728_v37 = vmul.f32 0.3275911, %v3693_v36  ;;  %3028 = vpow2.f32 %v1621_v2  ;;  %v1300_v33 = vmul.f32 %v3609_v20, %v1236_v23  ;;  %v3710_v44 = vmul.f32 0.70710677, %v3698_v0 }
 0x16a   :  { %v3713_v27 = vmul.f32 0.70710677, %v3704_v61  ;;  %3030 = vpow2.f32 %v1625_v15  ;;  %v1111_v46 = vadd.f32 1.4214138, %v1047_v4  ;;  %v3719_v5 = vadd.f32 %v3495_v47, %v3449_v12 }
 0x16b   :  { %v3724_v24 = vand.u32 2147483647, %v3710_v44  ;;  %v1424_v25 = vmul.f32 %v3597_v38, %v1360_v31  ;;  %v1362_v9 = vadd.f32 0.2548296, %v1298_v34  ;;  %v1629_v21 = vmul.f32 1.442695, %v1558_v17 }
 0x16c   :  { %v3727_v22 = vand.u32 2147483647, %v3713_v27  ;;  %v1559_v13 = vmul.f32 %v1495_v58, %v3591_v62  ;;  %v1364_v2 = vadd.f32 0.2548296, %v1300_v33  ;;  %v1302_v23 = vmul.f32 %v3615_v14, %v1238_v43 }
 0x16d   :  { %v792_v15 = vadd.f32 1.0, %v728_v37  ;;  %v730_v47 = vmul.f32 0.3275911, %v3724_v24  ;;  %v1175_v4 = vmul.f32 %v3648_v54, %v1111_v46  ;;  %v3735_v40 = vmul.f32 0.70710677, %v3719_v5  ;;  %v2985_v37 = vld [vmem:[#allocation7 + $0xa0] sm:$0xff]  }
 0x16e   :  { %v731_v30 = vmul.f32 0.3275911, %v3727_v22  ;;  %v3740_v38 = vadd.f32 %v3506_v51, %v3457_v19  ;;  %3032 = vpow2.f32 %v1629_v21  ;;  %v1631_v58 = vmul.f32 1.442695, %v1559_v13  ;;  %2852 = vmatpush3.bf16.msra.mxu1 %v2985_v37 }
 0x16f   :  { %v3025_v10 = vpop.eup %3024  ;;  %v794_v55 = vadd.f32 1.0, %v730_v47  ;;  %v1426_v31 = vmul.f32 %v3605_v7, %v1362_v9  ;;  %v1428_v34 = vmul.f32 %v3609_v20, %v1364_v2  ;;  %v1366_v43 = vadd.f32 0.2548296, %v1302_v23  ;;  %v3749_v47 = vpop.f32.mrb[17].mxu0 }
 0x170   :  { %v3742_v62 = vpop.eup %3026  ;;  %v1744_v17 = vmul.f32 %v3025_v10, %v1424_v25  ;;  %3034 = vrcp.f32 %v792_v15  ;;  %v1239_v33 = vadd.f32 -0.28449672, %v1175_v4  ;;  %v3747_v46 = vand.u32 2147483647, %v3735_v40  ;;  %5558 = vst [vmem:[#allocation34_spill] sm:$0xff] %v3749_v47  ;;  %v3821_v18 = vpop.f32.mrb[18].mxu0 }
 0x171   :  { %v921_v42 = vmul.f32 1.0614054, %v3742_v62  ;;  %3036 = vrcp.f32 %v794_v55  ;;  %v795_v10 = vadd.f32 1.0, %v731_v30  ;;  %v3753_v25 = vmul.f32 0.70710677, %v3740_v38 }
 0x172   :  { %v3757_v20 = vadd.f32 %v3508_v52, %v3465_v26  ;;  %v3761_v9 = vadd.f32 %v3528_v60, %v3447_v11  ;;  %v1808_v21 = vsub.f32 1.0, %v1744_v17  ;;  %3038 = vpow2.f32 %v1631_v58 }
 0x173   :  { %v3029_v51 = vpop.eup %3028  ;;  %v1303_v55 = vmul.f32 %v3648_v54, %v1239_v33  ;;  %v733_v30 = vmul.f32 0.3275911, %v3747_v46  ;;  %v3766_v23 = vand.u32 2147483647, %v3753_v25  ;;  %v1430_v52 = vmul.f32 %v3615_v14, %v1366_v43 }
 0x174   :  { %v3031_v7 = vpop.eup %3030  ;;  %v1746_v13 = vmul.f32 %v3029_v51, %v1426_v31  ;;  %v3769_v15 = vmul.f32 0.70710677, %v3757_v20  ;;  %v985_v4 = vadd.f32 -1.4531521, %v921_v42  ;;  %3040 = vrcp.f32 %v795_v10 }
 0x175   :  { %v1748_v2 = vmul.f32 %v3031_v7, %v1428_v34  ;;  %v528_v60 = vmul.f32 0.5, %v3470_v29  ;;  %v3777_v58 = vmul.f32 0.70710677, %v3761_v9  ;;  %v1936_v31 = vsub.f32 0.0, %v1808_v21 }
 0x176   :  { %5559 = vst [vmem:[#allocation35_spill] sm:$0xff] %v3769_v15  ;;  %v3774_v17 = vand.u32 2147483647, %v3769_v15  ;;  %v3780_v34 = vmul.f32 0.5, %v3473_v32  ;;  %v1810_v37 = vsub.f32 1.0, %v1746_v13  ;;  %v797_v42 = vadd.f32 1.0, %v733_v30 }
 0x177   :  { %5560 = vst [vmem:[#allocation36_spill] sm:$0xff] %v3777_v58  ;;  %v1812_v33 = vsub.f32 1.0, %v1748_v2  ;;  %v1367_v14 = vadd.f32 0.2548296, %v1303_v55  ;;  %v732_v43 = vmul.f32 0.3275911, %v3766_v23  ;;  %v1049_v32 = vmul.f32 %v3742_v62, %v985_v4 }
 0x178   :  { %v3033_v51 = vpop.eup %3032  ;;  %v3788_v10 = vmul.f32 0.5, %v3504_v50  ;;  %v3792_v13 = vmul.f32 0.5, %v3520_v56  ;;  %v734_v2 = vmul.f32 0.3275911, %v3774_v17  ;;  %v3796_v35 = vand.u32 2147483647, %v3777_v58 }
 0x179   :  { %v1750_v7 = vmul.f32 %v3033_v51, %v1430_v52  ;;  %v2986_v55 = vld [vmem:[#allocation7 + $0x68] sm:$0xff]   ;;  %v2000_v28 = vsel %vm1872_vm4, %v1808_v21, %v1936_v31  ;;  %v1938_v48 = vsub.f32 0.0, %v1810_v37  ;;  %v1940_v47 = vsub.f32 0.0, %v1812_v33  ;;  %v3803_v51 = vpop.f32.mrb[17].mxu1 }
 0x17a   :  { %v3784_v29 = vpop.eup %3034  ;;  %v1497_v50 = vsub.f32 0.0, %v3662_v57  ;;  %v1431_v52 = vmul.f32 %v3648_v54, %v1367_v14  ;;  %3042 = vrcp.f32 %v797_v42  ;;  %v796_v56 = vadd.f32 1.0, %v732_v43  ;;  %2789 = vmatprep.subr.bf16.mxu0 %v2986_v55  ;;  %5561 = vst [vmem:[#allocation37_spill] sm:$0xff] %v3803_v51 }
 0x17b   :  { %v3798_v30 = vpop.eup %3036  ;;  %v920_v4 = vmul.f32 1.0614054, %v3784_v29  ;;  %v1814_v39 = vsub.f32 1.0, %v1750_v7  ;;  %v1113_v21 = vadd.f32 1.4214138, %v1049_v32  ;;  %v798_v53 = vadd.f32 1.0, %v734_v2 }
 0x17c   :  { %v3039_v8 = vpop.eup %3038  ;;  %v922_v31 = vmul.f32 1.0614054, %v3798_v30  ;;  %v735_v45 = vmul.f32 0.3275911, %v3796_v35  ;;  %v3811_v54 = vadd.f32 %v3532_v63, %v3449_v12  ;;  %v2064_v42 = vadd.f32 1.0, %v2000_v28  ;;  %v5562_v7 = vld [vmem:[#allocation18_spill] sm:$0xff] }
 0x17d   :  { %v2002_v43 = vsel %vm1874_vm5, %v1810_v37, %v1938_v48  ;;  %v2004_v59 = vsel %vm1876_vm6, %v1812_v33, %v1940_v47  ;;  %v3818_v55 = vmul.f32 0.5, %v5562_v7  ;;  %v1751_v32 = vmul.f32 %v3039_v8, %v1431_v52  ;;  %5563 = vst [vmem:[#allocation18_spill] sm:$0xff] %v3821_v18  ;;  %v5565_v37 = vld [vmem:[#allocation22_spill] sm:$0xff] }
 0x17e   :  { %v3813_v14 = vpop.eup %3040  ;;  %v1561_v51 = vmul.f32 %v1497_v50, %v3662_v57  ;;  %v984_v2 = vadd.f32 -1.4531521, %v920_v4  ;;  %3044 = vrcp.f32 %v796_v56  ;;  %v1942_v58 = vsub.f32 0.0, %v1814_v39 }
 0x17f   :  { %v1177_v63 = vmul.f32 %v3742_v62, %v1113_v21  ;;  %v1496_v15 = vsub.f32 0.0, %v3693_v36  ;;  %v3826_v28 = vmul.f32 0.70710677, %v3811_v54  ;;  %v986_v41 = vadd.f32 -1.4531521, %v922_v31 }
 0x180   :  { %v923_v48 = vmul.f32 1.0614054, %v3813_v14  ;;  %3046 = vrcp.f32 %v798_v53  ;;  %v799_v47 = vadd.f32 1.0, %v735_v45  ;;  %v3829_v8 = vmul.f32 %v2064_v42, %v528_v60 }
 0x181   :  { %v2066_v57 = vadd.f32 1.0, %v2002_v43  ;;  %vm1879_vm8 = vcmp.ge.f32.partialorder %v5565_v37, 0.0  ;;  %v3833_v33 = vmul.f32 0.5, %v3636_v16  ;;  %v3836_v50 = vand.u32 2147483647, %v3826_v28  ;;  %v5570_v37 = vld [vmem:[#allocation12_spill] sm:$0xff] }
 0x182   :  { %5564 = vst [vmem:[#allocation38_spill] sm:$0xff] %v3829_v8  ;;  %v2068_v52 = vadd.f32 1.0, %v2004_v59  ;;  %v1815_v4 = vsub.f32 1.0, %v1751_v32  ;;  %v1048_v56 = vmul.f32 %v3784_v29, %v984_v2  ;;  %v1498_v21 = vsub.f32 0.0, %v3724_v24  ;;  %v2988_v8 = vld [vmem:[#allocation7 + $0xe8] sm:$0xff]  }
 0x183   :  { %v1241_v31 = vadd.f32 -0.28449672, %v1177_v63  ;;  %v1635_v53 = vmul.f32 1.442695, %v1561_v51  ;;  %v1560_v45 = vmul.f32 %v1496_v15, %v3693_v36  ;;  %v737_v60 = vmul.f32 0.3275911, %v3836_v50  ;;  %2853 = vmatprep.subr.bf16.mxu1 %v2988_v8 }
 0x184   :  { %v3842_v42 = vpop.eup %3042  ;;  %v2006_v16 = vsel %vm1878_vm7, %v1814_v39, %v1942_v58  ;;  %v1050_v43 = vmul.f32 %v3798_v30, %v986_v41  ;;  %v987_v7 = vadd.f32 -1.4531521, %v923_v48  ;;  %3048 = vrcp.f32 %v799_v47  ;;  %v3861_v48 = vpop.f32.mrb[18].mxu1 }
 0x185   :  { %v3848_v59 = vmul.f32 %v2066_v57, %v3780_v34  ;;  %v3851_v32 = vmul.f32 0.5, %v3659_v49  ;;  %v1499_v51 = vsub.f32 0.0, %v3727_v22  ;;  %v801_v36 = vadd.f32 1.0, %v737_v60  ;;  %5568 = vst [vmem:[#allocation40_spill] sm:$0xff] %v3861_v48 }
 0x186   :  { %v1943_v15 = vsub.f32 0.0, %v1815_v4  ;;  %v1112_v2 = vadd.f32 1.4214138, %v1048_v56  ;;  %v1562_v63 = vmul.f32 %v1498_v21, %v3724_v24  ;;  %v1501_v6 = vsub.f32 0.0, %v3747_v46  ;;  %v2987_v24 = vld [vmem:[#allocation7 + $0x28] sm:$0xff]  }
 0x187   :  { %5566 = vst [vmem:[#allocation22_spill] sm:$0xff] %v3848_v59  ;;  %v3857_v39 = vmul.f32 %v2068_v52, %v3788_v10  ;;  %v2070_v58 = vadd.f32 1.0, %v2006_v16  ;;  %v1305_v41 = vmul.f32 %v3742_v62, %v1241_v31  ;;  %v925_v34 = vmul.f32 1.0614054, %v3842_v42  ;;  %2790 = vmatpush3.bf16.msra.mxu0 %v2987_v24  ;;  %v5574_v59 = vld [vmem:[#allocation13_spill] sm:$0xff] }
 0x188   :  { %v3863_v49 = vpop.eup %3044  ;;  %3050 = vpow2.f32 %v1635_v53  ;;  %v1633_v47 = vmul.f32 1.442695, %v1560_v45  ;;  %v1114_v57 = vadd.f32 1.4214138, %v1050_v43  ;;  %v1051_v56 = vmul.f32 %v3813_v14, %v987_v7 }
 0x189   :  { %5567 = vst [vmem:[#allocation39_spill] sm:$0xff] %v3857_v39  ;;  %v3867_v21 = vmul.f32 0.5, %v3698_v0  ;;  %v3870_v10 = vmul.f32 0.5, %v3704_v61  ;;  %v1563_v52 = vmul.f32 %v1499_v51, %v3727_v22  ;;  %3052 = vrcp.f32 %v801_v36 }
 0x18a   :  { %v3873_v31 = vpop.eup %3046  ;;  %v2007_v60 = vsel %vm1879_vm8, %v1815_v4, %v1943_v15  ;;  %v1176_v53 = vmul.f32 %v3784_v29, %v1112_v2  ;;  %v1637_v45 = vmul.f32 1.442695, %v1562_v63  ;;  %v1565_v16 = vmul.f32 %v1501_v6, %v3747_v46 }
 0x18b   :  { %v3880_v0 = vmul.f32 %v2070_v58, %v3792_v13  ;;  %v1369_v43 = vadd.f32 0.2548296, %v1305_v41  ;;  %v989_v61 = vadd.f32 -1.4531521, %v925_v34  ;;  %v924_v7 = vmul.f32 1.0614054, %v3863_v49 }
 0x18c   :  { %3054 = vpow2.f32 %v1633_v47  ;;  %v1178_v22 = vmul.f32 %v3798_v30, %v1114_v57  ;;  %v1115_v51 = vadd.f32 1.4214138, %v1051_v56  ;;  %v3886_v4 = vadd.f32 %v5570_v37, %v3457_v19 }
 0x18d   :  { %5569 = vst [vmem:[#allocation41_spill] sm:$0xff] %v3880_v0  ;;  %v2071_v36 = vadd.f32 1.0, %v2007_v60  ;;  %v1639_v15 = vmul.f32 1.442695, %v1563_v52  ;;  %v3889_v46 = vmul.f32 0.5, %v3719_v5  ;;  %v3895_v58 = vmul.f32 0.5, %v3740_v38 }
 0x18e   :  { %v926_v13 = vmul.f32 1.0614054, %v3873_v31  ;;  %v3892_v2 = vpop.eup %3048  ;;  %v1240_v63 = vadd.f32 -0.28449672, %v1176_v53  ;;  %v1643_v6 = vmul.f32 1.442695, %v1565_v16  ;;  %v1433_v34 = vmul.f32 %v3742_v62, %v1369_v43 }
 0x18f   :  { %v1500_v41 = vsub.f32 0.0, %v3766_v23  ;;  %3056 = vpow2.f32 %v1637_v45  ;;  %v1053_v47 = vmul.f32 %v3842_v42, %v989_v61  ;;  %v988_v57 = vadd.f32 -1.4531521, %v924_v7  ;;  %v3905_v60 = vpop.f32.mrb[19].mxu0 }
 0x190   :  { %v1242_v56 = vadd.f32 -0.28449672, %v1178_v22  ;;  %v1179_v5 = vmul.f32 %v3813_v14, %v1115_v51  ;;  %v1502_v24 = vsub.f32 0.0, %v3774_v17  ;;  %v3903_v52 = vmul.f32 0.70710677, %v3886_v4  ;;  %5571 = vst [vmem:[#allocation12_spill] sm:$0xff] %v3905_v60 }
 0x191   :  { %v3908_v38 = vmul.f32 %v2071_v36, %v3818_v55  ;;  %3058 = vpow2.f32 %v1639_v15  ;;  %v990_v53 = vadd.f32 -1.4531521, %v926_v13  ;;  %v927_v62 = vmul.f32 1.0614054, %v3892_v2 }
 0x192   :  { %v3051_v45 = vpop.eup %3050  ;;  %v1304_v16 = vmul.f32 %v3784_v29, %v1240_v63  ;;  %3060 = vpow2.f32 %v1643_v6  ;;  %v1564_v43 = vmul.f32 %v1500_v41, %v3766_v23  ;;  %v1503_v61 = vsub.f32 0.0, %v3796_v35  ;;  %v3925_v23 = vpop.f32.mrb[19].mxu1 }
 0x193   :  { %5572 = vst [vmem:[#allocation42_spill] sm:$0xff] %v3908_v38  ;;  %v3914_v7 = vpop.eup %3052  ;;  %v1753_v22 = vmul.f32 %v3051_v45, %v1433_v34  ;;  %v1117_v51 = vadd.f32 1.4214138, %v1053_v47  ;;  %v1052_v37 = vmul.f32 %v3863_v49, %v988_v57  ;;  %v3918_v55 = vand.u32 2147483647, %v3903_v52  ;;  %5573 = vst [vmem:[#allocation43_spill] sm:$0xff] %v3925_v23 }
 0x194   :  { %v1306_v36 = vmul.f32 %v3798_v30, %v1242_v56  ;;  %v1243_v15 = vadd.f32 -0.28449672, %v1179_v5  ;;  %v3922_v13 = vmul.f32 0.5, %v3757_v20  ;;  %v1566_v63 = vmul.f32 %v1502_v24, %v3774_v17 }
 0x195   :  { %v1054_v6 = vmul.f32 %v3873_v31, %v990_v53  ;;  %v3929_v41 = vmul.f32 0.5, %v3761_v9  ;;  %v991_v34 = vadd.f32 -1.4531521, %v927_v62  ;;  %v736_v47 = vmul.f32 0.3275911, %v3918_v55 }
 0x196   :  { %v3055_v57 = vpop.eup %3054  ;;  %vm1881_vm9 = vcmp.ge.f32.partialorder %v3652_v1, 0.0  ;;  %v1368_v56 = vadd.f32 0.2548296, %v1304_v16  ;;  %v1641_v5 = vmul.f32 1.442695, %v1564_v43  ;;  %v1567_v20 = vmul.f32 %v1503_v61, %v3796_v35  ;;  %v5575_v61 = vld [vmem:[#allocation14_spill] sm:$0xff] }
 0x197   :  { %v929_v45 = vmul.f32 1.0614054, %v3914_v7  ;;  %v1817_v17 = vsub.f32 1.0, %v1753_v22  ;;  %v1181_v24 = vmul.f32 %v3842_v42, %v1117_v51  ;;  %v1116_v38 = vadd.f32 1.4214138, %v1052_v37 }
 0x198   :  { %v800_v53 = vadd.f32 1.0, %v736_v47  ;;  %v1370_v0 = vadd.f32 0.2548296, %v1306_v36  ;;  %v1307_v9 = vmul.f32 %v3813_v14, %v1243_v15  ;;  %v1645_v62 = vmul.f32 1.442695, %v1566_v63 }
 0x199   :  { %v3939_v39 = vadd.f32 %v5574_v59, %v3465_v26  ;;  %v3057_v16 = vpop.eup %3056  ;;  %v1118_v43 = vadd.f32 1.4214138, %v1054_v6  ;;  %v1055_v35 = vmul.f32 %v3892_v2, %v991_v34  ;;  %v3944_v22 = vadd.f32 %v5575_v61, %v3447_v11 }
 0x19a   :  { %3062 = vrcp.f32 %v800_v53  ;;  %v1432_v51 = vmul.f32 %v3784_v29, %v1368_v56  ;;  %v1647_v37 = vmul.f32 1.442695, %v1567_v20  ;;  %v993_v36 = vadd.f32 -1.4531521, %v929_v45  ;;  %v3957_v56 = vpop.f32.mrb[20].mxu0  ;;  %v3966_v45 = vpop.f32.mrb[20].mxu1 }
 0x19b   :  { %3064 = vpow2.f32 %v1641_v5  ;;  %v3059_v15 = vpop.eup %3058  ;;  %v1945_v63 = vsub.f32 0.0, %v1817_v17  ;;  %v1245_v59 = vadd.f32 -0.28449672, %v1181_v24  ;;  %v1180_v47 = vmul.f32 %v3863_v49, %v1116_v38  ;;  %5578 = vst [vmem:[#allocation44_spill] sm:$0xff] %v3957_v56  ;;  %5579 = vst [vmem:[#allocation45_spill] sm:$0xff] %v3966_v45 }
 0x19c   :  { %v3949_v6 = vmul.f32 0.70710677, %v3939_v39  ;;  %v3951_v34 = vpop.eup %3060  ;;  %v1434_v53 = vmul.f32 %v3798_v30, %v1370_v0  ;;  %v1371_v61 = vadd.f32 0.2548296, %v1307_v9  ;;  %3066 = vpow2.f32 %v1645_v62 }
 0x19d   :  { %v3955_v29 = vmul.f32 0.70710677, %v3944_v22  ;;  %v1182_v8 = vmul.f32 %v3873_v31, %v1118_v43  ;;  %v1119_v5 = vadd.f32 1.4214138, %v1055_v35  ;;  %v3961_v20 = vmul.f32 0.5, %v3811_v54 }
 0x19e   :  { %5576 = vst [vmem:[#allocation13_spill] sm:$0xff] %v3949_v6  ;;  %v3964_v38 = vand.u32 2147483647, %v3949_v6  ;;  %v1752_v24 = vmul.f32 %v3055_v57, %v1432_v51  ;;  %3068 = vpow2.f32 %v1647_v37  ;;  %v1057_v30 = vmul.f32 %v3914_v7, %v993_v36  ;;  %v2989_v51 = vld [vmem:[#allocation7 + $0xa8] sm:$0xff]  }
 0x19f   :  { %5577 = vst [vmem:[#allocation14_spill] sm:$0xff] %v3955_v29  ;;  %v3970_v0 = vand.u32 2147483647, %v3955_v29  ;;  %v2009_v9 = vsel %vm1881_vm9, %v1817_v17, %v1945_v63  ;;  %v1309_v62 = vmul.f32 %v3842_v42, %v1245_v59  ;;  %v1244_v43 = vadd.f32 -0.28449672, %v1180_v47  ;;  %v5580_v17 = vld [vmem:[#allocation15_spill] sm:$0xff]  ;;  %2854 = vmatpush3.bf16.msra.mxu1 %v2989_v51 }
 0x1a0   :  { %v738_v54 = vmul.f32 0.3275911, %v3964_v38  ;;  %v1754_v35 = vmul.f32 %v3057_v16, %v1434_v53  ;;  %v1435_v56 = vmul.f32 %v3813_v14, %v1371_v61  ;;  %v1505_v45 = vsub.f32 0.0, %v3836_v50 }
 0x1a1   :  { %v739_v57 = vmul.f32 0.3275911, %v3970_v0  ;;  %vm1880_vm10 = vcmp.ge.f32.partialorder %v3675_v3, 0.0  ;;  %v1246_v37 = vadd.f32 -0.28449672, %v1182_v8  ;;  %v1183_v36 = vmul.f32 %v3892_v2, %v1119_v5 }
 0x1a2   :  { %v802_v1 = vadd.f32 1.0, %v738_v54  ;;  %v3983_v63 = vadd.f32 %v5580_v17, %v3449_v12  ;;  %v2073_v59 = vadd.f32 1.0, %v2009_v9  ;;  %v1816_v47 = vsub.f32 1.0, %v1752_v24 }
 0x1a3   :  { %v1121_v16 = vadd.f32 1.4214138, %v1057_v30  ;;  %v803_v53 = vadd.f32 1.0, %v739_v57  ;;  %vm1882_vm11 = vcmp.ge.f32.partialorder %v3710_v44, 0.0  ;;  %v1373_v61 = vadd.f32 0.2548296, %v1309_v62 }
 0x1a4   :  { %v3985_v14 = vpop.eup %3062  ;;  %v1308_v23 = vmul.f32 %v3863_v49, %v1244_v43  ;;  %3070 = vrcp.f32 %v802_v1  ;;  %v3990_v8 = vmul.f32 0.70710677, %v3983_v63  ;;  %v1818_v54 = vsub.f32 1.0, %v1754_v35  ;;  %v3994_v30 = vpop.f32.mrb[21].mxu0  ;;  %v5583_v35 = vld [vmem:[#allocation16_spill] sm:$0xff] }
 0x1a5   :  { %v3065_v5 = vpop.eup %3064  ;;  %v1755_v17 = vmul.f32 %v3059_v15, %v1435_v56  ;;  %v1569_v9 = vmul.f32 %v1505_v45, %v3836_v50  ;;  %v928_v24 = vmul.f32 1.0614054, %v3985_v14  ;;  %5582 = vst [vmem:[#allocation46_spill] sm:$0xff] %v3994_v30  ;;  %v1310_v57 = vmul.f32 %v3873_v31, %v1246_v37  ;;  %v5584_v50 = vld [vmem:[#allocation17_spill] sm:$0xff] }
 0x1a6   :  { %5581 = vst [vmem:[#allocation15_spill] sm:$0xff] %v3990_v8  ;;  %v1247_v51 = vadd.f32 -0.28449672, %v1183_v36  ;;  %3072 = vrcp.f32 %v803_v53  ;;  %v3998_v62 = vand.u32 2147483647, %v3990_v8  ;;  %v3067_v43 = vpop.eup %3066  ;;  %v1944_v1 = vsub.f32 0.0, %v1816_v47 }
 0x1a7   :  { %v1185_v60 = vmul.f32 %v3914_v7, %v1121_v16  ;;  %v4003_v15 = vadd.f32 %v5583_v35, %v3457_v19  ;;  %v4007_v56 = vadd.f32 %v5584_v50, %v3465_v26  ;;  %vm1883_vm12 = vcmp.ge.f32.partialorder %v3713_v27, 0.0 }
 0x1a8   :  { %v1437_v45 = vmul.f32 %v3842_v42, %v1373_v61  ;;  %v1372_v37 = vadd.f32 0.2548296, %v1308_v23  ;;  %v992_v36 = vadd.f32 -1.4531521, %v928_v24  ;;  %v741_v53 = vmul.f32 0.3275911, %v3998_v62  ;;  %v4012_v30 = vpop.eup %3068 }
 0x1a9   :  { %v1946_v48 = vsub.f32 0.0, %v1818_v54  ;;  %v1819_v16 = vsub.f32 1.0, %v1755_v17  ;;  %v1651_v18 = vmul.f32 1.442695, %v1569_v9  ;;  %v4015_v35 = vmul.f32 0.70710677, %v4003_v15 }
 0x1aa   :  { %v1374_v8 = vadd.f32 0.2548296, %v1310_v57  ;;  %v1311_v50 = vmul.f32 %v3892_v2, %v1247_v51  ;;  %v805_v29 = vadd.f32 1.0, %v741_v53  ;;  %v4019_v6 = vmul.f32 0.70710677, %v4007_v56  ;;  %v2990_v9 = vld [vmem:[#allocation7 + $0x70] sm:$0xff]  }
 0x1ab   :  { %v4022_v42 = vmul.f32 %v2073_v59, %v3833_v33  ;;  %v2008_v23 = vsel %vm1880_vm10, %v1816_v47, %v1944_v1  ;;  %v1249_v61 = vadd.f32 -0.28449672, %v1185_v60  ;;  %v4027_v17 = vand.u32 2147483647, %v4015_v35  ;;  %v4034_v53 = vpop.f32.mrb[21].mxu1  ;;  %2791 = vmatprep.subr.bf16.mxu0 %v2990_v9 }
 0x1ac   :  { %v1436_v24 = vmul.f32 %v3863_v49, %v1372_v37  ;;  %v1056_v57 = vmul.f32 %v3985_v14, %v992_v36  ;;  %3074 = vrcp.f32 %v805_v29  ;;  %v4032_v51 = vand.u32 2147483647, %v4019_v6  ;;  %5586 = vst [vmem:[#allocation17_spill] sm:$0xff] %v4034_v53  ;;  %v5587_v37 = vld [vmem:[#allocation19_spill] sm:$0xff] }
 0x1ad   :  { %5585 = vst [vmem:[#allocation16_spill] sm:$0xff] %v4022_v42  ;;  %v2010_v33 = vsel %vm1882_vm11, %v1818_v54, %v1946_v48  ;;  %v1947_v3 = vsub.f32 0.0, %v1819_v16  ;;  %v1757_v60 = vmul.f32 %v3951_v34, %v1437_v45  ;;  %v740_v59 = vmul.f32 0.3275911, %v4027_v17 }
 0x1ae   :  { %v4040_v47 = vpop.eup %3070  ;;  %v1438_v49 = vmul.f32 %v3873_v31, %v1374_v8  ;;  %v1375_v1 = vadd.f32 0.2548296, %v1311_v50  ;;  %v742_v29 = vmul.f32 0.3275911, %v4032_v51  ;;  %v4046_v36 = vadd.f32 %v5587_v37, %v3447_v11 }
 0x1af   :  { %v2072_v42 = vadd.f32 1.0, %v2008_v23  ;;  %v1313_v44 = vmul.f32 %v3914_v7, %v1249_v61  ;;  %3076 = vpow2.f32 %v1651_v18  ;;  %v804_v48 = vadd.f32 1.0, %v740_v59  ;;  %v5591_v59 = vld [vmem:[#allocation35_spill] sm:$0xff] }
 0x1b0   :  { %v4049_v34 = vpop.eup %3072  ;;  %vm1885_vm13 = vcmp.ge.f32.partialorder %v3735_v40, 0.0  ;;  %v1756_v54 = vmul.f32 %v3065_v5, %v1436_v24  ;;  %v1120_v45 = vadd.f32 1.4214138, %v1056_v57  ;;  %v1504_v31 = vsub.f32 0.0, %v3918_v55  ;;  %v5589_v57 = vld [vmem:[#allocation20_spill] sm:$0xff] }
 0x1b1   :  { %v806_v8 = vadd.f32 1.0, %v742_v29  ;;  %v2074_v50 = vadd.f32 1.0, %v2010_v33  ;;  %v2011_v9 = vsel %vm1883_vm12, %v1819_v16, %v1947_v3  ;;  %v1821_v37 = vsub.f32 1.0, %v1757_v60  ;;  %v4078_v29 = vpop.f32.mrb[22].mxu0 }
 0x1b2   :  { %v930_v23 = vmul.f32 1.0614054, %v4040_v47  ;;  %v1758_v53 = vmul.f32 %v3067_v43, %v1438_v49  ;;  %v1439_v18 = vmul.f32 %v3892_v2, %v1375_v1  ;;  %3078 = vrcp.f32 %v804_v48  ;;  %5593 = vst [vmem:[#allocation47_spill] sm:$0xff] %v4078_v29 }
 0x1b3   :  { %v4058_v61 = vmul.f32 0.70710677, %v4046_v36  ;;  %vm1884_vm14 = vcmp.ge.f32.partialorder %v3753_v25, 0.0  ;;  %v1377_v5 = vadd.f32 0.2548296, %v1313_v44  ;;  %3080 = vrcp.f32 %v806_v8 }
 0x1b4   :  { %v931_v24 = vmul.f32 1.0614054, %v4049_v34  ;;  %v4064_v27 = vadd.f32 %v5589_v57, %v3449_v12  ;;  %v1820_v16 = vsub.f32 1.0, %v1756_v54  ;;  %v1184_v33 = vmul.f32 %v3985_v14, %v1120_v45 }
 0x1b5   :  { %5588 = vst [vmem:[#allocation19_spill] sm:$0xff] %v4058_v61  ;;  %v1568_v43 = vmul.f32 %v1504_v31, %v3918_v55  ;;  %v4069_v2 = vand.u32 2147483647, %v4058_v61  ;;  %v4072_v3 = vmul.f32 %v2072_v42, %v3851_v32  ;;  %v1949_v60 = vsub.f32 0.0, %v1821_v37 }
 0x1b6   :  { %vm1886_vm15 = vcmp.ge.f32.partialorder %v5591_v59, 0.0  ;;  %v994_v49 = vadd.f32 -1.4531521, %v930_v23  ;;  %v4076_v1 = vmul.f32 0.70710677, %v4064_v27  ;;  %v4080_v44 = vpop.eup %3074  ;;  %v1822_v48 = vsub.f32 1.0, %v1758_v53 }
 0x1b7   :  { %5590 = vst [vmem:[#allocation20_spill] sm:$0xff] %v4072_v3  ;;  %v1759_v55 = vmul.f32 %v4012_v30, %v1439_v18  ;;  %v4084_v54 = vmul.f32 0.5, %v3886_v4  ;;  %v743_v32 = vmul.f32 0.3275911, %v4069_v2  ;;  %v2075_v42 = vadd.f32 1.0, %v2011_v9  ;;  %v5595_v30 = vld [vmem:[#allocation36_spill] sm:$0xff] }
 0x1b8   :  { %5592 = vst [vmem:[#allocation35_spill] sm:$0xff] %v4076_v1  ;;  %v1441_v45 = vmul.f32 %v3914_v7, %v1377_v5  ;;  %v995_v31 = vadd.f32 -1.4531521, %v931_v24  ;;  %v4089_v8 = vand.u32 2147483647, %v4076_v1  ;;  %v4092_v23 = vmul.f32 %v2074_v50, %v3867_v21 }
 0x1b9   :  { %v1948_v57 = vsub.f32 0.0, %v1820_v16  ;;  %v1248_v3 = vadd.f32 -0.28449672, %v1184_v33  ;;  %v1649_v53 = vmul.f32 1.442695, %v1568_v43  ;;  %v3077_v29 = vpop.eup %3076  ;;  %v2013_v4 = vsel %vm1885_vm13, %v1821_v37, %v1949_v60  ;;  %v2991_v43 = vld [vmem:[#allocation7 + $0x30] sm:$0xff]  }
 0x1ba   :  { %5594 = vst [vmem:[#allocation48_spill] sm:$0xff] %v4092_v23  ;;  %vm1887_vm0 = vcmp.ge.f32.partialorder %v5595_v30, 0.0  ;;  %v1058_v9 = vmul.f32 %v4040_v47, %v994_v49  ;;  %v933_v7 = vmul.f32 1.0614054, %v4080_v44  ;;  %v807_v18 = vadd.f32 1.0, %v743_v32  ;;  %v4111_v23 = vpop.f32.mrb[22].mxu1  ;;  %2792 = vmatpush3.bf16.msra.mxu0 %v2991_v43 }
 0x1bb   :  { %v1950_v5 = vsub.f32 0.0, %v1822_v48  ;;  %v1823_v24 = vsub.f32 1.0, %v1759_v55  ;;  %v1506_v1 = vsub.f32 0.0, %v3964_v38  ;;  %v745_v21 = vmul.f32 0.3275911, %v4089_v8  ;;  %5597 = vst [vmem:[#allocation49_spill] sm:$0xff] %v4111_v23 }
 0x1bc   :  { %v4102_v50 = vmul.f32 %v2075_v42, %v3870_v10  ;;  %v1761_v33 = vmul.f32 %v3077_v29, %v1441_v45  ;;  %v1059_v40 = vmul.f32 %v4049_v34, %v995_v31  ;;  %v1507_v37 = vsub.f32 0.0, %v3970_v0  ;;  %v4106_v60 = vpop.eup %3078 }
 0x1bd   :  { %v2077_v49 = vadd.f32 1.0, %v2013_v4  ;;  %v2012_v32 = vsel %vm1884_vm14, %v1820_v16, %v1948_v57  ;;  %v1312_v55 = vmul.f32 %v3985_v14, %v1248_v3  ;;  %3082 = vpow2.f32 %v1649_v53  ;;  %v4113_v61 = vpop.eup %3080  ;;  %v5598_v16 = vld [vmem:[#allocation21_spill] sm:$0xff] }
 0x1be   :  { %5596 = vst [vmem:[#allocation36_spill] sm:$0xff] %v4102_v50  ;;  %v1122_v10 = vadd.f32 1.4214138, %v1058_v9  ;;  %v997_v29 = vadd.f32 -1.4531521, %v933_v7  ;;  %3084 = vrcp.f32 %v807_v18  ;;  %v809_v42 = vadd.f32 1.0, %v745_v21 }
 0x1bf   :  { %v2014_v45 = vsel %vm1886_vm15, %v1822_v48, %v1950_v5  ;;  %v1951_v31 = vsub.f32 0.0, %v1823_v24  ;;  %vm1889_vm1 = vcmp.ge.f32.partialorder %v3826_v28, 0.0  ;;  %v1570_v25 = vmul.f32 %v1506_v1, %v3964_v38  ;;  %v2992_v28 = vld [vmem:[#allocation7 + $0xf0] sm:$0xff]  }
 0x1c0   :  { %v4121_v3 = vadd.f32 %v5598_v16, %v3457_v19  ;;  %v1825_v57 = vsub.f32 1.0, %v1761_v33  ;;  %v1123_v53 = vadd.f32 1.4214138, %v1059_v40  ;;  %v1571_v4 = vmul.f32 %v1507_v37, %v3970_v0  ;;  %2855 = vmatprep.subr.bf16.mxu1 %v2992_v28 }
 0x1c1   :  { %v932_v9 = vmul.f32 1.0614054, %v4106_v60  ;;  %v4126_v7 = vmul.f32 %v2077_v49, %v3889_v46  ;;  %v1376_v59 = vadd.f32 0.2548296, %v1312_v55  ;;  %v4129_v48 = vmul.f32 0.5, %v3939_v39 }
 0x1c2   :  { %v934_v18 = vmul.f32 1.0614054, %v4113_v61  ;;  %v2076_v38 = vadd.f32 1.0, %v2012_v32  ;;  %v1186_v1 = vmul.f32 %v4040_v47, %v1122_v10  ;;  %v1061_v5 = vmul.f32 %v4080_v44, %v997_v29 }
 0x1c3   :  { %5599 = vst [vmem:[#allocation21_spill] sm:$0xff] %v4126_v7  ;;  %3086 = vrcp.f32 %v809_v42  ;;  %v2078_v21 = vadd.f32 1.0, %v2014_v45  ;;  %v2015_v0 = vsel %vm1887_vm0, %v1823_v24, %v1951_v31  ;;  %v1653_v33 = vmul.f32 1.442695, %v1570_v25  ;;  %v4151_v45 = vpop.f32.mrb[23].mxu0 }
 0x1c4   :  { %v4137_v46 = vmul.f32 0.70710677, %v4121_v3  ;;  %v1953_v40 = vsub.f32 0.0, %v1825_v57  ;;  %v1187_v39 = vmul.f32 %v4049_v34, %v1123_v53  ;;  %v1655_v37 = vmul.f32 1.442695, %v1571_v4  ;;  %5601 = vst [vmem:[#allocation51_spill] sm:$0xff] %v4151_v45 }
 0x1c5   :  { %v996_v43 = vadd.f32 -1.4531521, %v932_v9  ;;  %v1440_v49 = vmul.f32 %v3985_v14, %v1376_v59  ;;  %v1509_v32 = vsub.f32 0.0, %v3998_v62  ;;  %v998_v55 = vadd.f32 -1.4531521, %v934_v18 }
 0x1c6   :  { %v4143_v10 = vand.u32 2147483647, %v4137_v46  ;;  %v4146_v30 = vmul.f32 %v2076_v38, %v3895_v58  ;;  %v1250_v24 = vadd.f32 -0.28449672, %v1186_v1  ;;  %v4149_v29 = vmul.f32 0.5, %v3944_v22 }
 0x1c7   :  { %v1125_v42 = vadd.f32 1.4214138, %v1061_v5  ;;  %v3083_v31 = vpop.eup %3082  ;;  %v4154_v25 = vmul.f32 %v2078_v21, %v3922_v13  ;;  %v2079_v14 = vadd.f32 1.0, %v2015_v0  ;;  %v4157_v16 = vmul.f32 0.5, %v3983_v63  ;;  %v5603_v5 = vld [vmem:[#allocation23_spill] sm:$0xff] }
 0x1c8   :  { %5600 = vst [vmem:[#allocation50_spill] sm:$0xff] %v4146_v30  ;;  %v744_v53 = vmul.f32 0.3275911, %v4143_v10  ;;  %v4160_v4 = vpop.eup %3084  ;;  %v2017_v58 = vsel %vm1889_vm1, %v1825_v57, %v1953_v40  ;;  %3088 = vpow2.f32 %v1653_v33  ;;  %v1251_v22 = vadd.f32 -0.28449672, %v1187_v39  ;;  %v4173_v57 = vpop.f32.mrb[23].mxu1 }
 0x1c9   :  { %5602 = vst [vmem:[#allocation52_spill] sm:$0xff] %v4154_v25  ;;  %v1060_v9 = vmul.f32 %v4106_v60, %v996_v43  ;;  %v1760_v59 = vmul.f32 %v3083_v31, %v1440_v49  ;;  %v1573_v18 = vmul.f32 %v1509_v32, %v3998_v62  ;;  %v1062_v13 = vmul.f32 %v4113_v61, %v998_v55 }
 0x1ca   :  { %v808_v38 = vadd.f32 1.0, %v744_v53  ;;  %v1314_v63 = vmul.f32 %v4040_v47, %v1250_v24  ;;  %3090 = vpow2.f32 %v1655_v37  ;;  %v1189_v1 = vmul.f32 %v4080_v44, %v1125_v42  ;;  %5604 = vst [vmem:[#allocation23_spill] sm:$0xff] %v4173_v57 }
 0x1cb   :  { %v4171_v21 = vadd.f32 %v5603_v5, %v3465_v26  ;;  %v2081_v0 = vadd.f32 1.0, %v2017_v58  ;;  %v1508_v33 = vsub.f32 0.0, %v4027_v17  ;;  %v935_v62 = vmul.f32 1.0614054, %v4160_v4 }
 0x1cc   :  { %3092 = vrcp.f32 %v808_v38  ;;  %v1315_v39 = vmul.f32 %v4049_v34, %v1251_v22  ;;  %v4181_v37 = vmul.f32 0.5, %v4003_v15  ;;  %v1124_v43 = vadd.f32 1.4214138, %v1060_v9 }
 0x1cd   :  { %v4177_v40 = vpop.eup %3086  ;;  %v1510_v49 = vsub.f32 0.0, %v4032_v51  ;;  %v1824_v32 = vsub.f32 1.0, %v1760_v59  ;;  %vm1888_vm2 = vcmp.ge.f32.partialorder %v3903_v52, 0.0  ;;  %v1659_v55 = vmul.f32 1.442695, %v1573_v18 }
 0x1ce   :  { %v4186_v24 = vmul.f32 0.5, %v4007_v56  ;;  %v1126_v42 = vadd.f32 1.4214138, %v1062_v13  ;;  %v4189_v31 = vmul.f32 %v2079_v14, %v3929_v41  ;;  %v1378_v53 = vadd.f32 0.2548296, %v1314_v63 }
 0x1cf   :  { %v1253_v58 = vadd.f32 -0.28449672, %v1189_v1  ;;  %v4192_v15 = vmul.f32 0.70710677, %v4171_v21  ;;  %v4195_v22 = vmul.f32 %v2081_v0, %v3961_v20  ;;  %v1572_v9 = vmul.f32 %v1508_v33, %v4027_v17  ;;  %v5607_v20 = vld [vmem:[#allocation24_spill] sm:$0xff] }
 0x1d0   :  { %5605 = vst [vmem:[#allocation53_spill] sm:$0xff] %v4189_v31  ;;  %v999_v59 = vadd.f32 -1.4531521, %v935_v62  ;;  %v937_v18 = vmul.f32 1.0614054, %v4177_v40  ;;  %v1188_v56 = vmul.f32 %v4106_v60, %v1124_v43  ;;  %v1574_v13 = vmul.f32 %v1510_v49, %v4032_v51 }
 0x1d1   :  { %5606 = vst [vmem:[#allocation54_spill] sm:$0xff] %v4195_v22  ;;  %v1379_v38 = vadd.f32 0.2548296, %v1315_v39  ;;  %v4202_v41 = vand.u32 2147483647, %v4192_v15  ;;  %3094 = vpow2.f32 %v1659_v55  ;;  %v1190_v14 = vmul.f32 %v4113_v61, %v1126_v42 }
 0x1d2   :  { %v1511_v63 = vsub.f32 0.0, %v4069_v2  ;;  %v4208_v1 = vadd.f32 %v5607_v20, %v3447_v11  ;;  %v3089_v17 = vpop.eup %3088  ;;  %v1952_v5 = vsub.f32 0.0, %v1824_v32  ;;  %v1442_v28 = vmul.f32 %v4040_v47, %v1378_v53 }
 0x1d3   :  { %v1317_v0 = vmul.f32 %v4080_v44, %v1253_v58  ;;  %v746_v51 = vmul.f32 0.3275911, %v4202_v41  ;;  %v1657_v33 = vmul.f32 1.442695, %v1572_v9  ;;  %v4214_v62 = vmul.f32 0.5, %v4046_v36 }
 0x1d4   :  { %v1063_v39 = vmul.f32 %v4160_v4, %v999_v59  ;;  %v1001_v43 = vadd.f32 -1.4531521, %v937_v18  ;;  %v3091_v49 = vpop.eup %3090  ;;  %v1443_v55 = vmul.f32 %v4049_v34, %v1379_v38  ;;  %v1252_v42 = vadd.f32 -0.28449672, %v1188_v56 }
 0x1d5   :  { %v1661_v20 = vmul.f32 1.442695, %v1574_v13  ;;  %v810_v22 = vadd.f32 1.0, %v746_v51  ;;  %v1254_v47 = vadd.f32 -0.28449672, %v1190_v14  ;;  %v1575_v53 = vmul.f32 %v1511_v63, %v4069_v2  ;;  %v5608_v13 = vld [vmem:[#allocation25_spill] sm:$0xff] }
 0x1d6   :  { %v4218_v31 = vpop.eup %3092  ;;  %v1513_v58 = vsub.f32 0.0, %v4089_v8  ;;  %v4223_v9 = vmul.f32 0.70710677, %v4208_v1  ;;  %v2016_v36 = vsel %vm1888_vm2, %v1824_v32, %v1952_v5  ;;  %v4227_v59 = vmul.f32 %v3089_v17, %v1442_v28  ;;  %v2993_v32 = vld [vmem:[#allocation7 + $0xb0] sm:$0xff]   ;;  %v4241_v17 = vpop.f32.mrb[24].mxu0 }
 0x1d7   :  { %v1381_v18 = vadd.f32 0.2548296, %v1317_v0  ;;  %v936_v34 = vmul.f32 1.0614054, %v4218_v31  ;;  %v1127_v38 = vadd.f32 1.4214138, %v1063_v39  ;;  %v1065_v56 = vmul.f32 %v4177_v40, %v1001_v43  ;;  %2856 = vmatpush3.bf16.msra.mxu1 %v2993_v32 }
 0x1d8   :  { %3096 = vrcp.f32 %v810_v22  ;;  %v4233_v2 = vadd.f32 %v5608_v13, %v3449_v12  ;;  %v4235_v14 = vmul.f32 %v3091_v49, %v1443_v55  ;;  %v1316_v63 = vmul.f32 %v4106_v60, %v1252_v42  ;;  %5609 = vst [vmem:[#allocation24_spill] sm:$0xff] %v4241_v17  ;;  %v4245_v0 = vpop.f32.mrb[24].mxu1  ;;  %v5611_v39 = vld [vmem:[#allocation13_spill] sm:$0xff]  ;;  %v5612_v13 = vld [vmem:[#allocation14_spill] sm:$0xff] }
 0x1d9   :  { %3098 = vpow2.f32 %v1657_v33  ;;  %v4239_v52 = vand.u32 2147483647, %v4223_v9  ;;  %v1318_v5 = vmul.f32 %v4113_v61, %v1254_v47  ;;  %v1663_v28 = vmul.f32 1.442695, %v1575_v53  ;;  %5610 = vst [vmem:[#allocation25_spill] sm:$0xff] %v4245_v0 }
 0x1da   :  { %3100 = vpow2.f32 %v1661_v20  ;;  %v1577_v22 = vmul.f32 %v1513_v58, %v4089_v8  ;;  %v2080_v51 = vadd.f32 1.0, %v2016_v36  ;;  %vm1890_vm3 = vcmp.ge.f32.partialorder %v5611_v39, 0.0  ;;  %v5618_v39 = vld [vmem:[#allocation32_spill] sm:$0xff] }
 0x1db   :  { %v1445_v43 = vmul.f32 %v4080_v44, %v1381_v18  ;;  %v1000_v33 = vadd.f32 -1.4531521, %v936_v34  ;;  %v747_v49 = vmul.f32 0.3275911, %v4239_v52  ;;  %v3095_v55 = vpop.eup %3094  ;;  %v1826_v42 = vsub.f32 1.0, %v4227_v59  ;;  %v5613_v44 = vld [vmem:[#allocation26_spill] sm:$0xff] }
 0x1dc   :  { %vm1891_vm4 = vcmp.ge.f32.partialorder %v5612_v13, 0.0  ;;  %v1191_v20 = vmul.f32 %v4160_v4, %v1127_v38  ;;  %v1129_v47 = vadd.f32 1.4214138, %v1065_v56  ;;  %v4254_v8 = vmul.f32 0.70710677, %v4233_v2  ;;  %v4267_v38 = vpop.f32.mrb[25].mxu0 }
 0x1dd   :  { %v1827_v53 = vsub.f32 1.0, %v4235_v14  ;;  %v1380_v58 = vadd.f32 0.2548296, %v1316_v63  ;;  %v811_v36 = vadd.f32 1.0, %v747_v49  ;;  %v4259_v18 = vadd.f32 %v5613_v44, %v3457_v19  ;;  %5614 = vst [vmem:[#allocation13_spill] sm:$0xff] %v4267_v38  ;;  %v4340_v57 = vpop.f32.mrb[26].mxu0 }
 0x1de   :  { %v1382_v34 = vadd.f32 0.2548296, %v1318_v5  ;;  %3102 = vpow2.f32 %v1663_v28  ;;  %v4262_v59 = vmul.f32 0.5, %v4064_v27  ;;  %v4265_v32 = vand.u32 2147483647, %v4254_v8  ;;  %v2994_v28 = vld [vmem:[#allocation7 + $0x78] sm:$0xff]  }
 0x1df   :  { %v4269_v56 = vmul.f32 %v3095_v55, %v1445_v43  ;;  %v1667_v7 = vmul.f32 1.442695, %v1577_v22  ;;  %v1064_v14 = vmul.f32 %v4218_v31, %v1000_v33  ;;  %3104 = vrcp.f32 %v811_v36  ;;  %2793 = vmatprep.subr.bf16.mxu0 %v2994_v28  ;;  %5622 = vst [vmem:[#allocation32_spill] sm:$0xff] %v4340_v57 }
 0x1e0   :  { %v1954_v63 = vsub.f32 0.0, %v1826_v42  ;;  %v1255_v49 = vadd.f32 -0.28449672, %v1191_v20  ;;  %v1193_v44 = vmul.f32 %v4177_v40, %v1129_v47  ;;  %v749_v5 = vmul.f32 0.3275911, %v4265_v32  ;;  %v5616_v47 = vld [vmem:[#allocation29_spill] sm:$0xff] }
 0x1e1   :  { %v4275_v27 = vmul.f32 %v2080_v51, %v4084_v54  ;;  %v1955_v50 = vsub.f32 0.0, %v1827_v53  ;;  %v1444_v25 = vmul.f32 %v4106_v60, %v1380_v58  ;;  %v4279_v43 = vmul.f32 0.70710677, %v4259_v18  ;;  %v5617_v60 = vld [vmem:[#allocation15_spill] sm:$0xff] }
 0x1e2   :  { %v4281_v22 = vpop.eup %3096  ;;  %v1446_v33 = vmul.f32 %v4113_v61, %v1382_v34  ;;  %v4285_v55 = vmul.f32 0.5, %v4121_v3  ;;  %v813_v20 = vadd.f32 1.0, %v749_v5  ;;  %v4289_v36 = vadd.f32 %v5616_v47, %v3465_v26 }
 0x1e3   :  { %5615 = vst [vmem:[#allocation14_spill] sm:$0xff] %v4275_v27  ;;  %v3099_v54 = vpop.eup %3098  ;;  %v1829_v51 = vsub.f32 1.0, %v4269_v56  ;;  %vm1893_vm5 = vcmp.ge.f32.partialorder %v5617_v60, 0.0  ;;  %v1128_v58 = vadd.f32 1.4214138, %v1064_v14  ;;  %v1512_v27 = vsub.f32 0.0, %v4143_v10 }
 0x1e4   :  { %v4295_v30 = vand.u32 2147483647, %v4279_v43  ;;  %v3101_v61 = vpop.eup %3100  ;;  %v2018_v3 = vsel %vm1890_vm3, %v1826_v42, %v1954_v63  ;;  %v1319_v34 = vmul.f32 %v4160_v4, %v1255_v49  ;;  %v1257_v5 = vadd.f32 -0.28449672, %v1193_v44  ;;  %v4313_v63 = vpop.f32.mrb[25].mxu1 }
 0x1e5   :  { %3106 = vrcp.f32 %v813_v20  ;;  %v2019_v28 = vsel %vm1891_vm4, %v1827_v53, %v1955_v50  ;;  %v4302_v56 = vmul.f32 %v3099_v54, %v1444_v25  ;;  %v938_v14 = vmul.f32 1.0614054, %v4281_v22  ;;  %5619 = vst [vmem:[#allocation26_spill] sm:$0xff] %v4313_v63 }
 0x1e6   :  { %3108 = vpow2.f32 %v1667_v7  ;;  %v1766_v47 = vmul.f32 %v3101_v61, %v1446_v33  ;;  %v748_v38 = vmul.f32 0.3275911, %v4295_v30  ;;  %v4307_v0 = vmul.f32 0.70710677, %v4289_v36 }
 0x1e7   :  { %v4311_v42 = vadd.f32 %v5618_v39, %v3447_v11  ;;  %v2082_v49 = vadd.f32 1.0, %v2018_v3  ;;  %v1957_v13 = vsub.f32 0.0, %v1829_v51  ;;  %v1192_v50 = vmul.f32 %v4218_v31, %v1128_v58 }
 0x1e8   :  { %v1576_v7 = vmul.f32 %v1512_v27, %v4143_v10  ;;  %v3103_v25 = vpop.eup %3102  ;;  %v1383_v53 = vadd.f32 0.2548296, %v1319_v34  ;;  %v1321_v44 = vmul.f32 %v4177_v40, %v1257_v5  ;;  %v812_v33 = vadd.f32 1.0, %v748_v38 }
 0x1e9   :  { %v4319_v20 = vand.u32 2147483647, %v4307_v0  ;;  %v4321_v54 = vpop.eup %3104  ;;  %v2083_v61 = vadd.f32 1.0, %v2019_v28  ;;  %v1828_v39 = vsub.f32 1.0, %v4302_v56  ;;  %vm1892_vm6 = vcmp.ge.f32.partialorder %v4015_v35, 0.0 }
 0x1ea   :  { %vm1894_vm7 = vcmp.ge.f32.partialorder %v4019_v6, 0.0  ;;  %v1002_v58 = vadd.f32 -1.4531521, %v938_v14  ;;  %v4327_v10 = vmul.f32 0.70710677, %v4311_v42  ;;  %v1830_v27 = vsub.f32 1.0, %v1766_v47 }
 0x1eb   :  { %v939_v3 = vmul.f32 1.0614054, %v4321_v54  ;;  %3110 = vrcp.f32 %v812_v33  ;;  %v750_v38 = vmul.f32 0.3275911, %v4319_v20  ;;  %v4332_v34 = vmul.f32 %v2082_v49, %v4129_v48 }
 0x1ec   :  { %5620 = vst [vmem:[#allocation29_spill] sm:$0xff] %v4327_v10  ;;  %v1256_v5 = vadd.f32 -0.28449672, %v1192_v50  ;;  %v1665_v28 = vmul.f32 1.442695, %v1576_v7  ;;  %v2021_v14 = vsel %vm1893_vm5, %v1829_v51, %v1957_v13  ;;  %v1447_v63 = vmul.f32 %v4160_v4, %v1383_v53  ;;  %v5623_v51 = vld [vmem:[#allocation33_spill] sm:$0xff] }
 0x1ed   :  { %5621 = vst [vmem:[#allocation15_spill] sm:$0xff] %v4332_v34  ;;  %v4335_v56 = vand.u32 2147483647, %v4327_v10  ;;  %v1385_v17 = vadd.f32 0.2548296, %v1321_v44  ;;  %v814_v47 = vadd.f32 1.0, %v750_v38  ;;  %v1066_v33 = vmul.f32 %v4281_v22, %v1002_v58 }
 0x1ee   :  { %v1514_v45 = vsub.f32 0.0, %v4202_v41  ;;  %v1003_v48 = vadd.f32 -1.4531521, %v939_v3  ;;  %v1956_v7 = vsub.f32 0.0, %v1828_v39  ;;  %v1958_v34 = vsub.f32 0.0, %v1830_v27  ;;  %v2995_v4 = vld [vmem:[#allocation7 + $0x38] sm:$0xff]  }
 0x1ef   :  { %v751_v49 = vmul.f32 0.3275911, %v4335_v56  ;;  %v4345_v50 = vpop.eup %3106  ;;  %3112 = vrcp.f32 %v814_v47  ;;  %v4349_v60 = vadd.f32 %v5623_v51, %v3449_v12  ;;  %v4352_v53 = vmul.f32 %v2083_v61, %v4149_v29  ;;  %2794 = vmatpush3.bf16.msra.mxu0 %v2995_v4 }
 0x1f0   :  { %v3109_v13 = vpop.eup %3108  ;;  %v1320_v44 = vmul.f32 %v4218_v31, %v1256_v5  ;;  %v941_v58 = vmul.f32 1.0614054, %v4345_v50  ;;  %v1767_v38 = vmul.f32 %v3103_v25, %v1447_v63  ;;  %v1449_v57 = vmul.f32 %v4177_v40, %v1385_v17  ;;  %v5625_v17 = vld [vmem:[#allocation19_spill] sm:$0xff] }
 0x1f1   :  { %5624 = vst [vmem:[#allocation33_spill] sm:$0xff] %v4352_v53  ;;  %v815_v3 = vadd.f32 1.0, %v751_v49  ;;  %3114 = vpow2.f32 %v1665_v28  ;;  %v4358_v47 = vmul.f32 0.5, %v4171_v21  ;;  %v2085_v51 = vadd.f32 1.0, %v2021_v14  ;;  %v5626_v28 = vld [vmem:[#allocation34_spill] sm:$0xff]  ;;  %v4386_v49 = vpop.f32.mrb[26].mxu1 }
 0x1f2   :  { %v1130_v23 = vadd.f32 1.4214138, %v1066_v33  ;;  %v1067_v10 = vmul.f32 %v4321_v54, %v1003_v48  ;;  %v2020_v29 = vsel %vm1892_vm6, %v1828_v39, %v1956_v7  ;;  %v2022_v61 = vsel %vm1894_vm7, %v1830_v27, %v1958_v34  ;;  %5627 = vst [vmem:[#allocation19_spill] sm:$0xff] %v4386_v49  ;;  %v2996_v53 = vld [vmem:[#allocation7 + $0xf8] sm:$0xff]   ;;  %v5633_v49 = vld [vmem:[#allocation37_spill] sm:$0xff] }
 0x1f3   :  { %3116 = vrcp.f32 %v815_v3  ;;  %v1578_v63 = vmul.f32 %v1514_v45, %v4202_v41  ;;  %v4367_v40 = vmul.f32 0.70710677, %v4349_v60  ;;  %vm1895_vm8 = vcmp.ge.f32.partialorder %v5625_v17, 0.0  ;;  %2857 = vmatprep.subr.bf16.mxu1 %v2996_v53 }
 0x1f4   :  { %v1384_v21 = vadd.f32 0.2548296, %v1320_v44  ;;  %v1515_v25 = vsub.f32 0.0, %v4239_v52  ;;  %v1005_v5 = vadd.f32 -1.4531521, %v941_v58  ;;  %v4373_v14 = vadd.f32 %v5626_v28, %v3457_v19 }
 0x1f5   :  { %v4375_v35 = vpop.eup %3110  ;;  %v1831_v39 = vsub.f32 1.0, %v1767_v38  ;;  %v4377_v6 = vmul.f32 %v3109_v13, %v1449_v57  ;;  %v4380_v45 = vmul.f32 0.5, %v4208_v1  ;;  %v4383_v41 = vand.u32 2147483647, %v4367_v40 }
 0x1f6   :  { %v2084_v27 = vadd.f32 1.0, %v2020_v29  ;;  %v2086_v34 = vadd.f32 1.0, %v2022_v61  ;;  %v1194_v33 = vmul.f32 %v4281_v22, %v1130_v23  ;;  %v1131_v48 = vadd.f32 1.4214138, %v1067_v10 }
 0x1f7   :  { %v4389_v7 = vmul.f32 %v2085_v51, %v4157_v16  ;;  %v940_v4 = vmul.f32 1.0614054, %v4375_v35  ;;  %v753_v57 = vmul.f32 0.3275911, %v4383_v41  ;;  %v4394_v1 = vmul.f32 0.70710677, %v4373_v14 }
 0x1f8   :  { %v1448_v13 = vmul.f32 %v4218_v31, %v1384_v21  ;;  %v1669_v44 = vmul.f32 1.442695, %v1578_v63  ;;  %v1579_v58 = vmul.f32 %v1515_v25, %v4239_v52  ;;  %v1069_v23 = vmul.f32 %v4345_v50, %v1005_v5  ;;  %v5631_v31 = vld [vmem:[#allocation35_spill] sm:$0xff] }
 0x1f9   :  { %5628 = vst [vmem:[#allocation34_spill] sm:$0xff] %v4389_v7  ;;  %v4399_v10 = vpop.eup %3112  ;;  %v1959_v3 = vsub.f32 0.0, %v1831_v39  ;;  %v1833_v16 = vsub.f32 1.0, %v4377_v6  ;;  %v817_v38 = vadd.f32 1.0, %v753_v57  ;;  %v4403_v51 = vand.u32 2147483647, %v4394_v1 }
 0x1fa   :  { %v4406_v29 = vmul.f32 %v2084_v27, %v4181_v37  ;;  %v4409_v61 = vmul.f32 %v2086_v34, %v4186_v24  ;;  %vm1897_vm9 = vcmp.ge.f32.partialorder %v5631_v31, 0.0  ;;  %v1258_v52 = vadd.f32 -0.28449672, %v1194_v33  ;;  %v4459_v31 = vpop.f32.mrb[27].mxu1 }
 0x1fb   :  { %v942_v63 = vmul.f32 1.0614054, %v4399_v10  ;;  %v3115_v21 = vpop.eup %3114  ;;  %v1195_v25 = vmul.f32 %v4321_v54, %v1131_v48  ;;  %v1517_v5 = vsub.f32 0.0, %v4265_v32  ;;  %v1004_v28 = vadd.f32 -1.4531521, %v940_v4  ;;  %v4421_v48 = vpop.f32.mrb[27].mxu0 }
 0x1fc   :  { %5629 = vst [vmem:[#allocation55_spill] sm:$0xff] %v4406_v29  ;;  %5630 = vst [vmem:[#allocation56_spill] sm:$0xff] %v4409_v61  ;;  %v752_v6 = vmul.f32 0.3275911, %v4403_v51  ;;  %v1768_v37 = vmul.f32 %v3115_v21, %v1448_v13  ;;  %v1671_v27 = vmul.f32 1.442695, %v1579_v58  ;;  %3118 = vrcp.f32 %v817_v38 }
 0x1fd   :  { %v4416_v57 = vpop.eup %3116  ;;  %v1133_v7 = vadd.f32 1.4214138, %v1069_v23  ;;  %v2023_v24 = vsel %vm1895_vm8, %v1831_v39, %v1959_v3  ;;  %v1961_v34 = vsub.f32 0.0, %v1833_v16  ;;  %3120 = vpow2.f32 %v1669_v44  ;;  %5632 = vst [vmem:[#allocation35_spill] sm:$0xff] %v4421_v48  ;;  %5635 = vst [vmem:[#allocation57_spill] sm:$0xff] %v4459_v31  ;;  %v5657_v48 = vld [vmem:[#allocation17_spill] sm:$0xff] }
 0x1fe   :  { %v943_v33 = vmul.f32 1.0614054, %v4416_v57  ;;  %v1322_v4 = vmul.f32 %v4281_v22, %v1258_v52  ;;  %v1006_v61 = vadd.f32 -1.4531521, %v942_v63  ;;  %v816_v29 = vadd.f32 1.0, %v752_v6 }
 0x1ff   :  { %v4426_v13 = vadd.f32 %v5633_v49, %v3465_v26  ;;  %vm1896_vm10 = vcmp.ge.f32.partialorder %v4137_v46, 0.0  ;;  %v1259_v58 = vadd.f32 -0.28449672, %v1195_v25  ;;  %v1581_v17 = vmul.f32 %v1517_v5, %v4265_v32 }
 0x200   :  { %v1068_v39 = vmul.f32 %v4375_v35, %v1004_v28  ;;  %v1007_v44 = vadd.f32 -1.4531521, %v943_v33  ;;  %v1832_v23 = vsub.f32 1.0, %v1768_v37  ;;  %v1197_v3 = vmul.f32 %v4345_v50, %v1133_v7 }
 0x201   :  { %v1516_v38 = vsub.f32 0.0, %v4295_v30  ;;  %3122 = vrcp.f32 %v816_v29  ;;  %v2087_v52 = vadd.f32 1.0, %v2023_v24  ;;  %v4434_v49 = vmul.f32 0.5, %v4233_v2 }
 0x202   :  { %3124 = vpow2.f32 %v1671_v27  ;;  %v4437_v63 = vmul.f32 0.5, %v4259_v18  ;;  %v1386_v21 = vadd.f32 0.2548296, %v1322_v4  ;;  %v1070_v32 = vmul.f32 %v4399_v10, %v1006_v61 }
 0x203   :  { %v1518_v25 = vsub.f32 0.0, %v4319_v20  ;;  %v4442_v53 = vmul.f32 0.70710677, %v4426_v13  ;;  %v2025_v7 = vsel %vm1897_vm9, %v1833_v16, %v1961_v34  ;;  %v1323_v29 = vmul.f32 %v4321_v54, %v1259_v58 }
 0x204   :  { %v1132_v5 = vadd.f32 1.4214138, %v1068_v39  ;;  %v1071_v2 = vmul.f32 %v4416_v57, %v1007_v44  ;;  %v1960_v28 = vsub.f32 0.0, %v1832_v23  ;;  %v1261_v6 = vadd.f32 -0.28449672, %v1197_v3 }
 0x205   :  { %v1675_v18 = vmul.f32 1.442695, %v1581_v17  ;;  %v1580_v37 = vmul.f32 %v1516_v38, %v4295_v30  ;;  %v4450_v61 = vmul.f32 %v2087_v52, %v4214_v62  ;;  %v4453_v27 = vmul.f32 0.5, %v4289_v36 }
 0x206   :  { %v1519_v24 = vsub.f32 0.0, %v4335_v56  ;;  %v4457_v16 = vand.u32 2147483647, %v4442_v53  ;;  %v4461_v34 = vpop.eup %3118  ;;  %v2089_v33 = vadd.f32 1.0, %v2025_v7  ;;  %v1450_v4 = vmul.f32 %v4281_v22, %v1386_v21 }
 0x207   :  { %5634 = vst [vmem:[#allocation37_spill] sm:$0xff] %v4450_v61  ;;  %v1134_v58 = vadd.f32 1.4214138, %v1070_v32  ;;  %v1582_v30 = vmul.f32 %v1518_v25, %v4319_v20  ;;  %v3121_v62 = vpop.eup %3120  ;;  %v1387_v17 = vadd.f32 0.2548296, %v1323_v29  ;;  %v1196_v36 = vmul.f32 %v4375_v35, %v1132_v5  ;;  %v5636_v20 = vld [vmem:[#allocation18_spill] sm:$0xff] }
 0x208   :  { %v1135_v39 = vadd.f32 1.4214138, %v1071_v2  ;;  %v754_v44 = vmul.f32 0.3275911, %v4457_v16  ;;  %v2024_v3 = vsel %vm1896_vm10, %v1832_v23, %v1960_v28  ;;  %v1325_v38 = vmul.f32 %v4345_v50, %v1261_v6  ;;  %v2997_v2 = vld [vmem:[#allocation7 + $0xb8] sm:$0xff]  }
 0x209   :  { %3126 = vpow2.f32 %v1675_v18  ;;  %v1673_v52 = vmul.f32 1.442695, %v1580_v37  ;;  %v1583_v7 = vmul.f32 %v1519_v24, %v4335_v56  ;;  %v945_v22 = vmul.f32 1.0614054, %v4461_v34  ;;  %2858 = vmatpush3.bf16.msra.mxu1 %v2997_v2 }
 0x20a   :  { %v818_v21 = vadd.f32 1.0, %v754_v44  ;;  %v4474_v32 = vadd.f32 %v5636_v20, %v3447_v11  ;;  %v4479_v29 = vmul.f32 %v2089_v33, %v4262_v59  ;;  %v1770_v46 = vmul.f32 %v3121_v62, %v1450_v4  ;;  %v5638_v20 = vld [vmem:[#allocation40_spill] sm:$0xff] }
 0x20b   :  { %v4476_v25 = vpop.eup %3122  ;;  %v1198_v23 = vmul.f32 %v4399_v10, %v1134_v58  ;;  %v1677_v5 = vmul.f32 1.442695, %v1582_v30  ;;  %v2088_v6 = vadd.f32 1.0, %v2024_v3  ;;  %v1451_v56 = vmul.f32 %v4321_v54, %v1387_v17  ;;  %v4496_v17 = vpop.f32.mrb[28].mxu0 }
 0x20c   :  { %5637 = vst [vmem:[#allocation18_spill] sm:$0xff] %v4479_v29  ;;  %v3125_v28 = vpop.eup %3124  ;;  %v1260_v18 = vadd.f32 -0.28449672, %v1196_v36  ;;  %v1199_v37 = vmul.f32 %v4416_v57, %v1135_v39  ;;  %v1389_v24 = vadd.f32 0.2548296, %v1325_v38  ;;  %3128 = vrcp.f32 %v818_v21  ;;  %5639 = vst [vmem:[#allocation40_spill] sm:$0xff] %v4496_v17 }
 0x20d   :  { %v944_v44 = vmul.f32 1.0614054, %v4476_v25  ;;  %v4487_v59 = vadd.f32 %v5638_v20, %v3449_v12  ;;  %vm1898_vm11 = vcmp.ge.f32.partialorder %v4192_v15, 0.0  ;;  %3130 = vpow2.f32 %v1673_v52  ;;  %v4498_v36 = vpop.f32.mrb[28].mxu1  ;;  %v5642_v15 = vld [vmem:[#allocation12_spill] sm:$0xff] }
 0x20e   :  { %v1679_v33 = vmul.f32 1.442695, %v1583_v7  ;;  %v1009_v4 = vadd.f32 -1.4531521, %v945_v22  ;;  %v4491_v58 = vmul.f32 0.70710677, %v4474_v32  ;;  %3132 = vpow2.f32 %v1677_v5 }
 0x20f   :  { %v1834_v54 = vsub.f32 1.0, %v1770_v46  ;;  %v1262_v30 = vadd.f32 -0.28449672, %v1198_v23  ;;  %v4494_v62 = vmul.f32 0.5, %v4311_v42  ;;  %5640 = vst [vmem:[#allocation58_spill] sm:$0xff] %v4498_v36  ;;  %v1771_v39 = vmul.f32 %v3125_v28, %v1451_v56 }
 0x210   :  { %v1324_v3 = vmul.f32 %v4375_v35, %v1260_v18  ;;  %v1263_v38 = vadd.f32 -0.28449672, %v1199_v37  ;;  %v4502_v52 = vmul.f32 0.5, %v4349_v60  ;;  %v1453_v7 = vmul.f32 %v4345_v50, %v1389_v24 }
 0x211   :  { %v1008_v22 = vadd.f32 -1.4531521, %v944_v44  ;;  %v4506_v21 = vand.u32 2147483647, %v4491_v58  ;;  %v4509_v42 = vmul.f32 0.70710677, %v4487_v59  ;;  %v4512_v46 = vmul.f32 %v2088_v6, %v4285_v55 }
 0x212   :  { %3134 = vpow2.f32 %v1679_v33  ;;  %v1073_v23 = vmul.f32 %v4461_v34, %v1009_v4  ;;  %v1521_v5 = vsub.f32 0.0, %v4383_v41  ;;  %v1962_v60 = vsub.f32 0.0, %v1834_v54 }
 0x213   :  { %5641 = vst [vmem:[#allocation59_spill] sm:$0xff] %v4512_v46  ;;  %v3127_v2 = vpop.eup %3126  ;;  %vm1899_vm12 = vcmp.ge.f32.partialorder %v4223_v9, 0.0  ;;  %v1326_v50 = vmul.f32 %v4399_v10, %v1262_v30  ;;  %v755_v28 = vmul.f32 0.3275911, %v4506_v21  ;;  %v4520_v56 = vand.u32 2147483647, %v4509_v42 }
 0x214   :  { %v1835_v18 = vsub.f32 1.0, %v1771_v39  ;;  %v1388_v37 = vadd.f32 0.2548296, %v1324_v3  ;;  %v1327_v55 = vmul.f32 %v4416_v57, %v1263_v38  ;;  %v1520_v6 = vsub.f32 0.0, %v4403_v51 }
 0x215   :  { %v1773_v24 = vmul.f32 %v3127_v2, %v1453_v7  ;;  %v1072_v44 = vmul.f32 %v4476_v25, %v1008_v22  ;;  %v819_v20 = vadd.f32 1.0, %v755_v28  ;;  %v757_v33 = vmul.f32 0.3275911, %v4520_v56 }
 0x216   :  { %v1137_v4 = vadd.f32 1.4214138, %v1073_v23  ;;  %v1585_v30 = vmul.f32 %v1521_v5, %v4383_v41  ;;  %v4528_v29 = vmul.f32 0.5, %v4373_v14  ;;  %v4531_v61 = vmul.f32 0.5, %v4426_v13  ;;  %v4533_v39 = vpop.eup %3128 }
 0x217   :  { %v2026_v3 = vsel %vm1898_vm11, %v1834_v54, %v1962_v60  ;;  %v1390_v38 = vadd.f32 0.2548296, %v1326_v50  ;;  %3136 = vrcp.f32 %v819_v20  ;;  %v821_v7 = vadd.f32 1.0, %v757_v33  ;;  %v3131_v22 = vpop.eup %3130 }
 0x218   :  { %v1963_v2 = vsub.f32 0.0, %v1835_v18  ;;  %vm1901_vm13 = vcmp.ge.f32.partialorder %v4254_v8, 0.0  ;;  %v1452_v41 = vmul.f32 %v4375_v35, %v1388_v37  ;;  %v1391_v23 = vadd.f32 0.2548296, %v1327_v55  ;;  %v3133_v5 = vpop.eup %3132  ;;  %v5643_v55 = vld [vmem:[#allocation43_spill] sm:$0xff]  ;;  %v5648_v8 = vld [vmem:[#allocation29_spill] sm:$0xff] }
 0x219   :  { %v946_v14 = vmul.f32 1.0614054, %v4533_v39  ;;  %v1837_v13 = vsub.f32 1.0, %v1773_v24  ;;  %v1136_v28 = vadd.f32 1.4214138, %v1072_v44  ;;  %v1584_v46 = vmul.f32 %v1520_v6, %v4403_v51 }
 0x21a   :  { %v4543_v54 = vadd.f32 %v5642_v15, %v3457_v19  ;;  %v1201_v60 = vmul.f32 %v4461_v34, %v1137_v4  ;;  %v1683_v50 = vmul.f32 1.442695, %v1585_v30  ;;  %3138 = vrcp.f32 %v821_v7  ;;  %v4558_v7 = vpop.f32.mrb[29].mxu0  ;;  %v4564_v15 = vpop.f32.mrb[29].mxu1 }
 0x21b   :  { %v1010_v20 = vadd.f32 -1.4531521, %v946_v14  ;;  %v2090_v33 = vadd.f32 1.0, %v2026_v3  ;;  %v1454_v35 = vmul.f32 %v4399_v10, %v1390_v38  ;;  %v4552_v24 = vadd.f32 %v5643_v55, %v3465_v26  ;;  %5644 = vst [vmem:[#allocation12_spill] sm:$0xff] %v4558_v7  ;;  %5645 = vst [vmem:[#allocation43_spill] sm:$0xff] %v4564_v15 }
 0x21c   :  { %v4548_v37 = vmul.f32 0.70710677, %v4543_v54  ;;  %v3135_v51 = vpop.eup %3134  ;;  %v2027_v6 = vsel %vm1899_vm12, %v1835_v18, %v1963_v2  ;;  %v1772_v44 = vmul.f32 %v3131_v22, %v1452_v41  ;;  %v1455_v4 = vmul.f32 %v4416_v57, %v1391_v23  ;;  %v5646_v57 = vld [vmem:[#allocation44_spill] sm:$0xff] }
 0x21d   :  { %v1074_v30 = vmul.f32 %v4533_v39, %v1010_v20  ;;  %v1965_v3 = vsub.f32 0.0, %v1837_v13  ;;  %v1200_v10 = vmul.f32 %v4476_v25, %v1136_v28  ;;  %v1681_v38 = vmul.f32 1.442695, %v1584_v46 }
 0x21e   :  { %v4562_v14 = vand.u32 2147483647, %v4548_v37  ;;  %v1265_v55 = vadd.f32 -0.28449672, %v1201_v60  ;;  %v1522_v9 = vsub.f32 0.0, %v4457_v16  ;;  %v4572_v22 = vadd.f32 %v5646_v57, %v3447_v11 }
 0x21f   :  { %v4568_v18 = vmul.f32 0.70710677, %v4552_v24  ;;  %v2091_v2 = vadd.f32 1.0, %v2027_v6  ;;  %vm1900_vm14 = vcmp.ge.f32.partialorder %v4279_v43, 0.0  ;;  %v1774_v41 = vmul.f32 %v3133_v5, %v1454_v35  ;;  %v5652_v43 = vld [vmem:[#allocation46_spill] sm:$0xff] }
 0x220   :  { %3140 = vpow2.f32 %v1683_v50  ;;  %v756_v46 = vmul.f32 0.3275911, %v4562_v14  ;;  %v1836_v23 = vsub.f32 1.0, %v1772_v44  ;;  %v1775_v28 = vmul.f32 %v3135_v51, %v1455_v4 }
 0x221   :  { %v1138_v20 = vadd.f32 1.4214138, %v1074_v30  ;;  %v4577_v60 = vand.u32 2147483647, %v4568_v18  ;;  %v4579_v15 = vpop.eup %3136  ;;  %v2029_v7 = vsel %vm1901_vm13, %v1837_v13, %v1965_v3  ;;  %v1264_v57 = vadd.f32 -0.28449672, %v1200_v10 }
 0x222   :  { %3142 = vpow2.f32 %v1681_v38  ;;  %v820_v6 = vadd.f32 1.0, %v756_v46  ;;  %vm1902_vm15 = vcmp.ge.f32.partialorder %v4307_v0, 0.0  ;;  %v1329_v5 = vmul.f32 %v4461_v34, %v1265_v55 }
 0x223   :  { %v1586_v50 = vmul.f32 %v1522_v9, %v4457_v16  ;;  %v947_v35 = vmul.f32 1.0614054, %v4579_v15  ;;  %v4588_v51 = vmul.f32 0.70710677, %v4572_v22  ;;  %v4591_v44 = vmul.f32 %v2090_v33, %v4358_v47  ;;  %v4600_v33 = vpop.f32.mrb[30].mxu0 }
 0x224   :  { %v1838_v4 = vsub.f32 1.0, %v1774_v41  ;;  %vm1903_vm0 = vcmp.ge.f32.partialorder %v5648_v8, 0.0  ;;  %3144 = vrcp.f32 %v820_v6  ;;  %v758_v13 = vmul.f32 0.3275911, %v4577_v60  ;;  %v4595_v30 = vpop.eup %3138  ;;  %5649 = vst [vmem:[#allocation29_spill] sm:$0xff] %v4600_v33 }
 0x225   :  { %5647 = vst [vmem:[#allocation44_spill] sm:$0xff] %v4591_v44  ;;  %v2093_v3 = vadd.f32 1.0, %v2029_v7  ;;  %v1964_v10 = vsub.f32 0.0, %v1836_v23  ;;  %v1839_v38 = vsub.f32 1.0, %v1775_v28  ;;  %v1202_v16 = vmul.f32 %v4533_v39, %v1138_v20 }
 0x226   :  { %v1328_v55 = vmul.f32 %v4476_v25, %v1264_v57  ;;  %v1011_v9 = vadd.f32 -1.4531521, %v947_v35  ;;  %v949_v46 = vmul.f32 1.0614054, %v4595_v30  ;;  %v822_v47 = vadd.f32 1.0, %v758_v13 }
 0x227   :  { %v4603_v41 = vmul.f32 %v2091_v2, %v4380_v45  ;;  %v1393_v6 = vadd.f32 0.2548296, %v1329_v5  ;;  %v1685_v44 = vmul.f32 1.442695, %v1586_v50  ;;  %v4606_v36 = vand.u32 2147483647, %v4588_v51 }
 0x228   :  { %v1966_v7 = vsub.f32 0.0, %v1838_v4  ;;  %v4609_v28 = vmul.f32 0.5, %v4474_v32  ;;  %v1013_v20 = vadd.f32 -1.4531521, %v949_v46  ;;  %3146 = vrcp.f32 %v822_v47 }
 0x229   :  { %5650 = vst [vmem:[#allocation60_spill] sm:$0xff] %v4603_v41  ;;  %v2028_v57 = vsel %vm1900_vm14, %v1836_v23, %v1964_v10  ;;  %v1967_v35 = vsub.f32 0.0, %v1839_v38  ;;  %v1266_v13 = vadd.f32 -0.28449672, %v1202_v16  ;;  %v759_v33 = vmul.f32 0.3275911, %v4606_v36 }
 0x22a   :  { %v3141_v45 = vpop.eup %3140  ;;  %v1392_v2 = vadd.f32 0.2548296, %v1328_v55  ;;  %v1075_v5 = vmul.f32 %v4579_v15, %v1011_v9  ;;  %v1523_v50 = vsub.f32 0.0, %v4506_v21  ;;  %v5651_v41 = vld [vmem:[#allocation45_spill] sm:$0xff]  ;;  %v1457_v32 = vmul.f32 %v4461_v34, %v1393_v6 }
 0x22b   :  { %v4618_v17 = vadd.f32 %v5651_v41, %v3449_v12  ;;  %3148 = vpow2.f32 %v1685_v44  ;;  %v823_v46 = vadd.f32 1.0, %v759_v33  ;;  %v4623_v23 = vadd.f32 %v5652_v43, %v3457_v19  ;;  %v4634_v41 = vpop.f32.mrb[30].mxu1 }
 0x22c   :  { %v3143_v10 = vpop.eup %3142  ;;  %v2030_v16 = vsel %vm1902_vm15, %v1838_v4, %v1966_v7  ;;  %v4628_v55 = vmul.f32 0.5, %v4487_v59  ;;  %v1077_v9 = vmul.f32 %v4595_v30, %v1013_v20  ;;  %5653 = vst [vmem:[#allocation45_spill] sm:$0xff] %v4634_v41  ;;  %v2092_v34 = vadd.f32 1.0, %v2028_v57 }
 0x22d   :  { %v4632_v47 = vmul.f32 0.70710677, %v4618_v17  ;;  %v2031_v44 = vsel %vm1903_vm0, %v1839_v38, %v1967_v35  ;;  %v1330_v33 = vmul.f32 %v4533_v39, %v1266_v13  ;;  %3150 = vrcp.f32 %v823_v46 }
 0x22e   :  { %v4639_v6 = vpop.eup %3144  ;;  %v1456_v0 = vmul.f32 %v4476_v25, %v1392_v2  ;;  %v1139_v59 = vadd.f32 1.4214138, %v1075_v5  ;;  %v1587_v4 = vmul.f32 %v1523_v50, %v4506_v21  ;;  %v2094_v20 = vadd.f32 1.0, %v2030_v16 }
 0x22f   :  { %v4644_v7 = vand.u32 2147483647, %v4632_v47  ;;  %v1777_v43 = vmul.f32 %v3141_v45, %v1457_v32  ;;  %v948_v57 = vmul.f32 1.0614054, %v4639_v6  ;;  %v4648_v8 = vmul.f32 0.70710677, %v4623_v23 }
 0x230   :  { %v2095_v38 = vadd.f32 1.0, %v2031_v44  ;;  %v1141_v35 = vadd.f32 1.4214138, %v1077_v9  ;;  %v1525_v13 = vsub.f32 0.0, %v4520_v56  ;;  %v4653_v25 = vmul.f32 %v2093_v3, %v4434_v49  ;;  %v4662_v44 = vpop.f32.mrb[31].mxu0 }
 0x231   :  { %v761_v46 = vmul.f32 0.3275911, %v4644_v7  ;;  %v1394_v21 = vadd.f32 0.2548296, %v1330_v33  ;;  %v1012_v2 = vadd.f32 -1.4531521, %v948_v57  ;;  %v1776_v50 = vmul.f32 %v3143_v10, %v1456_v0 }
 0x232   :  { %5654 = vst [vmem:[#allocation46_spill] sm:$0xff] %v4653_v25  ;;  %v4656_v5 = vand.u32 2147483647, %v4648_v8  ;;  %v4658_v45 = vpop.eup %3146  ;;  %vm1905_vm1 = vcmp.ge.f32.partialorder %v4367_v40, 0.0  ;;  %v1203_v32 = vmul.f32 %v4579_v15, %v1139_v59  ;;  %v1687_v16 = vmul.f32 1.442695, %v1587_v4 }
 0x233   :  { %v825_v9 = vadd.f32 1.0, %v761_v46  ;;  %5655 = vst [vmem:[#allocation61_spill] sm:$0xff] %v4662_v44  ;;  %v1841_v41 = vsub.f32 1.0, %v1777_v43  ;;  %v1076_v49 = vmul.f32 %v4639_v6, %v1012_v2  ;;  %v950_v3 = vmul.f32 1.0614054, %v4658_v45 }
 0x234   :  { %v760_v33 = vmul.f32 0.3275911, %v4656_v5  ;;  %v1205_v57 = vmul.f32 %v4595_v30, %v1141_v35  ;;  %v1589_v25 = vmul.f32 %v1525_v13, %v4520_v56  ;;  %v1524_v31 = vsub.f32 0.0, %v4562_v14 }
 0x235   :  { %3152 = vrcp.f32 %v825_v9  ;;  %v3149_v10 = vpop.eup %3148  ;;  %vm1904_vm2 = vcmp.ge.f32.partialorder %v4394_v1, 0.0  ;;  %v1458_v0 = vmul.f32 %v4533_v39, %v1394_v21  ;;  %v1140_v59 = vadd.f32 1.4214138, %v1076_v49 }
 0x236   :  { %v1014_v4 = vadd.f32 -1.4531521, %v950_v3  ;;  %v824_v43 = vadd.f32 1.0, %v760_v33  ;;  %v4673_v46 = vmul.f32 %v2092_v34, %v4437_v63  ;;  %v4676_v2 = vmul.f32 %v2094_v20, %v4453_v27 }
 0x237   :  { %v1840_v35 = vsub.f32 1.0, %v1776_v50  ;;  %v1267_v44 = vadd.f32 -0.28449672, %v1203_v32  ;;  %v4678_v56 = vpop.eup %3150  ;;  %v1969_v13 = vsub.f32 0.0, %v1841_v41  ;;  %v4683_v39 = vadd.f32 %v5657_v48, %v3465_v26 }
 0x238   :  { %5656 = vst [vmem:[#allocation62_spill] sm:$0xff] %v4676_v2  ;;  %v1078_v9 = vmul.f32 %v4658_v45, %v1014_v4  ;;  %3154 = vrcp.f32 %v824_v43  ;;  %v1269_v21 = vadd.f32 -0.28449672, %v1205_v57  ;;  %v1691_v49 = vmul.f32 1.442695, %v1589_v25  ;;  %v4695_v57 = vpop.f32.mrb[31].mxu1 }
 0x239   :  { %v1588_v63 = vmul.f32 %v1524_v31, %v4562_v14  ;;  %v951_v34 = vmul.f32 1.0614054, %v4678_v56  ;;  %v4688_v27 = vmul.f32 %v2095_v38, %v4494_v62  ;;  %v1778_v20 = vmul.f32 %v3149_v10, %v1458_v0 }
 0x23a   :  { %3156 = vpow2.f32 %v1687_v16  ;;  %v1204_v50 = vmul.f32 %v4639_v6, %v1140_v59  ;;  %v1968_v32 = vsub.f32 0.0, %v1840_v35  ;;  %v1331_v3 = vmul.f32 %v4579_v15, %v1267_v44 }
 0x23b   :  { %5658 = vst [vmem:[#allocation17_spill] sm:$0xff] %v4688_v27  ;;  %v4693_v33 = vmul.f32 0.5, %v4543_v54  ;;  %v1015_v48 = vadd.f32 -1.4531521, %v951_v34  ;;  %v2033_v31 = vsel %vm1905_vm1, %v1841_v41, %v1969_v13  ;;  %v1142_v14 = vadd.f32 1.4214138, %v1078_v9 }
 0x23c   :  { %v1526_v62 = vsub.f32 0.0, %v4577_v60  ;;  %v4701_v38 = vmul.f32 0.70710677, %v4683_v39  ;;  %vm1906_vm3 = vcmp.ge.f32.partialorder %v4442_v53, 0.0  ;;  %v1333_v25 = vmul.f32 %v4595_v30, %v1269_v21 }
 0x23d   :  { %3158 = vpow2.f32 %v1691_v49  ;;  %v1689_v16 = vmul.f32 1.442695, %v1588_v63  ;;  %v1079_v54 = vmul.f32 %v4678_v56, %v1015_v48  ;;  %v1842_v44 = vsub.f32 1.0, %v1778_v20  ;;  %v5659_v49 = vld [vmem:[#allocation47_spill] sm:$0xff] }
 0x23e   :  { %v1268_v10 = vadd.f32 -0.28449672, %v1204_v50  ;;  %v4707_v0 = vmul.f32 0.5, %v4552_v24  ;;  %v4710_v40 = vand.u32 2147483647, %v4701_v38  ;;  %v2097_v59 = vadd.f32 1.0, %v2033_v31 }
 0x23f   :  { %v4712_v41 = vpop.eup %3152  ;;  %v2032_v4 = vsel %vm1904_vm2, %v1840_v35, %v1968_v32  ;;  %v1395_v43 = vadd.f32 0.2548296, %v1331_v3  ;;  %v4717_v13 = vmul.f32 0.5, %v4572_v22  ;;  %v1206_v9 = vmul.f32 %v4658_v45, %v1142_v14 }
 0x240   :  { %v1590_v21 = vmul.f32 %v1526_v62, %v4577_v60  ;;  %v953_v24 = vmul.f32 1.0614054, %v4712_v41  ;;  %v4724_v63 = vadd.f32 %v5659_v49, %v3447_v11  ;;  %v1397_v34 = vadd.f32 0.2548296, %v1333_v25 }
 0x241   :  { %3160 = vpow2.f32 %v1689_v16  ;;  %v1143_v20 = vadd.f32 1.4214138, %v1079_v54  ;;  %v762_v1 = vmul.f32 0.3275911, %v4710_v40  ;;  %v1970_v50 = vsub.f32 0.0, %v1842_v44 }
 0x242   :  { %v4727_v35 = vpop.eup %3154  ;;  %v1332_v22 = vmul.f32 %v4639_v6, %v1268_v10  ;;  %v1527_v32 = vsub.f32 0.0, %v4606_v36  ;;  %v1529_v60 = vsub.f32 0.0, %v4644_v7  ;;  %v1459_v3 = vmul.f32 %v4579_v15, %v1395_v43 }
 0x243   :  { %v1017_v48 = vadd.f32 -1.4531521, %v953_v24  ;;  %v952_v31 = vmul.f32 1.0614054, %v4727_v35  ;;  %v826_v14 = vadd.f32 1.0, %v762_v1  ;;  %v4735_v25 = vmul.f32 %v2097_v59, %v4502_v52 }
 0x244   :  { %v3157_v62 = vpop.eup %3156  ;;  %v2096_v16 = vadd.f32 1.0, %v2032_v4  ;;  %v1270_v54 = vadd.f32 -0.28449672, %v1206_v9  ;;  %v4738_v49 = vmul.f32 0.70710677, %v4724_v63  ;;  %v1461_v10 = vmul.f32 %v4595_v30, %v1397_v34 }
 0x245   :  { %5660 = vst [vmem:[#allocation47_spill] sm:$0xff] %v4735_v25  ;;  %v1693_v27 = vmul.f32 1.442695, %v1590_v21  ;;  %v1207_v2 = vmul.f32 %v4678_v56, %v1143_v20  ;;  %3162 = vrcp.f32 %v826_v14  ;;  %v2034_v15 = vsel %vm1906_vm3, %v1842_v44, %v1970_v50  ;;  %v5662_v44 = vld [vmem:[#allocation49_spill] sm:$0xff] }
 0x246   :  { %v1396_v43 = vadd.f32 0.2548296, %v1332_v22  ;;  %v1591_v24 = vmul.f32 %v1527_v32, %v4606_v36  ;;  %v4746_v52 = vand.u32 2147483647, %v4738_v49  ;;  %v1779_v4 = vmul.f32 %v3157_v62, %v1459_v3 }
 0x247   :  { %v3159_v59 = vpop.eup %3158  ;;  %v1081_v9 = vmul.f32 %v4712_v41, %v1017_v48  ;;  %v1593_v1 = vmul.f32 %v1529_v60, %v4644_v7  ;;  %v1016_v30 = vadd.f32 -1.4531521, %v952_v31  ;;  %v4751_v21 = vmul.f32 %v2096_v16, %v4528_v29 }
 0x248   :  { %v1334_v34 = vmul.f32 %v4658_v45, %v1270_v54  ;;  %v763_v53 = vmul.f32 0.3275911, %v4746_v52  ;;  %v4757_v36 = vadd.f32 %v5662_v44, %v3449_v12  ;;  %v1781_v20 = vmul.f32 %v3159_v59, %v1461_v10  ;;  %v5663_v10 = vld [vmem:[#allocation51_spill] sm:$0xff] }
 0x249   :  { %5661 = vst [vmem:[#allocation63_spill] sm:$0xff] %v4751_v21  ;;  %3164 = vpow2.f32 %v1693_v27  ;;  %v1271_v50 = vadd.f32 -0.28449672, %v1207_v2  ;;  %v4760_v22 = vmul.f32 0.5, %v4618_v17  ;;  %v2098_v32 = vadd.f32 1.0, %v2034_v15 }
 0x24a   :  { %vm1907_vm4 = vcmp.ge.f32.partialorder %v4491_v58, 0.0  ;;  %v1460_v29 = vmul.f32 %v4639_v6, %v1396_v43  ;;  %v1695_v7 = vmul.f32 1.442695, %v1591_v24  ;;  %v827_v60 = vadd.f32 1.0, %v763_v53 }
 0x24b   :  { %v3161_v3 = vpop.eup %3160  ;;  %v1843_v48 = vsub.f32 1.0, %v1779_v4  ;;  %v1145_v31 = vadd.f32 1.4214138, %v1081_v9  ;;  %v1699_v14 = vmul.f32 1.442695, %v1593_v1  ;;  %v1080_v62 = vmul.f32 %v4727_v35, %v1016_v30 }
 0x24c   :  { %v1398_v16 = vadd.f32 0.2548296, %v1334_v34  ;;  %v1528_v27 = vsub.f32 0.0, %v4656_v5  ;;  %3166 = vrcp.f32 %v827_v60  ;;  %v4767_v17 = vmul.f32 0.70710677, %v4757_v36 }
 0x24d   :  { %v1845_v2 = vsub.f32 1.0, %v1781_v20  ;;  %vm1909_vm5 = vcmp.ge.f32.partialorder %v4509_v42, 0.0  ;;  %v1335_v6 = vmul.f32 %v4678_v56, %v1271_v50  ;;  %v4772_v54 = vmul.f32 0.5, %v4623_v23 }
 0x24e   :  { %v4776_v15 = vadd.f32 %v5663_v10, %v3457_v19  ;;  %v4779_v43 = vmul.f32 %v2098_v32, %v4531_v61  ;;  %v1780_v24 = vmul.f32 %v3161_v3, %v1460_v29  ;;  %3168 = vpow2.f32 %v1695_v7 }
 0x24f   :  { %v4782_v59 = vand.u32 2147483647, %v4767_v17  ;;  %v4784_v4 = vpop.eup %3162  ;;  %v1971_v9 = vsub.f32 0.0, %v1843_v48  ;;  %v1209_v1 = vmul.f32 %v4712_v41, %v1145_v31  ;;  %3170 = vpow2.f32 %v1699_v14 }
 0x250   :  { %5664 = vst [vmem:[#allocation49_spill] sm:$0xff] %v4779_v43  ;;  %v1144_v23 = vadd.f32 1.4214138, %v1080_v62  ;;  %v1462_v30 = vmul.f32 %v4658_v45, %v1398_v16  ;;  %v1592_v34 = vmul.f32 %v1528_v27, %v4656_v5  ;;  %v954_v53 = vmul.f32 1.0614054, %v4784_v4  ;;  %v5665_v45 = vld [vmem:[#allocation23_spill] sm:$0xff] }
 0x251   :  { %v765_v61 = vmul.f32 0.3275911, %v4782_v59  ;;  %v1973_v44 = vsub.f32 0.0, %v1845_v2  ;;  %vm1908_vm6 = vcmp.ge.f32.partialorder %v4548_v37, 0.0  ;;  %v1399_v20 = vadd.f32 0.2548296, %v1335_v6 }
 0x252   :  { %v1530_v50 = vsub.f32 0.0, %v4710_v40  ;;  %v4794_v32 = vmul.f32 0.70710677, %v4776_v15  ;;  %v1844_v29 = vsub.f32 1.0, %v1780_v24  ;;  %v1018_v7 = vadd.f32 -1.4531521, %v954_v53 }
 0x253   :  { %v829_v60 = vadd.f32 1.0, %v765_v61  ;;  %v4798_v3 = vadd.f32 %v5665_v45, %v3465_v26  ;;  %v3165_v5 = vpop.eup %3164  ;;  %v2035_v31 = vsel %vm1907_vm4, %v1843_v48, %v1971_v9  ;;  %v1273_v14 = vadd.f32 -0.28449672, %v1209_v1 }
 0x254   :  { %v1208_v62 = vmul.f32 %v4727_v35, %v1144_v23  ;;  %v4804_v16 = vand.u32 2147483647, %v4794_v32  ;;  %v1782_v27 = vmul.f32 %v3165_v5, %v1462_v30  ;;  %v1697_v6 = vmul.f32 1.442695, %v1592_v34 }
 0x255   :  { %v1082_v10 = vmul.f32 %v4784_v4, %v1018_v7  ;;  %3172 = vrcp.f32 %v829_v60  ;;  %v1463_v24 = vmul.f32 %v4678_v56, %v1399_v20  ;;  %v4809_v53 = vmul.f32 0.5, %v4683_v39 }
 0x256   :  { %v1594_v61 = vmul.f32 %v1530_v50, %v4710_v40  ;;  %v764_v58 = vmul.f32 0.3275911, %v4804_v16  ;;  %v4813_v48 = vpop.eup %3166  ;;  %v2099_v9 = vadd.f32 1.0, %v2035_v31  ;;  %v2037_v1 = vsel %vm1909_vm5, %v1845_v2, %v1973_v44 }
 0x257   :  { %v1972_v23 = vsub.f32 0.0, %v1844_v29  ;;  %v4818_v30 = vmul.f32 0.70710677, %v4798_v3  ;;  %vm1910_vm7 = vcmp.ge.f32.partialorder %v4568_v18, 0.0  ;;  %v1337_v56 = vmul.f32 %v4712_v41, %v1273_v14 }
 0x258   :  { %v1272_v39 = vadd.f32 -0.28449672, %v1208_v62  ;;  %v955_v34 = vmul.f32 1.0614054, %v4813_v48  ;;  %v828_v40 = vadd.f32 1.0, %v764_v58  ;;  %v3169_v20 = vpop.eup %3168  ;;  %v1846_v50 = vsub.f32 1.0, %v1782_v27 }
 0x259   :  { %3174 = vpow2.f32 %v1697_v6  ;;  %v1146_v7 = vadd.f32 1.4214138, %v1082_v10  ;;  %v4824_v60 = vand.u32 2147483647, %v4818_v30  ;;  %v3171_v42 = vpop.eup %3170  ;;  %v1783_v2 = vmul.f32 %v3169_v20, %v1463_v24  ;;  %v5666_v62 = vld [vmem:[#allocation24_spill] sm:$0xff] }
 0x25a   :  { %v1701_v44 = vmul.f32 1.442695, %v1594_v61  ;;  %v1019_v45 = vadd.f32 -1.4531521, %v955_v34  ;;  %3176 = vrcp.f32 %v828_v40  ;;  %v2101_v5 = vadd.f32 1.0, %v2037_v1 }
 0x25b   :  { %v2036_v31 = vsel %vm1908_vm6, %v1844_v29, %v1972_v23  ;;  %v766_v14 = vmul.f32 0.3275911, %v4824_v60  ;;  %v4831_v58 = vadd.f32 %v5666_v62, %v3447_v11  ;;  %v4834_v27 = vmul.f32 %v2099_v9, %v4609_v28 }
 0x25c   :  { %v1401_v6 = vadd.f32 0.2548296, %v1337_v56  ;;  %v1336_v10 = vmul.f32 %v4727_v35, %v1272_v39  ;;  %v1083_v24 = vmul.f32 %v4813_v48, %v1019_v45  ;;  %v1974_v61 = vsub.f32 0.0, %v1846_v50 }
 0x25d   :  { %5667 = vst [vmem:[#allocation51_spill] sm:$0xff] %v4834_v27  ;;  %vm1911_vm8 = vcmp.ge.f32.partialorder %v4588_v51, 0.0  ;;  %v1210_v37 = vmul.f32 %v4784_v4, %v1146_v7  ;;  %v1531_v29 = vsub.f32 0.0, %v4746_v52  ;;  %v830_v1 = vadd.f32 1.0, %v766_v14 }
 0x25e   :  { %v2100_v23 = vadd.f32 1.0, %v2036_v31  ;;  %v1847_v34 = vsub.f32 1.0, %v1783_v2  ;;  %3178 = vpow2.f32 %v1701_v44  ;;  %v4842_v40 = vmul.f32 0.5, %v4724_v63  ;;  %v5669_v2 = vld [vmem:[#allocation25_spill] sm:$0xff] }
 0x25f   :  { %v4844_v28 = vpop.eup %3172  ;;  %v4847_v9 = vmul.f32 %v2101_v5, %v4628_v55  ;;  %v1147_v56 = vadd.f32 1.4214138, %v1083_v24  ;;  %3180 = vrcp.f32 %v830_v1  ;;  %v4850_v39 = vmul.f32 0.70710677, %v4831_v58 }
 0x260   :  { %v1465_v20 = vmul.f32 %v4712_v41, %v1401_v6  ;;  %v1400_v7 = vadd.f32 0.2548296, %v1336_v10  ;;  %v957_v45 = vmul.f32 1.0614054, %v4844_v28  ;;  %v4856_v44 = vadd.f32 %v5669_v2, %v3449_v12 }
 0x261   :  { %5668 = vst [vmem:[#allocation23_spill] sm:$0xff] %v4847_v9  ;;  %v2038_v63 = vsel %vm1910_vm7, %v1846_v50, %v1974_v61  ;;  %v1274_v31 = vadd.f32 -0.28449672, %v1210_v37  ;;  %v1595_v55 = vmul.f32 %v1531_v29, %v4746_v52  ;;  %v4862_v5 = vand.u32 2147483647, %v4850_v39  ;;  %v5671_v52 = vld [vmem:[#allocation13_spill] sm:$0xff] }
 0x262   :  { %v4865_v14 = vmul.f32 %v2100_v23, %v4693_v33  ;;  %v1975_v41 = vsub.f32 0.0, %v1847_v34  ;;  %v4868_v62 = vmul.f32 0.5, %v4757_v36  ;;  %v1021_v6 = vadd.f32 -1.4531521, %v957_v45 }
 0x263   :  { %v3175_v10 = vpop.eup %3174  ;;  %v1211_v24 = vmul.f32 %v4813_v48, %v1147_v56  ;;  %v767_v18 = vmul.f32 0.3275911, %v4862_v5  ;;  %v4873_v50 = vmul.f32 0.70710677, %v4856_v44  ;;  %v4877_v61 = vadd.f32 %v5671_v52, %v3457_v19 }
 0x264   :  { %5670 = vst [vmem:[#allocation24_spill] sm:$0xff] %v4865_v14  ;;  %v4879_v37 = vpop.eup %3176  ;;  %v2102_v33 = vadd.f32 1.0, %v2038_v63  ;;  %v1785_v29 = vmul.f32 %v3171_v42, %v1465_v20  ;;  %v1464_v36 = vmul.f32 %v4727_v35, %v1400_v7  ;;  %v1085_v1 = vmul.f32 %v4844_v28, %v1021_v6 }
 0x265   :  { %v1338_v23 = vmul.f32 %v4784_v4, %v1274_v31  ;;  %v1703_v56 = vmul.f32 1.442695, %v1595_v55  ;;  %v956_v45 = vmul.f32 1.0614054, %v4879_v37  ;;  %v831_v2 = vadd.f32 1.0, %v767_v18 }
 0x266   :  { %v2039_v9 = vsel %vm1911_vm8, %v1847_v34, %v1975_v41  ;;  %v1149_v25 = vadd.f32 1.4214138, %v1085_v1  ;;  %v1533_v52 = vsub.f32 0.0, %v4782_v59  ;;  %v4889_v27 = vand.u32 2147483647, %v4873_v50 }
 0x267   :  { %vm1913_vm9 = vcmp.ge.f32.partialorder %v4632_v47, 0.0  ;;  %v1275_v35 = vadd.f32 -0.28449672, %v1211_v24  ;;  %v1020_v42 = vadd.f32 -1.4531521, %v956_v45  ;;  %3182 = vrcp.f32 %v831_v2 }
 0x268   :  { %v4893_v20 = vmul.f32 0.70710677, %v4877_v61  ;;  %v3179_v7 = vpop.eup %3178  ;;  %v1849_v63 = vsub.f32 1.0, %v1785_v29  ;;  %v1784_v31 = vmul.f32 %v3175_v10, %v1464_v36  ;;  %v1532_v51 = vsub.f32 0.0, %v4804_v16 }
 0x269   :  { %v769_v34 = vmul.f32 0.3275911, %v4889_v27  ;;  %v4897_v55 = vpop.eup %3180  ;;  %v1402_v41 = vadd.f32 0.2548296, %v1338_v23  ;;  %3184 = vpow2.f32 %v1703_v56  ;;  %v4900_v6 = vmul.f32 0.5, %v4776_v15 }
 0x26a   :  { %v1084_v24 = vmul.f32 %v4879_v37, %v1020_v42  ;;  %v2103_v18 = vadd.f32 1.0, %v2039_v9  ;;  %v1213_v1 = vmul.f32 %v4844_v28, %v1149_v25  ;;  %v1597_v45 = vmul.f32 %v1533_v52, %v4782_v59 }
 0x26b   :  { %v958_v10 = vmul.f32 1.0614054, %v4897_v55  ;;  %vm1912_vm10 = vcmp.ge.f32.partialorder %v4648_v8, 0.0  ;;  %v1339_v29 = vmul.f32 %v4813_v48, %v1275_v35  ;;  %v833_v2 = vadd.f32 1.0, %v769_v34 }
 0x26c   :  { %v1148_v36 = vadd.f32 1.4214138, %v1084_v24  ;;  %v4909_v23 = vand.u32 2147483647, %v4893_v20  ;;  %v1977_v15 = vsub.f32 0.0, %v1849_v63  ;;  %v1848_v56 = vsub.f32 1.0, %v1784_v31 }
 0x26d   :  { %v1596_v42 = vmul.f32 %v1532_v51, %v4804_v16  ;;  %v1022_v9 = vadd.f32 -1.4531521, %v958_v10  ;;  %v1466_v25 = vmul.f32 %v4784_v4, %v1402_v41  ;;  %3186 = vrcp.f32 %v833_v2  ;;  %v5672_v16 = vld [vmem:[#allocation26_spill] sm:$0xff] }
 0x26e   :  { %v1212_v59 = vmul.f32 %v4879_v37, %v1148_v36  ;;  %v768_v52 = vmul.f32 0.3275911, %v4909_v23  ;;  %v1277_v43 = vadd.f32 -0.28449672, %v1213_v1  ;;  %v1707_v14 = vmul.f32 1.442695, %v1597_v45 }
 0x26f   :  { %v1086_v35 = vmul.f32 %v4897_v55, %v1022_v9  ;;  %v1534_v34 = vsub.f32 0.0, %v4824_v60  ;;  %v4918_v24 = vmul.f32 %v2102_v33, %v4707_v0  ;;  %v1403_v31 = vadd.f32 0.2548296, %v1339_v29 }
 0x270   :  { %v832_v21 = vadd.f32 1.0, %v768_v52  ;;  %v4922_v51 = vadd.f32 %v5672_v16, %v3465_v26  ;;  %v2041_v4 = vsel %vm1913_vm9, %v1849_v63, %v1977_v15  ;;  %v1976_v41 = vsub.f32 0.0, %v1848_v56 }
 0x271   :  { %v1276_v10 = vadd.f32 -0.28449672, %v1212_v59  ;;  %v1150_v1 = vadd.f32 1.4214138, %v1086_v35  ;;  %v4926_v45 = vpop.eup %3182  ;;  %v4929_v36 = vmul.f32 %v2103_v18, %v4717_v13  ;;  %v1786_v2 = vmul.f32 %v3179_v7, %v1466_v25  ;;  %v5674_v13 = vld [vmem:[#allocation32_spill] sm:$0xff] }
 0x272   :  { %v1705_v0 = vmul.f32 1.442695, %v1596_v42  ;;  %3188 = vrcp.f32 %v832_v21  ;;  %v1341_v33 = vmul.f32 %v4844_v28, %v1277_v43  ;;  %v1598_v29 = vmul.f32 %v1534_v34, %v4824_v60 }
 0x273   :  { %5673 = vst [vmem:[#allocation25_spill] sm:$0xff] %v4929_v36  ;;  %3190 = vpow2.f32 %v1707_v14  ;;  %v959_v9 = vmul.f32 1.0614054, %v4926_v45  ;;  %v3185_v47 = vpop.eup %3184  ;;  %v2105_v63 = vadd.f32 1.0, %v2041_v4  ;;  %v1467_v15 = vmul.f32 %v4813_v48, %v1403_v31 }
 0x274   :  { %v4936_v59 = vmul.f32 0.70710677, %v4922_v51  ;;  %v4940_v18 = vadd.f32 %v5674_v13, %v3447_v11  ;;  %v2040_v21 = vsel %vm1912_vm10, %v1848_v56, %v1976_v41  ;;  %vm1914_vm11 = vcmp.ge.f32.partialorder %v4701_v38, 0.0 }
 0x275   :  { %v1340_v43 = vmul.f32 %v4879_v37, %v1276_v10  ;;  %v1214_v60 = vmul.f32 %v4897_v55, %v1150_v1  ;;  %v1023_v14 = vadd.f32 -1.4531521, %v959_v9  ;;  %v1850_v7 = vsub.f32 1.0, %v1786_v2 }
 0x276   :  { %3192 = vpow2.f32 %v1705_v0  ;;  %v4948_v48 = vmul.f32 0.5, %v4798_v3  ;;  %v4951_v42 = vand.u32 2147483647, %v4936_v59  ;;  %v1405_v25 = vadd.f32 0.2548296, %v1341_v33 }
 0x277   :  { %v1709_v52 = vmul.f32 1.442695, %v1598_v29  ;;  %v1087_v8 = vmul.f32 %v4926_v45, %v1023_v14  ;;  %v4955_v56 = vmul.f32 0.70710677, %v4940_v18  ;;  %v4957_v35 = vpop.eup %3186  ;;  %v2104_v34 = vadd.f32 1.0, %v2040_v21 }
 0x278   :  { %v1787_v31 = vmul.f32 %v3185_v47, %v1467_v15  ;;  %v1535_v16 = vsub.f32 0.0, %v4862_v5  ;;  %v770_v4 = vmul.f32 0.3275911, %v4951_v42  ;;  %v4962_v3 = vmul.f32 %v2105_v63, %v4760_v22 }
 0x279   :  { %v1404_v41 = vadd.f32 0.2548296, %v1340_v43  ;;  %v1278_v10 = vadd.f32 -0.28449672, %v1214_v60  ;;  %v961_v1 = vmul.f32 1.0614054, %v4957_v35  ;;  %v1469_v9 = vmul.f32 %v4844_v28, %v1405_v25 }
 0x27a   :  { %5675 = vst [vmem:[#allocation13_spill] sm:$0xff] %v4962_v3  ;;  %v1978_v2 = vsub.f32 0.0, %v1850_v7  ;;  %v1151_v0 = vadd.f32 1.4214138, %v1087_v8  ;;  %v1537_v33 = vsub.f32 0.0, %v4889_v27  ;;  %v834_v29 = vadd.f32 1.0, %v770_v4 }
 0x27b   :  { %vm1915_vm12 = vcmp.ge.f32.partialorder %v4738_v49, 0.0  ;;  %3194 = vpow2.f32 %v1709_v52  ;;  %v1025_v47 = vadd.f32 -1.4531521, %v961_v1  ;;  %v4969_v15 = vand.u32 2147483647, %v4955_v56  ;;  %v5676_v4 = vld [vmem:[#allocation19_spill] sm:$0xff] }
 0x27c   :  { %v4971_v22 = vpop.eup %3188  ;;  %v1851_v63 = vsub.f32 1.0, %v1787_v31  ;;  %v4974_v13 = vmul.f32 0.5, %v4831_v58  ;;  %v1599_v21 = vmul.f32 %v1535_v16, %v4862_v5  ;;  %3196 = vrcp.f32 %v834_v29 }
 0x27d   :  { %v3191_v43 = vpop.eup %3190  ;;  %v1468_v60 = vmul.f32 %v4879_v37, %v1404_v41  ;;  %v1342_v14 = vmul.f32 %v4897_v55, %v1278_v10  ;;  %v1089_v28 = vmul.f32 %v4957_v35, %v1025_v47  ;;  %v960_v25 = vmul.f32 1.0614054, %v4971_v22 }
 0x27e   :  { %v2042_v52 = vsel %vm1914_vm11, %v1850_v7, %v1978_v2  ;;  %v1215_v8 = vmul.f32 %v4926_v45, %v1151_v0  ;;  %v1601_v58 = vmul.f32 %v1537_v33, %v4889_v27  ;;  %v771_v31 = vmul.f32 0.3275911, %v4969_v15 }
 0x27f   :  { %v4987_v5 = vmul.f32 %v2104_v34, %v4772_v54  ;;  %v1789_v16 = vmul.f32 %v3191_v43, %v1469_v9  ;;  %v1153_v37 = vadd.f32 1.4214138, %v1089_v28  ;;  %v4991_v41 = vadd.f32 %v5676_v4, %v3449_v12 }
 0x280   :  { %v3193_v10 = vpop.eup %3192  ;;  %v1979_v1 = vsub.f32 0.0, %v1851_v63  ;;  %v1711_v29 = vmul.f32 1.442695, %v1599_v21  ;;  %v1024_v38 = vadd.f32 -1.4531521, %v960_v25  ;;  %v835_v7 = vadd.f32 1.0, %v771_v31 }
 0x281   :  { %v2106_v2 = vadd.f32 1.0, %v2042_v52  ;;  %v1788_v0 = vmul.f32 %v3193_v10, %v1468_v60  ;;  %v1406_v47 = vadd.f32 0.2548296, %v1342_v14  ;;  %v4994_v27 = vmul.f32 0.5, %v4856_v44  ;;  %v5677_v14 = vld [vmem:[#allocation35_spill] sm:$0xff] }
 0x282   :  { %vm1917_vm13 = vcmp.ge.f32.partialorder %v4767_v17, 0.0  ;;  %v1279_v54 = vadd.f32 -0.28449672, %v1215_v8  ;;  %v1715_v34 = vmul.f32 1.442695, %v1601_v58  ;;  %v1088_v33 = vmul.f32 %v4971_v22, %v1024_v38 }
 0x283   :  { %3198 = vrcp.f32 %v835_v7  ;;  %v1853_v9 = vsub.f32 1.0, %v1789_v16  ;;  %v1217_v43 = vmul.f32 %v4957_v35, %v1153_v37  ;;  %v5000_v21 = vmul.f32 0.5, %v4877_v61 }
 0x284   :  { %v5003_v28 = vmul.f32 0.70710677, %v4991_v41  ;;  %v2043_v44 = vsel %vm1915_vm12, %v1851_v63, %v1979_v1  ;;  %vm1916_vm14 = vcmp.ge.f32.partialorder %v4794_v32, 0.0  ;;  %3200 = vpow2.f32 %v1711_v29 }
 0x285   :  { %v1536_v60 = vsub.f32 0.0, %v4909_v23  ;;  %v5011_v25 = vadd.f32 %v5677_v14, %v3457_v19  ;;  %v3195_v52 = vpop.eup %3194  ;;  %v1852_v8 = vsub.f32 1.0, %v1788_v0  ;;  %v1470_v61 = vmul.f32 %v4897_v55, %v1406_v47 }
 0x286   :  { %v1152_v58 = vadd.f32 1.4214138, %v1088_v33  ;;  %v5015_v31 = vand.u32 2147483647, %v5003_v28  ;;  %v5017_v16 = vpop.eup %3196  ;;  %v5020_v49 = vmul.f32 %v2106_v2, %v4809_v53  ;;  %v1343_v63 = vmul.f32 %v4926_v45, %v1279_v54 }
 0x287   :  { %3202 = vpow2.f32 %v1715_v34  ;;  %v5024_v37 = vmul.f32 0.70710677, %v5011_v25  ;;  %v1981_v4 = vsub.f32 0.0, %v1853_v9  ;;  %v1281_v10 = vadd.f32 -0.28449672, %v1217_v43 }
 0x288   :  { %5678 = vst [vmem:[#allocation26_spill] sm:$0xff] %v5020_v49  ;;  %v962_v1 = vmul.f32 1.0614054, %v5017_v16  ;;  %v1538_v55 = vsub.f32 0.0, %v4951_v42  ;;  %v2107_v29 = vadd.f32 1.0, %v2043_v44  ;;  %v1600_v38 = vmul.f32 %v1536_v60, %v4909_v23 }
 0x289   :  { %v773_v7 = vmul.f32 0.3275911, %v5015_v31  ;;  %v5031_v53 = vand.u32 2147483647, %v5024_v37  ;;  %v1980_v2 = vsub.f32 0.0, %v1852_v8  ;;  %v1790_v0 = vmul.f32 %v3195_v52, %v1470_v61 }
 0x28a   :  { %v1216_v47 = vmul.f32 %v4971_v22, %v1152_v58  ;;  %v1026_v54 = vadd.f32 -1.4531521, %v962_v1  ;;  %v1407_v34 = vadd.f32 0.2548296, %v1343_v63  ;;  %v5035_v33 = vmul.f32 0.5, %v4922_v51  ;;  %v5679_v58 = vld [vmem:[#allocation57_spill] sm:$0xff] }
 0x28b   :  { %v837_v43 = vadd.f32 1.0, %v773_v7  ;;  %v772_v14 = vmul.f32 0.3275911, %v5031_v53  ;;  %v2045_v23 = vsel %vm1917_vm13, %v1853_v9, %v1981_v4  ;;  %v1345_v44 = vmul.f32 %v4957_v35, %v1281_v10 }
 0x28c   :  { %v1090_v60 = vmul.f32 %v5017_v16, %v1026_v54  ;;  %v1602_v3 = vmul.f32 %v1538_v55, %v4951_v42  ;;  %vm1918_vm15 = vcmp.ge.f32.partialorder %v4818_v30, 0.0  ;;  %v1539_v61 = vsub.f32 0.0, %v4969_v15 }
 0x28d   :  { %v5043_v52 = vpop.eup %3198  ;;  %3204 = vrcp.f32 %v837_v43  ;;  %v836_v51 = vadd.f32 1.0, %v772_v14  ;;  %v5049_v63 = vadd.f32 %v5679_v58, %v3465_v26  ;;  %v2044_v17 = vsel %vm1916_vm14, %v1852_v8, %v1980_v2 }
 0x28e   :  { %v1854_v9 = vsub.f32 1.0, %v1790_v0  ;;  %v1280_v4 = vadd.f32 -0.28449672, %v1216_v47  ;;  %v963_v10 = vmul.f32 1.0614054, %v5043_v52  ;;  %v3201_v42 = vpop.eup %3200  ;;  %v2109_v1 = vadd.f32 1.0, %v2045_v23 }
 0x28f   :  { %v1471_v55 = vmul.f32 %v4926_v45, %v1407_v34  ;;  %v1713_v7 = vmul.f32 1.442695, %v1600_v38  ;;  %3206 = vrcp.f32 %v836_v51  ;;  %v5056_v54 = vmul.f32 %v2107_v29, %v4842_v40  ;;  %v5680_v38 = vld [vmem:[#allocation40_spill] sm:$0xff] }
 0x290   :  { %v1409_v43 = vadd.f32 0.2548296, %v1345_v44  ;;  %v1154_v14 = vadd.f32 1.4214138, %v1090_v60  ;;  %v1027_v58 = vadd.f32 -1.4531521, %v963_v10  ;;  %v1603_v8 = vmul.f32 %v1539_v61, %v4969_v15 }
 0x291   :  { %v3203_v36 = vpop.eup %3202  ;;  %v2108_v49 = vadd.f32 1.0, %v2044_v17  ;;  %v1717_v32 = vmul.f32 1.442695, %v1602_v3  ;;  %v5060_v2 = vmul.f32 0.70710677, %v5049_v63  ;;  %v1982_v0 = vsub.f32 0.0, %v1854_v9 }
 0x292   :  { %v1344_v47 = vmul.f32 %v4971_v22, %v1280_v4  ;;  %v1091_v45 = vmul.f32 %v5043_v52, %v1027_v58  ;;  %v5066_v40 = vadd.f32 %v5680_v38, %v3447_v11  ;;  %v1791_v29 = vmul.f32 %v3201_v42, %v1471_v55  ;;  %v5683_v55 = vld [vmem:[#allocation39_spill] sm:$0xff]  ;;  %v5685_v38 = vld [vmem:[#allocation28_spill] sm:$0xff] }
 0x293   :  { %3208 = vpow2.f32 %v1713_v7  ;;  %v5069_v34 = vmul.f32 0.5, %v4940_v18  ;;  %v5072_v3 = vand.u32 2147483647, %v5060_v2  ;;  %v5075_v15 = vmul.f32 %v2109_v1, %v4868_v62  ;;  %v5682_v1 = vld [vmem:[#allocation38_spill] sm:$0xff] }
 0x294   :  { %v1473_v23 = vmul.f32 %v4957_v35, %v1409_v43  ;;  %v1218_v44 = vmul.f32 %v5017_v16, %v1154_v14  ;;  %v1155_v60 = vadd.f32 1.4214138, %v1091_v45  ;;  %v5080_v61 = vmul.f32 %v2108_v49, %v4900_v6 }
 0x295   :  { %5681 = vst [vmem:[#allocation32_spill] sm:$0xff] %v5075_v15  ;;  %3210 = vpow2.f32 %v1717_v32  ;;  %v1719_v51 = vmul.f32 1.442695, %v1603_v8  ;;  %v774_v17 = vmul.f32 0.3275911, %v5072_v3  ;;  %v2046_v18 = vsel %vm1918_vm15, %v1854_v9, %v1982_v0 }
 0x296   :  { %vm1919_vm0 = vcmp.ge.f32.partialorder %v4850_v39, 0.0  ;;  %v1408_v4 = vadd.f32 0.2548296, %v1344_v47  ;;  %v1541_v62 = vsub.f32 0.0, %v5015_v31  ;;  %v5088_v35 = vmul.f32 0.70710677, %v5066_v40 }
 0x297   :  { %v5090_v10 = vpop.eup %3204  ;;  %v1855_v42 = vsub.f32 1.0, %v1791_v29  ;;  %v5093_v6 = vmul.f32 0.5, %v4991_v41  ;;  %v838_v49 = vadd.f32 1.0, %v774_v17  ;;  %v2192_v7 = vpack.c.bf16 %v5683_v55, %v5682_v1  ;;  %v5684_v41 = vld [vmem:[#allocation58_spill] sm:$0xff]  ;;  %v5686_v29 = vld [vmem:[#allocation27_spill] sm:$0xff] }
 0x298   :  { %v1793_v30 = vmul.f32 %v3203_v36, %v1473_v23  ;;  %v1282_v9 = vadd.f32 -0.28449672, %v1218_v44  ;;  %v1219_v43 = vmul.f32 %v5043_v52, %v1155_v60  ;;  %v965_v14 = vmul.f32 1.0614054, %v5090_v10 }
 0x299   :  { %v5099_v58 = vpop.eup %3206  ;;  %v2110_v32 = vadd.f32 1.0, %v2046_v18  ;;  %3212 = vrcp.f32 %v838_v49  ;;  %v5102_v8 = vand.u32 2147483647, %v5088_v35  ;;  %v5106_v0 = vadd.f32 %v5684_v41, %v3449_v12  ;;  %2518 = vmatprep.mubr.bf16.mxu0 %v2192_v7 }
 0x29a   :  { %v1472_v47 = vmul.f32 %v4971_v22, %v1408_v4  ;;  %3214 = vpow2.f32 %v1719_v51  ;;  %v1029_v36 = vadd.f32 -1.4531521, %v965_v14  ;;  %v1605_v45 = vmul.f32 %v1541_v62, %v5015_v31 }
 0x29b   :  { %v5687_v23 = vpack.c.bf16 %v5685_v38, %v5686_v29  ;;  %v1983_v44 = vsub.f32 0.0, %v1855_v42  ;;  %vm1921_vm1 = vcmp.ge.f32.partialorder %v4873_v50, 0.0  ;;  %v964_v60 = vmul.f32 1.0614054, %v5099_v58  ;;  %v5688_v29 = vld [vmem:[#allocation22_spill] sm:$0xff] }
 0x29c   :  { %v1540_v17 = vsub.f32 0.0, %v5031_v53  ;;  %v775_v18 = vmul.f32 0.3275911, %v5102_v8  ;;  %v1857_v49 = vsub.f32 1.0, %v1793_v30  ;;  %v1346_v22 = vmul.f32 %v5017_v16, %v1282_v9 }
 0x29d   :  { %2519 = vmatmul.mubr.bf16.vlgmr.msra.gmra.mrb[32].mxu0 %v5687_v23  ;;  %v1283_v51 = vadd.f32 -0.28449672, %v1219_v43  ;;  %v1093_v4 = vmul.f32 %v5090_v10, %v1029_v36  ;;  %v3209_v31 = vpop.eup %3208  ;;  %v5120_v62 = vmul.f32 %v2110_v32, %v4948_v48  ;;  %v1028_v1 = vadd.f32 -1.4531521, %v964_v60  ;;  %v5689_v23 = vld [vmem:[#allocation41_spill] sm:$0xff] }
 0x29e   :  { %v839_v55 = vadd.f32 1.0, %v775_v18  ;;  %v5123_v7 = vmul.f32 0.70710677, %v5106_v0  ;;  %v1792_v14 = vmul.f32 %v3209_v31, %v1472_v47  ;;  %v1723_v38 = vmul.f32 1.442695, %v1605_v45  ;;  %v5690_v18 = vld [vmem:[#allocation31_spill] sm:$0xff] }
 0x29f   :  { %v1157_v41 = vadd.f32 1.4214138, %v1093_v4  ;;  %v2194_v30 = vpack.c.bf16 %v5689_v23, %v5688_v29  ;;  %v3211_v15 = vpop.eup %3210  ;;  %v2047_v9 = vsel %vm1919_vm0, %v1855_v42, %v1983_v44  ;;  %v1092_v43 = vmul.f32 %v5099_v58, %v1028_v1  ;;  %v5691_v4 = vld [vmem:[#allocation30_spill] sm:$0xff] }
 0x2a0   :  { %3216 = vrcp.f32 %v839_v55  ;;  %v5131_v48 = vand.u32 2147483647, %v5123_v7  ;;  %v1985_v32 = vsub.f32 0.0, %v1857_v49  ;;  %v1410_v36 = vadd.f32 0.2548296, %v1346_v22 }
 0x2a1   :  { %v1221_v60 = vmul.f32 %v5090_v10, %v1157_v41  ;;  %v1604_v47 = vmul.f32 %v1540_v17, %v5031_v53  ;;  %2615 = vmatprep.mubr.bf16.mxu1 %v2194_v30  ;;  %vm1920_vm2 = vcmp.ge.f32.partialorder %v4893_v20, 0.0  ;;  %v1347_v45 = vmul.f32 %v5043_v52, %v1283_v51  ;;  %v5693_v53 = vld [vmem:[#allocation12_spill] sm:$0xff] }
 0x2a2   :  { %v5138_v39 = vmul.f32 0.5, %v5011_v25  ;;  %v1156_v42 = vadd.f32 1.4214138, %v1092_v43  ;;  %v777_v44 = vmul.f32 0.3275911, %v5131_v48  ;;  %v5692_v31 = vpack.c.bf16 %v5690_v18, %v5691_v4 }
 0x2a3   :  { %v2111_v22 = vadd.f32 1.0, %v2047_v9  ;;  %v1856_v1 = vsub.f32 1.0, %v1792_v14  ;;  %3218 = vpow2.f32 %v1723_v38  ;;  %v5146_v17 = vadd.f32 %v5693_v53, %v3457_v19  ;;  %v5148_v55 = vpop.eup %3212 }
 0x2a4   :  { %2616 = vmatmul.mubr.bf16.vlgmr.msra.gmra.mrb[32].mxu1 %v5692_v31  ;;  %v1285_v51 = vadd.f32 -0.28449672, %v1221_v60  ;;  %v1220_v25 = vmul.f32 %v5099_v58, %v1156_v42  ;;  %v1542_v41 = vsub.f32 0.0, %v5072_v3  ;;  %v841_v29 = vadd.f32 1.0, %v777_v44  ;;  %v3215_v23 = vpop.eup %3214  ;;  %v5694_v31 = vld [vmem:[#allocation43_spill] sm:$0xff] }
 0x2a5   :  { %v2049_v30 = vsel %vm1921_vm1, %v1857_v49, %v1985_v32  ;;  %v1474_v9 = vmul.f32 %v5017_v16, %v1410_v36  ;;  %v1721_v14 = vmul.f32 1.442695, %v1604_v47  ;;  %v966_v38 = vmul.f32 1.0614054, %v5148_v55 }
 0x2a6   :  { %v1411_v43 = vadd.f32 0.2548296, %v1347_v45  ;;  %v1284_v18 = vadd.f32 -0.28449672, %v1220_v25  ;;  %3220 = vrcp.f32 %v841_v29  ;;  %v5157_v4 = vmul.f32 0.70710677, %v5146_v17 }
 0x2a7   :  { %v5160_v60 = vmul.f32 %v2111_v22, %v4974_v13  ;;  %v1984_v42 = vsub.f32 0.0, %v1856_v1  ;;  %v1030_v44 = vadd.f32 -1.4531521, %v966_v38  ;;  %v5164_v50 = vadd.f32 %v5694_v31, %v3465_v26 }
 0x2a8   :  { %v1349_v16 = vmul.f32 %v5090_v10, %v1285_v51  ;;  %v1606_v49 = vmul.f32 %v1542_v41, %v5072_v3  ;;  %v1543_v32 = vsub.f32 0.0, %v5102_v8  ;;  %v5170_v36 = vand.u32 2147483647, %v5157_v4 }
 0x2a9   :  { %5695 = vst [vmem:[#allocation19_spill] sm:$0xff] %v5164_v50  ;;  %v2113_v47 = vadd.f32 1.0, %v2049_v30  ;;  %v1348_v45 = vmul.f32 %v5099_v58, %v1284_v18  ;;  %v5174_v13 = vmul.f32 0.5, %v5049_v63  ;;  %v1094_v22 = vmul.f32 %v5148_v55, %v1030_v44 }
 0x2aa   :  { %v5177_v53 = vpop.eup %3216  ;;  %v1794_v25 = vmul.f32 %v3211_v15, %v1474_v9  ;;  %v1475_v51 = vmul.f32 %v5043_v52, %v1411_v43  ;;  %3222 = vpow2.f32 %v1721_v14  ;;  %v776_v3 = vmul.f32 0.3275911, %v5170_v36 }
 0x2ab   :  { %v2048_v41 = vsel %vm1920_vm2, %v1856_v1, %v1984_v42  ;;  %v1158_v29 = vadd.f32 1.4214138, %v1094_v22  ;;  %v967_v30 = vmul.f32 1.0614054, %v5177_v53  ;;  %v5185_v38 = vmul.f32 0.70710677, %v5164_v50 }
 0x2ac   :  { %v1413_v63 = vadd.f32 0.2548296, %v1349_v16  ;;  %v1725_v18 = vmul.f32 1.442695, %v1606_v49  ;;  %v1607_v44 = vmul.f32 %v1543_v32, %v5102_v8  ;;  %v840_v31 = vadd.f32 1.0, %v776_v3  ;;  %v5697_v32 = vld [vmem:[#allocation29_spill] sm:$0xff] }
 0x2ad   :  { %5696 = vst [vmem:[#allocation35_spill] sm:$0xff] %v5185_v38  ;;  %v3219_v15 = vpop.eup %3218  ;;  %vm1922_vm3 = vcmp.ge.f32.partialorder %v4936_v59, 0.0  ;;  %v1412_v52 = vadd.f32 0.2548296, %v1348_v45  ;;  %v1222_v9 = vmul.f32 %v5148_v55, %v1158_v29  ;;  %v1031_v14 = vadd.f32 -1.4531521, %v967_v30 }
 0x2ae   :  { %v5191_v20 = vand.u32 2147483647, %v5185_v38  ;;  %v1858_v1 = vsub.f32 1.0, %v1794_v25  ;;  %v1795_v43 = vmul.f32 %v3215_v23, %v1475_v51  ;;  %v5194_v42 = vmul.f32 0.5, %v5066_v40 }
 0x2af   :  { %3224 = vrcp.f32 %v840_v31  ;;  %v1286_v16 = vadd.f32 -0.28449672, %v1222_v9  ;;  %v1095_v8 = vmul.f32 %v5177_v53, %v1031_v14  ;;  %v5200_v45 = vadd.f32 %v5697_v32, %v3447_v11 }
 0x2b0   :  { %v778_v49 = vmul.f32 0.3275911, %v5191_v20  ;;  %v5202_v22 = vpop.eup %3220  ;;  %v2112_v3 = vadd.f32 1.0, %v2048_v41  ;;  %v1477_v29 = vmul.f32 %v5090_v10, %v1413_v63  ;;  %3226 = vpow2.f32 %v1725_v18 }
 0x2b1   :  { %v1727_v23 = vmul.f32 1.442695, %v1607_v44  ;;  %v1476_v40 = vmul.f32 %v5099_v58, %v1412_v52  ;;  %v1350_v25 = vmul.f32 %v5148_v55, %v1286_v16  ;;  %v1159_v51 = vadd.f32 1.4214138, %v1095_v8 }
 0x2b2   :  { %v969_v30 = vmul.f32 1.0614054, %v5202_v22  ;;  %v1986_v31 = vsub.f32 0.0, %v1858_v1  ;;  %v1859_v9 = vsub.f32 1.0, %v1795_v43  ;;  %vm1923_vm4 = vcmp.ge.f32.partialorder %v4955_v56, 0.0 }
 0x2b3   :  { %v1545_v11 = vsub.f32 0.0, %v5131_v48  ;;  %v842_v14 = vadd.f32 1.0, %v778_v49  ;;  %v1414_v32 = vadd.f32 0.2548296, %v1350_v25  ;;  %v1223_v41 = vmul.f32 %v5177_v53, %v1159_v51 }
 0x2b4   :  { %v1033_v10 = vadd.f32 -1.4531521, %v969_v30  ;;  %v5212_v63 = vmul.f32 0.70710677, %v5200_v45  ;;  %v3223_v58 = vpop.eup %3222  ;;  %v5215_v18 = vmul.f32 %v2113_v47, %v4994_v27  ;;  %v5218_v44 = vmul.f32 %v2112_v3, %v5000_v21  ;;  %v5698_v27 = vld [vmem:[#allocation45_spill] sm:$0xff] }
 0x2b5   :  { %v1797_v52 = vmul.f32 %v3219_v15, %v1477_v29  ;;  %3228 = vrcp.f32 %v842_v14  ;;  %v1796_v43 = vmul.f32 %v3223_v58, %v1476_v40  ;;  %v1287_v16 = vadd.f32 -0.28449672, %v1223_v41 }
 0x2b6   :  { %3230 = vpow2.f32 %v1727_v23  ;;  %v1097_v8 = vmul.f32 %v5202_v22, %v1033_v10  ;;  %v2050_v49 = vsel %vm1922_vm3, %v1858_v1, %v1986_v31  ;;  %v1609_v25 = vmul.f32 %v1545_v11, %v5131_v48 }
 0x2b7   :  { %v715_v51 = vand.u32 2147483647, %v5212_v63  ;;  %v5227_v47 = vadd.f32 %v5698_v27, %v3449_v12  ;;  %v1987_v21 = vsub.f32 0.0, %v1859_v9  ;;  %v1478_v15 = vmul.f32 %v5148_v55, %v1414_v32 }
 0x2b8   :  { %v1351_v3 = vmul.f32 %v5177_v53, %v1287_v16  ;;  %v1161_v29 = vadd.f32 1.4214138, %v1097_v8  ;;  %v1861_v40 = vsub.f32 1.0, %v1797_v52  ;;  %vm1925_vm5 = vcmp.ge.f32.partialorder %v5003_v28, 0.0 }
 0x2b9   :  { %v5231_v23 = vpop.eup %3224  ;;  %vm1924_vm6 = vcmp.ge.f32.partialorder %v5024_v37, 0.0  ;;  %v1544_v59 = vsub.f32 0.0, %v5170_v36  ;;  %v779_v48 = vmul.f32 0.3275911, %v715_v51  ;;  %v5237_v1 = vmul.f32 0.70710677, %v5227_v47 }
 0x2ba   :  { %v1860_v12 = vsub.f32 1.0, %v1796_v43  ;;  %v1415_v30 = vadd.f32 0.2548296, %v1351_v3  ;;  %v1225_v55 = vmul.f32 %v5202_v22, %v1161_v29  ;;  %v968_v31 = vmul.f32 1.0614054, %v5231_v23  ;;  %v3227_v11 = vpop.eup %3226  ;;  %v5703_v37 = vld [vmem:[#allocation50_spill] sm:$0xff] }
 0x2bb   :  { %v2114_v14 = vadd.f32 1.0, %v2050_v49  ;;  %v1731_v32 = vmul.f32 1.442695, %v1609_v25  ;;  %v843_v41 = vadd.f32 1.0, %v779_v48  ;;  %v717_v10 = vand.u32 2147483647, %v5237_v1 }
 0x2bc   :  { %v2051_v58 = vsel %vm1923_vm4, %v1859_v9, %v1987_v21  ;;  %v1798_v52 = vmul.f32 %v3227_v11, %v1478_v15  ;;  %v1289_v16 = vadd.f32 -0.28449672, %v1225_v55  ;;  %v1032_v8 = vadd.f32 -1.4531521, %v968_v31 }
 0x2bd   :  { %v1479_v27 = vmul.f32 %v5177_v53, %v1415_v30  ;;  %v1608_v43 = vmul.f32 %v1544_v59, %v5170_v36  ;;  %3232 = vrcp.f32 %v843_v41  ;;  %v781_v3 = vmul.f32 0.3275911, %v717_v10  ;;  %v5699_v30 = vld [vmem:[#allocation61_spill] sm:$0xff] }
 0x2be   :  { %v1989_v29 = vsub.f32 0.0, %v1861_v40  ;;  %v1988_v50 = vsub.f32 0.0, %v1860_v12  ;;  %v1353_v49 = vmul.f32 %v5202_v22, %v1289_v16  ;;  %v1546_v25 = vsub.f32 0.0, %v5191_v20 }
 0x2bf   :  { %v5248_v48 = vpop.eup %3228  ;;  %v5251_v56 = vmul.f32 %v2114_v14, %v5035_v33  ;;  %vm1926_vm7 = vcmp.ge.f32.partialorder %v5060_v2, 0.0  ;;  %3234 = vpow2.f32 %v1731_v32  ;;  %v1096_v53 = vmul.f32 %v5231_v23, %v1032_v8 }
 0x2c0   :  { %v845_v9 = vadd.f32 1.0, %v781_v3  ;;  %v3231_v36 = vpop.eup %3230  ;;  %v2115_v21 = vadd.f32 1.0, %v2051_v58  ;;  %v1862_v15 = vsub.f32 1.0, %v1798_v52  ;;  %v1547_v59 = vsub.f32 0.0, %v715_v51 }
 0x2c1   :  { %v5257_v55 = vadd.f32 %v5699_v30, %v3457_v19  ;;  %v1799_v31 = vmul.f32 %v3231_v36, %v1479_v27  ;;  %v1729_v11 = vmul.f32 1.442695, %v1608_v43  ;;  %v970_v41 = vmul.f32 1.0614054, %v5248_v48  ;;  %v5702_v43 = vld [vmem:[#allocation20_spill] sm:$0xff] }
 0x2c2   :  { %3236 = vrcp.f32 %v845_v9  ;;  %v2053_v33 = vsel %vm1925_vm5, %v1861_v40, %v1989_v29  ;;  %v2052_v14 = vsel %vm1924_vm6, %v1860_v12, %v1988_v50  ;;  %v1417_v32 = vadd.f32 0.2548296, %v1353_v49 }
 0x2c3   :  { %5700 = vst [vmem:[#allocation57_spill] sm:$0xff] %v5257_v55  ;;  %v1610_v58 = vmul.f32 %v1546_v25, %v5191_v20  ;;  %v1160_v52 = vadd.f32 1.4214138, %v1096_v53  ;;  %v1034_v16 = vadd.f32 -1.4531521, %v970_v41  ;;  %v5270_v19 = vadd.f32 %v4695_v57, %v3465_v26 }
 0x2c4   :  { %v5266_v8 = vmul.f32 0.70710677, %v5257_v55  ;;  %v1990_v27 = vsub.f32 0.0, %v1862_v15  ;;  %vm1927_vm8 = vcmp.ge.f32.partialorder %v5088_v35, 0.0  ;;  %v1611_v28 = vmul.f32 %v1547_v59, %v715_v51 }
 0x2c5   :  { %5701 = vst [vmem:[#allocation40_spill] sm:$0xff] %v5270_v19  ;;  %v1549_v40 = vsub.f32 0.0, %v717_v10  ;;  %v2196_v50 = vpack.c.bf16 %v5703_v37, %v5702_v43  ;;  %v5276_v12 = vmul.f32 %v2115_v21, %v5069_v34  ;;  %v1863_v20 = vsub.f32 1.0, %v1799_v31 }
 0x2c6   :  { %v1098_v3 = vmul.f32 %v5248_v48, %v1034_v16  ;;  %v5280_v29 = vand.u32 2147483647, %v5266_v8  ;;  %v1481_v26 = vmul.f32 %v5202_v22, %v1417_v32  ;;  %3238 = vpow2.f32 %v1729_v11 }
 0x2c7   :  { %v1733_v57 = vmul.f32 1.442695, %v1610_v58  ;;  %v5284_v49 = vmul.f32 0.70710677, %v5270_v19  ;;  %2526 = vmatprep.mubr.bf16.mxu0 %v2196_v50  ;;  %v5286_v51 = vpop.eup %3232  ;;  %v2117_v25 = vadd.f32 1.0, %v2053_v33  ;;  %v2116_v53 = vadd.f32 1.0, %v2052_v14 }
 0x2c8   :  { %v1224_v34 = vmul.f32 %v5231_v23, %v1160_v52  ;;  %v780_v9 = vmul.f32 0.3275911, %v5280_v29  ;;  %v2054_v36 = vsel %vm1926_vm7, %v1862_v15, %v1990_v27  ;;  %v971_v21 = vmul.f32 1.0614054, %v5286_v51  ;;  %v5705_v58 = vld [vmem:[#allocation48_spill] sm:$0xff]  ;;  %v5729_v19 = vld [vmem:[#allocation17_spill] sm:$0xff] }
 0x2c9   :  { %5704 = vst [vmem:[#allocation38_spill] sm:$0xff] %v5284_v49  ;;  %v1735_v22 = vmul.f32 1.442695, %v1611_v28  ;;  %v1613_v59 = vmul.f32 %v1549_v40, %v717_v10  ;;  %v3235_v30 = vpop.eup %3234  ;;  %v1991_v31 = vsub.f32 0.0, %v1863_v20  ;;  %v1162_v11 = vadd.f32 1.4214138, %v1098_v3 }
 0x2ca   :  { %v844_v41 = vadd.f32 1.0, %v780_v9  ;;  %v5294_v32 = vand.u32 2147483647, %v5284_v49  ;;  %v5296_v33 = vmul.f32 %v3235_v30, %v1481_v26  ;;  %3240 = vpow2.f32 %v1733_v57  ;;  %v5706_v52 = vld [vmem:[#allocation52_spill] sm:$0xff]  ;;  %v5707_v9 = vld [vmem:[#allocation42_spill] sm:$0xff]  ;;  %v5731_v49 = vld [vmem:[#allocation47_spill] sm:$0xff] }
 0x2cb   :  { %v1035_v14 = vadd.f32 -1.4531521, %v971_v21  ;;  %v2198_v16 = vpack.c.bf16 %v5706_v52, %v5705_v58  ;;  %v5303_v15 = vmul.f32 %v2117_v25, %v5093_v6  ;;  %v5306_v10 = vmul.f32 %v2116_v53, %v5138_v39  ;;  %v5709_v30 = vld [vmem:[#allocation16_spill] sm:$0xff]  ;;  %v5712_v58 = vld [vmem:[#allocation55_spill] sm:$0xff] }
 0x2cc   :  { %v5300_v2 = vpop.eup %3236  ;;  %v1288_v27 = vadd.f32 -0.28449672, %v1224_v34  ;;  %3242 = vrcp.f32 %v844_v41  ;;  %v2118_v28 = vadd.f32 1.0, %v2054_v36  ;;  %v782_v37 = vmul.f32 0.3275911, %v5294_v32  ;;  %v5708_v36 = vld [vmem:[#allocation36_spill] sm:$0xff] }
 0x2cd   :  { %v1099_v40 = vmul.f32 %v5286_v51, %v1035_v14  ;;  %v973_v43 = vmul.f32 1.0614054, %v5300_v2  ;;  %2623 = vmatprep.mubr.bf16.mxu1 %v2198_v16  ;;  %v2055_v50 = vsel %vm1927_vm8, %v1863_v20, %v1991_v31  ;;  %v1226_v3 = vmul.f32 %v5248_v48, %v1162_v11  ;;  %v5710_v41 = vld [vmem:[#allocation21_spill] sm:$0xff]  ;;  %v5711_v14 = vld [vmem:[#allocation14_spill] sm:$0xff]  ;;  %v5713_v16 = vld [vmem:[#allocation15_spill] sm:$0xff] }
 0x2ce   :  { %3244 = vpow2.f32 %v1735_v22  ;;  %v1739_v6 = vmul.f32 1.442695, %v1613_v59  ;;  %v5531_v39 = vsub.f32 1.0, %v5296_v33  ;;  %v846_v25 = vadd.f32 1.0, %v782_v37 }
 0x2cf   :  { %v1163_v26 = vadd.f32 1.4214138, %v1099_v40  ;;  %v1037_v57 = vadd.f32 -1.4531521, %v973_v43  ;;  %v1352_v53 = vmul.f32 %v5231_v23, %v1288_v27  ;;  %v1548_v34 = vsub.f32 0.0, %v5280_v29  ;;  %v5714_v27 = vld [vmem:[#allocation56_spill] sm:$0xff] }
 0x2d0   :  { %v2195_v21 = vpack.c.bf16 %v5708_v36, %v5707_v9  ;;  %v2197_v35 = vpack.c.bf16 %v5710_v41, %v5709_v30  ;;  %v5321_v20 = vpop.eup %3238  ;;  %v5324_v22 = vmul.f32 %v2118_v28, %v5174_v13  ;;  %3246 = vrcp.f32 %v846_v25  ;;  %v5715_v28 = vld [vmem:[#allocation53_spill] sm:$0xff]  ;;  %v5717_v25 = vld [vmem:[#allocation54_spill] sm:$0xff] }
 0x2d1   :  { %v1227_v59 = vmul.f32 %v5286_v51, %v1163_v26  ;;  %v1101_v31 = vmul.f32 %v5300_v2, %v1037_v57  ;;  %v1290_v11 = vadd.f32 -0.28449672, %v1226_v3  ;;  %3248 = vpow2.f32 %v1739_v6  ;;  %v5716_v9 = vld [vmem:[#allocation33_spill] sm:$0xff]  ;;  %v5718_v36 = vld [vmem:[#allocation34_spill] sm:$0xff] }
 0x2d2   :  { %2527 = vmatmul.mubr.bf16.gmra.mrb[36].mxu0 %v2195_v21  ;;  %2624 = vmatmul.mubr.bf16.gmra.mrb[36].mxu1 %v2197_v35  ;;  %v2200_v52 = vpack.c.bf16 %v5712_v58, %v5711_v14  ;;  %v2202_v40 = vpack.c.bf16 %v5714_v27, %v5713_v16  ;;  %v5332_v43 = vadd.f32 1.0, %v2055_v50  ;;  %v2199_v26 = vpack.c.bf16 %v5716_v9, %v5715_v28  ;;  %v5719_v35 = vld [vmem:[#allocation59_spill] sm:$0xff]  ;;  %v5721_v14 = vld [vmem:[#allocation62_spill] sm:$0xff]  ;;  %v5723_v16 = vld [vmem:[#allocation60_spill] sm:$0xff] }
 0x2d3   :  { %v1291_v37 = vadd.f32 -0.28449672, %v1227_v59  ;;  %v1165_v13 = vadd.f32 1.4214138, %v1101_v31  ;;  %v5338_v57 = vsub.f32 0.0, %v5531_v39  ;;  %v1612_v6 = vmul.f32 %v1548_v34, %v5280_v29  ;;  %v5720_v31 = vld [vmem:[#allocation44_spill] sm:$0xff] }
 0x2d4   :  { %v1416_v3 = vadd.f32 0.2548296, %v1352_v53  ;;  %2534 = vmatprep.mubr.bf16.mxu0 %v2200_v52  ;;  %2631 = vmatprep.mubr.bf16.mxu1 %v2202_v40  ;;  %v2201_v21 = vpack.c.bf16 %v5718_v36, %v5717_v25  ;;  %v5343_v30 = vpop.eup %3240  ;;  %v2204_v59 = vpack.c.bf16 %v4673_v46, %v5719_v35  ;;  %v2206_v58 = vpack.c.bf16 %v5721_v14, %v5720_v31  ;;  %v5722_v52 = vld [vmem:[#allocation37_spill] sm:$0xff]  ;;  %v5724_v40 = vld [vmem:[#allocation18_spill] sm:$0xff]  ;;  %v5726_v46 = vld [vmem:[#allocation63_spill] sm:$0xff] }
 0x2d5   :  { %v1355_v50 = vmul.f32 %v5286_v51, %v1291_v37  ;;  %v1229_v41 = vmul.f32 %v5300_v2, %v1165_v13  ;;  %v1354_v29 = vmul.f32 %v5248_v48, %v1290_v11  ;;  %v1550_v34 = vsub.f32 0.0, %v5294_v32  ;;  %v5725_v28 = vld [vmem:[#allocation46_spill] sm:$0xff]  ;;  %v5727_v36 = vld [vmem:[#allocation24_spill] sm:$0xff]  ;;  %v5728_v14 = vld [vmem:[#allocation49_spill] sm:$0xff] }
 0x2d6   :  { %v5351_v53 = vpop.eup %3242  ;;  %v2203_v27 = vpack.c.bf16 %v5723_v16, %v5722_v52  ;;  %v2205_v37 = vpack.c.bf16 %v5725_v28, %v5724_v40  ;;  %v2208_v35 = vpack.c.bf16 %v5727_v36, %v5726_v46  ;;  %vm1929_vm9 = vcmp.ge.f32.partialorder %v5123_v7, 0.0  ;;  %v5730_v52 = vld [vmem:[#allocation51_spill] sm:$0xff] }
 0x2d7   :  { %v1419_v9 = vadd.f32 0.2548296, %v1355_v50  ;;  %v1293_v13 = vadd.f32 -0.28449672, %v1229_v41  ;;  %v972_v25 = vmul.f32 1.0614054, %v5351_v53  ;;  %v1480_v11 = vmul.f32 %v5231_v23, %v1416_v3 }
 0x2d8   :  { %v3245_v31 = vpop.eup %3244  ;;  %v2210_v39 = vpack.c.bf16 %v4918_v24, %v5728_v14  ;;  %v5732_v40 = vld [vmem:[#allocation23_spill] sm:$0xff]  ;;  %v1418_v36 = vadd.f32 0.2548296, %v1354_v29  ;;  %v1737_v38 = vmul.f32 1.442695, %v1612_v6  ;;  %v5733_v23 = vld [vmem:[#allocation26_spill] sm:$0xff] }
 0x2d9   :  { %v1483_v41 = vmul.f32 %v5286_v51, %v1419_v9  ;;  %v1357_v28 = vmul.f32 %v5300_v2, %v1293_v13  ;;  %v1036_v55 = vadd.f32 -1.4531521, %v972_v25  ;;  %v5734_v3 = vld [vmem:[#allocation25_spill] sm:$0xff]  ;;  %v1614_v13 = vmul.f32 %v1550_v34, %v5294_v32 }
 0x2da   :  { %2535 = vmatmul.mubr.bf16.gmra.mrb[40].mxu0 %v2199_v26  ;;  %2632 = vmatmul.mubr.bf16.gmra.mrb[40].mxu1 %v2201_v21  ;;  %v5378_v16 = vpop.eup %3246  ;;  %v5735_v6 = vld [vmem:[#allocation13_spill] sm:$0xff]  ;;  %v5736_v21 = vld [vmem:[#allocation32_spill] sm:$0xff]  ;;  %3250 = vpow2.f32 %v1737_v38  ;;  %v2217_v34 = vpack.c.bf16 %v5303_v15, %v5215_v18  ;;  %v1482_v14 = vmul.f32 %v5248_v48, %v1418_v36  ;;  %vm1931_vm10 = vcmp.ge.f32.partialorder %v5212_v63, 0.0 }
 0x2db   :  { %v1803_v50 = vmul.f32 %v3245_v31, %v1483_v41  ;;  %v1421_v51 = vadd.f32 0.2548296, %v1357_v28  ;;  %v1100_v9 = vmul.f32 %v5351_v53, %v1036_v55  ;;  %2542 = vmatprep.mubr.bf16.mxu0 %v2204_v59  ;;  %2639 = vmatprep.mubr.bf16.mxu1 %v2206_v58  ;;  %v3249_v29 = vpop.eup %3248  ;;  %v974_v26 = vmul.f32 1.0614054, %v5378_v16 }
 0x2dc   :  { %v1800_v31 = vmul.f32 %v5321_v20, %v1480_v11  ;;  %v2215_v58 = vpack.c.bf16 %v5276_v12, %v5160_v60  ;;  %v1741_v46 = vmul.f32 1.442695, %v1614_v13  ;;  %v587_v20 = vmul.f32 0.5, %v5200_v45 }
 0x2dd   :  { %v1867_v41 = vsub.f32 1.0, %v1803_v50  ;;  %v1485_v55 = vmul.f32 %v5300_v2, %v1421_v51  ;;  %v1164_v32 = vadd.f32 1.4214138, %v1100_v9  ;;  %v1038_v59 = vadd.f32 -1.4531521, %v974_v26 }
 0x2de   :  { %v5737_v2 = vsub.f32 1.0, %v5296_v33  ;;  %v5407_v13 = vmul.f32 %v5332_v43, %v5194_v42  ;;  %vm1933_vm11 = vcmp.ge.f32.partialorder %v5237_v1, 0.0  ;;  %v1864_v63 = vsub.f32 1.0, %v1800_v31 }
 0x2df   :  { %v1995_v28 = vsub.f32 0.0, %v1867_v41  ;;  %v1805_v25 = vmul.f32 %v3249_v29, %v1485_v55  ;;  %v1228_v24 = vmul.f32 %v5351_v53, %v1164_v32  ;;  %v1102_v38 = vmul.f32 %v5378_v16, %v1038_v59 }
 0x2e0   :  { %v2057_v11 = vsel %vm1929_vm9, %v5737_v2, %v5338_v57  ;;  %3252 = vpow2.f32 %v1741_v46  ;;  %v1802_v57 = vmul.f32 %v5343_v30, %v1482_v14  ;;  %v585_v43 = vmul.f32 0.5, %v5106_v0 }
 0x2e1   :  { %v2059_v50 = vsel %vm1931_vm10, %v1867_v41, %v1995_v28  ;;  %v1869_v51 = vsub.f32 1.0, %v1805_v25  ;;  %v1292_v9 = vadd.f32 -0.28449672, %v1228_v24  ;;  %v1166_v45 = vadd.f32 1.4214138, %v1102_v38 }
 0x2e2   :  { %v2123_v48 = vadd.f32 1.0, %v2059_v50  ;;  %2543 = vmatmul.mubr.bf16.gmra.mrb[44].mxu0 %v2203_v27  ;;  %2640 = vmatmul.mubr.bf16.gmra.mrb[44].mxu1 %v2205_v37  ;;  %v2121_v7 = vadd.f32 1.0, %v2057_v11  ;;  %v589_v27 = vmul.f32 0.5, %v5227_v47  ;;  %v1992_v31 = vsub.f32 0.0, %v1864_v63  ;;  %v5742_v50 = vld [vmem:[#allocation35_spill] sm:$0xff] }
 0x2e3   :  { %v1997_v36 = vsub.f32 0.0, %v1869_v51  ;;  %v1356_v33 = vmul.f32 %v5351_v53, %v1292_v9  ;;  %2550 = vmatprep.mubr.bf16.mxu0 %v2208_v35  ;;  %2647 = vmatprep.mubr.bf16.mxu1 %v2210_v39  ;;  %v1230_v42 = vmul.f32 %v5378_v16, %v1166_v45  ;;  %v1866_v41 = vsub.f32 1.0, %v1802_v57 }
 0x2e4   :  { %v2187_v24 = vmul.f32 %v2123_v48, %v587_v20  ;;  %v3251_v39 = vpop.eup %3250  ;;  %v2185_v46 = vmul.f32 %v2121_v7, %v585_v43  ;;  %vm1928_vm12 = vcmp.ge.f32.partialorder %v5157_v4, 0.0  ;;  %v5738_v47 = vpack.c.bf16 %v5730_v52, %v5729_v19 }
 0x2e5   :  { %v2061_v29 = vsel %vm1933_vm11, %v1869_v51, %v1997_v36  ;;  %v1420_v1 = vadd.f32 0.2548296, %v1356_v33  ;;  %v1294_v26 = vadd.f32 -0.28449672, %v1230_v42  ;;  %v5739_v32 = vpack.c.bf16 %v5732_v40, %v5731_v49 }
 0x2e6   :  { %v2125_v37 = vadd.f32 1.0, %v2061_v29  ;;  %v2219_v25 = vpack.c.bf16 %v2187_v24, %v5407_v13  ;;  %v5740_v20 = vpack.c.bf16 %v5080_v61, %v4987_v5  ;;  %v5741_v38 = vpack.c.bf16 %v5120_v62, %v5733_v23  ;;  %v5743_v61 = vld [vmem:[#allocation57_spill] sm:$0xff]  ;;  %v5749_v24 = vld [vmem:[#allocation19_spill] sm:$0xff] }
 0x2e7   :  { %v1484_v35 = vmul.f32 %v5351_v53, %v1420_v1  ;;  %v1358_v14 = vmul.f32 %v5378_v16, %v1294_v26  ;;  %v2056_v53 = vsel %vm1928_vm12, %v1864_v63, %v1992_v31  ;;  %v1994_v4 = vsub.f32 0.0, %v1866_v41  ;;  %v5746_v63 = vld [vmem:[#allocation38_spill] sm:$0xff] }
 0x2e8   :  { %v2189_v30 = vmul.f32 %v2125_v37, %v589_v27  ;;  %v2120_v11 = vadd.f32 1.0, %v2056_v53  ;;  %vm1932_vm13 = vcmp.ge.f32.partialorder %v5266_v8, 0.0  ;;  %v584_v40 = vmul.f32 0.5, %v5146_v17  ;;  %v5460_v27 = vld [vmem:[%s5497_s4] ss:$0 sm:$0xff]  ;;  %s3358_s4 = smov [#allocation8]  }
 0x2e9   :  { %v1804_v55 = vmul.f32 %v3251_v39, %v1484_v35  ;;  %v1422_v0 = vadd.f32 0.2548296, %v1358_v14  ;;  %vm1930_vm14 = vcmp.ge.f32.partialorder %v5742_v50, 0.0  ;;  %v588_v9 = vmul.f32 0.5, %v5743_v61  ;;  %s2701_s10 = sshll.u32 %s3358_s4, 4  ;;  %s2702_s10 = int_to_ptr.vmem [resolvable:$true] %s2701_s10 }
 0x2ea   :  { %2551 = vmatmul.mubr.bf16.gmra.mrb[48].mxu0 %v5738_v47  ;;  %2648 = vmatmul.mubr.bf16.gmra.mrb[48].mxu1 %v5739_v32  ;;  %v2221_v59 = vpack.c.bf16 %v2189_v30, %v2185_v46  ;;  %v3253_v19 = vpop.eup %3252  ;;  %v2058_v5 = vsel %vm1930_vm14, %v1866_v41, %v1994_v4  ;;  %v2184_v23 = vmul.f32 %v2120_v11, %v584_v40  ;;  %vm1934_vm15 = vcmp.ge.f32.partialorder %v5746_v63, 0.0  ;;  %s3320_s11 = scalar_lea.vmem %s2702_s10, 2048  ;;  %p3325_p11 = scmp.lt.s32.totalorder %s2702_s10, %s2702_s10 }
 0x2eb   :  { %v1868_v28 = vsub.f32 1.0, %v1804_v55  ;;  %2558 = vmatprep.mubr.bf16.mxu0 %v5740_v20  ;;  %2655 = vmatprep.mubr.bf16.mxu1 %v5741_v38  ;;  %v1486_v2 = vmul.f32 %v5378_v16, %v1422_v0  ;;  %v5744_v16 = vpack.c.bf16 %v5056_v54, %v5734_v3  ;;  %v5745_v8 = vpack.c.bf16 %v5736_v21, %v5735_v6  ;;  %v5750_v3 = vld [vmem:[#allocation40_spill] sm:$0xff]  ;;  %p3321_p10 = scmp.ne.s32.totalorder %s2702_s10, %s3320_s11  ;;  %p3326_p12 = scmp.lt.s32.totalorder %s3320_s11, %s3320_s11 }
 0x2ec   :  { %v2122_v17 = vadd.f32 1.0, %v2058_v5  ;;  %v5747_v36 = vpack.c.bf16 %v5306_v10, %v5218_v44  ;;  %v5748_v33 = vpack.c.bf16 %v5324_v22, %v5251_v56  ;;  %v586_v54 = vmul.f32 0.5, %v5749_v24 }
 0x2ed   :  { %v1996_v52 = vsub.f32 0.0, %v1868_v28  ;;  %v1806_v49 = vmul.f32 %v3253_v19, %v1486_v2  ;;  %v590_v42 = vmul.f32 0.5, %v5750_v3  ;;  %p3327_p13 = por %p3326_p12, %p3325_p11 }
 0x2ee   :  { %v2186_v6 = vmul.f32 %v2122_v17, %v586_v54 }
 0x2ef   :  { %v2060_v51 = vsel %vm1932_vm13, %v1868_v28, %v1996_v52  ;;  %v1870_v62 = vsub.f32 1.0, %v1806_v49  ;;  %p3328_p0 = pnand %p3327_p13, %p3321_p10 }
 0x2f0   :  { %v2124_v13 = vadd.f32 1.0, %v2060_v51 }
 0x2f1   :  { %v1998_v45 = vsub.f32 0.0, %v1870_v62 }
 0x2f2   :  { %v2188_v48 = vmul.f32 %v2124_v13, %v588_v9  ;;  %2559 = vmatmul.mubr.bf16.gmra.mrb[52].mxu0 %v5744_v16  ;;  %2656 = vmatmul.mubr.bf16.gmra.mrb[52].mxu1 %v5745_v8 }
 0x2f3   :  { %2566 = vmatprep.mubr.bf16.mxu0 %v5747_v36  ;;  %2663 = vmatprep.mubr.bf16.mxu1 %v5748_v33  ;;  %v2062_v7 = vsel %vm1934_vm15, %v1870_v62, %v1998_v45 }
 0x2f4   :  { %v2220_v57 = vpack.c.bf16 %v2188_v48, %v2184_v23  ;;  %v2126_v43 = vadd.f32 1.0, %v2062_v7 }
 0x2f6   :  { %v2190_v21 = vmul.f32 %v2126_v43, %v590_v42 }
 0x2f8   :  { %v2222_v29 = vpack.c.bf16 %v2190_v21, %v2186_v6 }
 0x2fa   :  { %2567 = vmatmul.mubr.bf16.gmra.mrb[56].mxu0 %v2215_v58  ;;  %2664 = vmatmul.mubr.bf16.gmra.mrb[56].mxu1 %v2217_v34 }
 0x2fb   :  { %2574 = vmatprep.mubr.bf16.mxu0 %v2220_v57  ;;  %2671 = vmatprep.mubr.bf16.mxu1 %v2222_v29 }
 0x302   :  { %2575 = vmatmul.mubr.bf16.gmra.mrb[60].mxu0 %v2219_v25  ;;  %2672 = vmatmul.mubr.bf16.gmra.mrb[60].mxu1 %v2221_v59 }
 0x370   :  { %v2795_v44 = vpop.f32.mrb[32].mxu0 }
 0x371   :  { %v2796_v56 = vpop.f32.mrb[33].mxu0 }
 0x372   :  { %v2797_v10 = vadd.f32 %v2796_v56, %v2795_v44  ;;  %v2798_v22 = vpop.f32.mrb[34].mxu0 }
 0x373   :  { %v2799_v1 = vpop.f32.mrb[35].mxu0 }
 0x374   :  { %v2800_v60 = vadd.f32 %v2799_v1, %v2798_v22  ;;  %v2521_v58 = vadd.f32 %v2797_v10, %v5460_v27 }
 0x376   :  { %v2524_v37 = vadd.f32 %v2800_v60, %v5460_v27 }
 0x377   :  { %v2859_v12 = vpop.f32.mrb[32].mxu1 }
 0x378   :  { %v2860_v18 = vpop.f32.mrb[33].mxu1 }
 0x379   :  { %v2861_v15 = vadd.f32 %v2860_v18, %v2859_v12  ;;  %v2862_v34 = vpop.f32.mrb[34].mxu1 }
 0x37a   :  { %v2863_v26 = vpop.f32.mrb[35].mxu1 }
 0x37b   :  { %v2618_v25 = vadd.f32 %v2861_v15, %v2521_v58  ;;  %v2864_v31 = vadd.f32 %v2863_v26, %v2862_v34 }
 0x37d   :  { %2680 = vst [vmem:[#allocation8] sm:$0xff] %v2618_v25  ;;  %v2621_v35 = vadd.f32 %v2864_v31, %v2524_v37 }
 0x37f   :  { %2681 = vst [vmem:[#allocation8 + $0x8] sm:$0xff] %v2621_v35 }
 0x3a5   :  { %v2801_v39 = vpop.f32.mrb[36].mxu0  ;;  %v2865_v46 = vpop.f32.mrb[36].mxu1 }
 0x3a6   :  { %v2802_v41 = vpop.f32.mrb[37].mxu0  ;;  %v2866_v30 = vpop.f32.mrb[37].mxu1 }
 0x3a7   :  { %v2803_v14 = vadd.f32 %v2802_v41, %v2801_v39  ;;  %v2867_v55 = vadd.f32 %v2866_v30, %v2865_v46  ;;  %v2804_v0 = vpop.f32.mrb[38].mxu0  ;;  %v2868_v47 = vpop.f32.mrb[38].mxu1 }
 0x3a8   :  { %v2805_v32 = vpop.f32.mrb[39].mxu0  ;;  %v2869_v59 = vpop.f32.mrb[39].mxu1 }
 0x3a9   :  { %v2529_v53 = vadd.f32 %v2803_v14, %v5460_v27  ;;  %v2806_v28 = vadd.f32 %v2805_v32, %v2804_v0  ;;  %v2870_v20 = vadd.f32 %v2869_v59, %v2868_v47 }
 0x3ab   :  { %v2626_v38 = vadd.f32 %v2867_v55, %v2529_v53  ;;  %v2532_v4 = vadd.f32 %v2806_v28, %v5460_v27 }
 0x3ad   :  { %2682 = vst [vmem:[#allocation8 + $0x10] sm:$0xff] %v2626_v38  ;;  %v2629_v2 = vadd.f32 %v2870_v20, %v2532_v4  ;;  %v2807_v19 = vpop.f32.mrb[40].mxu0  ;;  %v2871_v52 = vpop.f32.mrb[40].mxu1 }
 0x3ae   :  { %v2808_v11 = vpop.f32.mrb[41].mxu0  ;;  %v2872_v49 = vpop.f32.mrb[41].mxu1 }
 0x3af   :  { %2683 = vst [vmem:[#allocation8 + $0x18] sm:$0xff] %v2629_v2  ;;  %v2809_v40 = vadd.f32 %v2808_v11, %v2807_v19  ;;  %v2873_v50 = vadd.f32 %v2872_v49, %v2871_v52  ;;  %v2810_v51 = vpop.f32.mrb[42].mxu0  ;;  %v2874_v5 = vpop.f32.mrb[42].mxu1 }
 0x3b0   :  { %v2811_v61 = vpop.f32.mrb[43].mxu0  ;;  %v2875_v9 = vpop.f32.mrb[43].mxu1 }
 0x3b1   :  { %v2537_v13 = vadd.f32 %v2809_v40, %v5460_v27  ;;  %v2812_v62 = vadd.f32 %v2811_v61, %v2810_v51  ;;  %v2876_v23 = vadd.f32 %v2875_v9, %v2874_v5 }
 0x3b3   :  { %v2634_v48 = vadd.f32 %v2873_v50, %v2537_v13  ;;  %v2540_v45 = vadd.f32 %v2812_v62, %v5460_v27 }
 0x3b5   :  { %2684 = vst [vmem:[#allocation8 + $0x20] sm:$0xff] %v2634_v48  ;;  %v2637_v16 = vadd.f32 %v2876_v23, %v2540_v45  ;;  %v2813_v8 = vpop.f32.mrb[44].mxu0  ;;  %v2877_v17 = vpop.f32.mrb[44].mxu1 }
 0x3b6   :  { %v2814_v63 = vpop.f32.mrb[45].mxu0  ;;  %v2878_v36 = vpop.f32.mrb[45].mxu1 }
 0x3b7   :  { %2685 = vst [vmem:[#allocation8 + $0x28] sm:$0xff] %v2637_v16  ;;  %v2815_v33 = vadd.f32 %v2814_v63, %v2813_v8  ;;  %v2879_v7 = vadd.f32 %v2878_v36, %v2877_v17  ;;  %v2816_v57 = vpop.f32.mrb[46].mxu0  ;;  %v2880_v24 = vpop.f32.mrb[46].mxu1 }
 0x3b8   :  { %v2817_v54 = vpop.f32.mrb[47].mxu0  ;;  %v2881_v3 = vpop.f32.mrb[47].mxu1 }
 0x3b9   :  { %v2545_v42 = vadd.f32 %v2815_v33, %v5460_v27  ;;  %v2818_v43 = vadd.f32 %v2817_v54, %v2816_v57  ;;  %v2882_v6 = vadd.f32 %v2881_v3, %v2880_v24 }
 0x3bb   :  { %v2642_v21 = vadd.f32 %v2879_v7, %v2545_v42  ;;  %v2548_v29 = vadd.f32 %v2818_v43, %v5460_v27 }
 0x3bd   :  { %2686 = vst [vmem:[#allocation8 + $0x30] sm:$0xff] %v2642_v21  ;;  %v2645_v44 = vadd.f32 %v2882_v6, %v2548_v29  ;;  %v2819_v56 = vpop.f32.mrb[48].mxu0  ;;  %v2883_v10 = vpop.f32.mrb[48].mxu1 }
 0x3be   :  { %v2820_v22 = vpop.f32.mrb[49].mxu0  ;;  %v2884_v1 = vpop.f32.mrb[49].mxu1 }
 0x3bf   :  { %2687 = vst [vmem:[#allocation8 + $0x38] sm:$0xff] %v2645_v44  ;;  %v2821_v60 = vadd.f32 %v2820_v22, %v2819_v56  ;;  %v2885_v12 = vadd.f32 %v2884_v1, %v2883_v10  ;;  %v2822_v58 = vpop.f32.mrb[50].mxu0  ;;  %v2886_v18 = vpop.f32.mrb[50].mxu1 }
 0x3c0   :  { %v2823_v15 = vpop.f32.mrb[51].mxu0  ;;  %v2887_v34 = vpop.f32.mrb[51].mxu1 }
 0x3c1   :  { %v2553_v37 = vadd.f32 %v2821_v60, %v5460_v27  ;;  %v2824_v26 = vadd.f32 %v2823_v15, %v2822_v58  ;;  %v2888_v25 = vadd.f32 %v2887_v34, %v2886_v18 }
 0x3c3   :  { %v2650_v31 = vadd.f32 %v2885_v12, %v2553_v37  ;;  %v2556_v35 = vadd.f32 %v2824_v26, %v5460_v27 }
 0x3c5   :  { %2688 = vst [vmem:[#allocation8 + $0x40] sm:$0xff] %v2650_v31  ;;  %v2653_v39 = vadd.f32 %v2888_v25, %v2556_v35  ;;  %v2825_v46 = vpop.f32.mrb[52].mxu0  ;;  %v2889_v41 = vpop.f32.mrb[52].mxu1 }
 0x3c6   :  { %v2826_v30 = vpop.f32.mrb[53].mxu0  ;;  %v2890_v14 = vpop.f32.mrb[53].mxu1 }
 0x3c7   :  { %2689 = vst [vmem:[#allocation8 + $0x48] sm:$0xff] %v2653_v39  ;;  %v2827_v55 = vadd.f32 %v2826_v30, %v2825_v46  ;;  %v2891_v0 = vadd.f32 %v2890_v14, %v2889_v41  ;;  %v2828_v47 = vpop.f32.mrb[54].mxu0  ;;  %v2892_v32 = vpop.f32.mrb[54].mxu1 }
 0x3c8   :  { %v2829_v59 = vpop.f32.mrb[55].mxu0  ;;  %v2893_v53 = vpop.f32.mrb[55].mxu1 }
 0x3c9   :  { %v2561_v28 = vadd.f32 %v2827_v55, %v5460_v27  ;;  %v2830_v20 = vadd.f32 %v2829_v59, %v2828_v47  ;;  %v2894_v38 = vadd.f32 %v2893_v53, %v2892_v32 }
 0x3cb   :  { %v2658_v4 = vadd.f32 %v2891_v0, %v2561_v28  ;;  %v2564_v2 = vadd.f32 %v2830_v20, %v5460_v27 }
 0x3cd   :  { %2690 = vst [vmem:[#allocation8 + $0x50] sm:$0xff] %v2658_v4  ;;  %v2661_v19 = vadd.f32 %v2894_v38, %v2564_v2  ;;  %v2831_v52 = vpop.f32.mrb[56].mxu0  ;;  %v2895_v11 = vpop.f32.mrb[56].mxu1 }
 0x3ce   :  { %v2832_v49 = vpop.f32.mrb[57].mxu0  ;;  %v2896_v40 = vpop.f32.mrb[57].mxu1 }
 0x3cf   :  { %2691 = vst [vmem:[#allocation8 + $0x58] sm:$0xff] %v2661_v19  ;;  %v2833_v50 = vadd.f32 %v2832_v49, %v2831_v52  ;;  %v2897_v51 = vadd.f32 %v2896_v40, %v2895_v11  ;;  %v2834_v5 = vpop.f32.mrb[58].mxu0  ;;  %v2898_v61 = vpop.f32.mrb[58].mxu1 }
 0x3d0   :  { %v2835_v9 = vpop.f32.mrb[59].mxu0  ;;  %v2899_v13 = vpop.f32.mrb[59].mxu1 }
 0x3d1   :  { %v2569_v62 = vadd.f32 %v2833_v50, %v5460_v27  ;;  %v2836_v23 = vadd.f32 %v2835_v9, %v2834_v5  ;;  %v2900_v48 = vadd.f32 %v2899_v13, %v2898_v61 }
 0x3d3   :  { %v2666_v45 = vadd.f32 %v2897_v51, %v2569_v62  ;;  %v2572_v16 = vadd.f32 %v2836_v23, %v5460_v27 }
 0x3d5   :  { %2692 = vst [vmem:[#allocation8 + $0x60] sm:$0xff] %v2666_v45  ;;  %v2669_v8 = vadd.f32 %v2900_v48, %v2572_v16  ;;  %v2837_v17 = vpop.f32.mrb[60].mxu0  ;;  %v2901_v63 = vpop.f32.mrb[60].mxu1 }
 0x3d6   :  { %v2838_v36 = vpop.f32.mrb[61].mxu0  ;;  %v2902_v33 = vpop.f32.mrb[61].mxu1 }
 0x3d7   :  { %2693 = vst [vmem:[#allocation8 + $0x68] sm:$0xff] %v2669_v8  ;;  %v2839_v7 = vadd.f32 %v2838_v36, %v2837_v17  ;;  %v2903_v57 = vadd.f32 %v2902_v33, %v2901_v63  ;;  %v2840_v24 = vpop.f32.mrb[62].mxu0  ;;  %v2904_v54 = vpop.f32.mrb[62].mxu1 }
 0x3d8   :  { %v2841_v3 = vpop.f32.mrb[63].mxu0  ;;  %v2905_v42 = vpop.f32.mrb[63].mxu1 }
 0x3d9   :  { %v2577_v43 = vadd.f32 %v2839_v7, %v5460_v27  ;;  %v2842_v6 = vadd.f32 %v2841_v3, %v2840_v24  ;;  %v2906_v21 = vadd.f32 %v2905_v42, %v2904_v54 }
 0x3db   :  { %v2674_v29 = vadd.f32 %v2903_v57, %v2577_v43  ;;  %v2580_v44 = vadd.f32 %v2842_v6, %v5460_v27 }
 0x3dd   :  { %2694 = vst [vmem:[#allocation8 + $0x70] sm:$0xff] %v2674_v29  ;;  %v2677_v56 = vadd.f32 %v2906_v21, %v2580_v44 }
 0x3df   :  { %2695 = vst [vmem:[#allocation8 + $0x78] sm:$0xff] %v2677_v56 }
 0x3e0   :  { %3331 = shalt.err (!%p3328_p0)
}
 0x3e1   :  { %s3332_s14 = scalar_lea.hbm %s5498_s5, 2048 }
 0x3e2   :  { %p3333_p1 = scmp.ne.s32.totalorder %s5498_s5, %s3332_s14  ;;  %p3336_p2 = scmp.lt.u32.totalorder %s3332_s14, %s5498_s5 }
 0x3e4   :  { %p3338_p3 = pnand %p3336_p2, %p3333_p1 }
 0x3e6   :  { %3341 = shalt.err (!%p3338_p3)
}
 0x3e7   :  { %2707 = dma.vmem_to_hbm [thread:$0]  %s2702_s10, 2048, %s5498_s5, [#allocation4], %s3352_s1, %s3352_s1, %s3353_s17  }
 0x3e8   :  { %3346 = dma.done.wait [#allocation4], 2048  }
 0x3e9   :  { %3347 = vsyncadd [#allocation4], 4294965248 }
 0x3ea   :  { %2711 = vsyncpa [#allocation3], 1 }
 0x3eb   :  { %2712 = vsyncpa [#allocation6], 1 }
 0x3ec   :  { %2713 = vsyncpa [#allocation4], 1 }

</bundles_post_ra>
